<compile_context>
chip_gen: v5e
topology: v5e:2x2
jax: 0.10.0
libtpu: 0.0.40
codegen_flags: <defaults>
</compile_context>

<pallas_src>
import functools

import numpy as np

import jax
import jax.numpy as jnp
from jax.experimental import pallas as pl
from jax.experimental.pallas import tpu as pltpu


# ----------------------------------------------------------------------------
# Architecture constants (inferred modelV3)
# ----------------------------------------------------------------------------
C_IN = 3
C0P = 8           # input channels padded 3 -> 8  (K multiple of 8)
C_E1 = 32
C_E2 = 64
C_D1 = 32
C_D2 = 3
C_D2P = 8         # dec2 output channels padded 3 -> 8 (lane-dense packing)
NUM_CLASSES = 10
CLS_PAD = 128     # classifier logits padded 10 -> 128 (lane-dense HBM store)


# ----------------------------------------------------------------------------
# Weight packing: convs as precomputed block-Toeplitz "row matrices"
# ----------------------------------------------------------------------------
def _conv_row_matrix(w, wp, wo, c_in_pad):
    """Stride-2 3x3 conv (pad 1) as a [3*wp*c_in_pad, wo*c_out] matrix.

    LHS row layout : ki*(wp*c_in_pad) + wq*c_in_pad + ci   (wq = padded input col)
    Col layout     : n*c_out + co                          (n  = output col)
    w: PyTorch Conv2d weight [c_out, c_in, 3, 3].
    """
    c_out, c_in = w.shape[0], w.shape[1]
    wpad = jnp.pad(w.astype(jnp.float32),
                   ((0, 0), (0, c_in_pad - c_in), (0, 0), (0, 0)))
    blocks = []
    for ki in range(3):
        acc = jnp.zeros((wp * c_in_pad, wo * c_out), jnp.float32)
        for kj in range(3):
            sel = np.zeros((wp, wo), np.float32)
            for n in range(wo):
                sel[2 * n + kj, n] = 1.0            # output col n uses padded col 2n+kj
            acc = acc + jnp.kron(jnp.asarray(sel), wpad[:, :, ki, kj].T)
        blocks.append(acc)
    return jnp.concatenate(blocks, axis=0)


def _convT_row_matrices(w, wi, c_out_pad):
    """ConvTranspose2d(k3, s2, p1, op1), phase decomposed into two row matrices.

    out_rows(2m, 2m+1) = act( X[m] @ A + X[m+1] @ B + bias ),
    X row layout: n*c_in + ci over the (right-zero-padded) input row (n in [0, wi]).
    Output column layout: r*(2*wi*c_out_pad) + ow*c_out_pad + co, r in {0,1}.
    w: PyTorch ConvTranspose2d weight [c_in, c_out, 3, 3].
    """
    c_in, c_out = w.shape[0], w.shape[1]
    wpad = jnp.pad(w.astype(jnp.float32),
                   ((0, 0), (0, c_out_pad - c_out), (0, 0), (0, 0)))
    wp, wo = wi + 1, 2 * wi

    def sel(dn, pw):
        m = np.zeros((wp, wo), np.float32)
        for n in range(wi):
            m[n + dn, 2 * n + pw] = 1.0
        return jnp.asarray(m)

    taps = ((0, 0, 1), (0, 1, 2), (1, 1, 0))   # (dn, output-col parity, kw)

    def build(kh_by_r):
        cols = []
        for r in (0, 1):
            acc = jnp.zeros((wp * c_in, wo * c_out_pad), jnp.float32)
            if r in kh_by_r:
                kh = kh_by_r[r]
                for dn, pw, kw in taps:
                    acc = acc + jnp.kron(sel(dn, pw), wpad[:, :, kh, kw])
            cols.append(acc)
        return jnp.concatenate(cols, axis=1)

    return build({0: 1, 1: 2}), build({1: 0})   # A (row m), B (row m+1)


def pack_params(params, height=16, width=16):
    """One-time conversion of PyTorch-layout params to kernel-ready matrices."""
    assert height % 4 == 0 and width % 4 == 0
    h1, w1 = height // 2, width // 2
    h2, w2 = h1 // 2, w1 // 2
    bf = jnp.bfloat16
    f32 = jnp.float32
    p = {}
    p["w1"] = _conv_row_matrix(params["enc1_w"], width + 2, w1, C0P).astype(bf)
    p["b1"] = jnp.tile(params["enc1_b"], w1).reshape(1, -1).astype(f32)
    p["w2"] = _conv_row_matrix(params["enc2_w"], w1 + 2, w2, C_E1).astype(bf)
    p["b2"] = jnp.tile(params["enc2_b"], w2).reshape(1, -1).astype(f32)
    wd1a, wd1b = _convT_row_matrices(params["dec1_w"], w2, C_D1)
    p["wd1a"], p["wd1b"] = wd1a.astype(bf), wd1b.astype(bf)
    p["bd1"] = jnp.tile(params["dec1_b"], 2 * w1).reshape(1, -1).astype(f32)
    wd2a, wd2b = _convT_row_matrices(params["dec2_w"], w1, C_D2P)
    p["wd2a"], p["wd2b"] = wd2a.astype(bf), wd2b.astype(bf)
    bd2 = jnp.pad(params["dec2_b"], (0, C_D2P - C_D2))
    p["bd2"] = jnp.tile(bd2, 2 * width).reshape(1, -1).astype(f32)
    # classifier: fold the 1/(h2*w2) global-average-pool and the width grouping
    # into the weight; pad the class dim to 128 lanes.
    wc = jnp.tile(params["cls_w"].T / float(h2 * w2), (w2, 1))     # [w2*64, ncls]
    p["wc"] = jnp.pad(wc, ((0, 0), (0, CLS_PAD - NUM_CLASSES))).astype(bf)
    p["bc"] = jnp.pad(params["cls_b"], (0, CLS_PAD - NUM_CLASSES)).reshape(1, -1).astype(f32)
    return p


# ----------------------------------------------------------------------------
# The fused kernel (one grid step == one image; everything stays in VMEM)
# ----------------------------------------------------------------------------
def _make_kernel(height, width):
    h1, w1 = height // 2, width // 2
    h2, w2 = h1 // 2, w1 // 2
    lw0 = (width + 2) * C0P          # x0   row lanes (padded input)
    lw1 = (w1 + 2) * C_E1            # x1p  row lanes (enc1 out, pad 1 each side)
    n1 = w1 * C_E1
    n2 = w2 * C_E2
    nd1 = 2 * w1 * C_D1              # dec1: two interleaved output rows
    nd2 = 2 * width * C_D2P          # dec2: two interleaved output rows

    def kernel(x0_ref,
               w1_ref, b1_ref, w2_ref, b2_ref,
               wd1a_ref, wd1b_ref, bd1_ref,
               wd2a_ref, wd2b_ref, bd2_ref,
               wc_ref, bc_ref,
               cls_ref, dec_ref,
               x1p_ref, x2p_ref, x3p_ref, l1_ref, l2_ref):
        bf16 = jnp.bfloat16
        f32 = jnp.float32

        # zero the padded activation scratch (borders must read as zero)
        x1p_ref[...] = jnp.zeros(x1p_ref.shape, x1p_ref.dtype)
        x2p_ref[...] = jnp.zeros(x2p_ref.shape, x2p_ref.dtype)
        x3p_ref[...] = jnp.zeros(x3p_ref.shape, x3p_ref.dtype)

        # ---- enc1: Conv2d(3->32, k3, s2, p1) + ReLU -------------------------
        for m in range(h1):
            for ki in range(3):
                r = 2 * m + ki
                l1_ref[m:m + 1, ki * lw0:(ki + 1) * lw0] = x0_ref[0, r:r + 1, :]
        y1 = jnp.dot(l1_ref[...].astype(bf16), w1_ref[...],
                     preferred_element_type=f32)                     # [h1, n1]
        y1 = jnp.maximum(y1 + b1_ref[...], 0.0)
        for m in range(h1):                                          # interior of x1p
            x1p_ref[1 + m:2 + m, C_E1:C_E1 + n1] = y1[m:m + 1, :]

        # ---- enc2: Conv2d(32->64, k3, s2, p1) + ReLU ------------------------
        for m in range(h2):
            for ki in range(3):
                r = 2 * m + ki
                l2_ref[m:m + 1, ki * lw1:(ki + 1) * lw1] = x1p_ref[r:r + 1, :]
        y2 = jnp.dot(l2_ref[...].astype(bf16), w2_ref[...],
                     preferred_element_type=f32)                     # [h2, n2]
        y2 = jnp.maximum(y2 + b2_ref[...], 0.0)                      # x_enc rows
        x2p_ref[0:h2, 0:n2] = y2

        # ---- classifier: global-avg-pool + Linear (pool folded into wc) ----
        pooled_sum = jnp.sum(y2, axis=0, keepdims=True)              # [1, n2]
        cls = jnp.dot(pooled_sum.astype(bf16), wc_ref[...],
                      preferred_element_type=f32) + bc_ref[...]      # [1, 128]
        cls_ref[0, :, :] = cls

        # ---- dec1: ConvTranspose2d(64->32, k3, s2, p1, op1) + ReLU ----------
        x2 = x2p_ref[...]
        ra = jnp.dot(x2[0:h2, :].astype(bf16), wd1a_ref[...],
                     preferred_element_type=f32)
        rb = jnp.dot(x2[1:h2 + 1, :].astype(bf16), wd1b_ref[...],
                     preferred_element_type=f32)
        yd1 = jnp.maximum(ra + rb + bd1_ref[...], 0.0)               # [h2, nd1]
        half = nd1 // 2
        for m in range(h2):                                          # interleave rows
            x3p_ref[2 * m:2 * m + 1, 0:half] = yd1[m:m + 1, 0:half]
            x3p_ref[2 * m + 1:2 * m + 2, 0:half] = yd1[m:m + 1, half:nd1]

        # ---- dec2: ConvTranspose2d(32->3, k3, s2, p1, op1) + Sigmoid --------
        x3 = x3p_ref[...]
        ra2 = jnp.dot(x3[0:h1, :].astype(bf16), wd2a_ref[...],
                      preferred_element_type=f32)
        rb2 = jnp.dot(x3[1:h1 + 1, :].astype(bf16), wd2b_ref[...],
                      preferred_element_type=f32)
        dec_ref[...] = jax.nn.sigmoid(ra2 + rb2 + bd2_ref[...])      # [h1, nd2]

    return kernel


def model_v3_forward(packed, x):
    """x: NCHW float32 image batch -> (x_cls [B, 10], x_dec [B, 3, H, W])."""
    b, c, height, width = x.shape
    h1, w1 = height // 2, width // 2
    h2, w2 = h1 // 2, w1 // 2
    lw0 = (width + 2) * C0P
    lw1 = (w1 + 2) * C_E1
    lw2 = (w2 + 1) * C_E2
    lw3 = (w1 + 1) * C_D1
    nd2 = 2 * width * C_D2P

    # pack the image: NCHW -> NHWC, pad channels 3->8, pad H/W by 1, fold W into lanes
    xn = jnp.transpose(x, (0, 2, 3, 1))
    xn = jnp.pad(xn, ((0, 0), (1, 1), (1, 1), (0, C0P - c)))
    x0 = xn.reshape(b, height + 2, lw0).astype(jnp.float32)

    const2d = lambda i: (0, 0)
    cls_p, dec_p = pl.pallas_call(
        _make_kernel(height, width),
        out_shape=(
            jax.ShapeDtypeStruct((b, 1, CLS_PAD), jnp.float32),      # logits (padded)
            jax.ShapeDtypeStruct((b * h1, nd2), jnp.float32),        # packed image
        ),
        grid=(b,),
        in_specs=[
            pl.BlockSpec((1, height + 2, lw0), lambda i: (i, 0, 0)),
            pl.BlockSpec(packed["w1"].shape, const2d),
            pl.BlockSpec(packed["b1"].shape, const2d),
            pl.BlockSpec(packed["w2"].shape, const2d),
            pl.BlockSpec(packed["b2"].shape, const2d),
            pl.BlockSpec(packed["wd1a"].shape, const2d),
            pl.BlockSpec(packed["wd1b"].shape, const2d),
            pl.BlockSpec(packed["bd1"].shape, const2d),
            pl.BlockSpec(packed["wd2a"].shape, const2d),
            pl.BlockSpec(packed["wd2b"].shape, const2d),
            pl.BlockSpec(packed["bd2"].shape, const2d),
            pl.BlockSpec(packed["wc"].shape, const2d),
            pl.BlockSpec(packed["bc"].shape, const2d),
        ],
        out_specs=(
            pl.BlockSpec((1, 1, CLS_PAD), lambda i: (i, 0, 0)),
            pl.BlockSpec((h1, nd2), lambda i: (i, 0)),
        ),
        scratch_shapes=[
            pltpu.VMEM((h1 + 2, lw1), jnp.float32),   # enc1 out, padded (enc2 input)
            pltpu.VMEM((h2 + 1, lw2), jnp.float32),   # x_enc, padded (dec1 input)
            pltpu.VMEM((h1 + 1, lw3), jnp.float32),   # dec1 out, padded (dec2 input)
            pltpu.VMEM((h1, 3 * lw0), jnp.float32),   # enc1 row-im2col
            pltpu.VMEM((h2, 3 * lw1), jnp.float32),   # enc2 row-im2col
        ],
        compiler_params=pltpu.CompilerParams(
            dimension_semantics=("parallel",),        # batch shards across v7x cores
        ),
    )(x0, packed["w1"], packed["b1"], packed["w2"], packed["b2"],
      packed["wd1a"], packed["wd1b"], packed["bd1"],
      packed["wd2a"], packed["wd2b"], packed["bd2"],
      packed["wc"], packed["bc"])

    x_cls = cls_p[:, 0, :NUM_CLASSES]
    d = dec_p.reshape(b, h1, 2, width, C_D2P).reshape(b, height, width, C_D2P)
    x_dec = jnp.transpose(d[..., :C_D2], (0, 3, 1, 2))
    return x_cls, x_dec


# ----------------------------------------------------------------------------
# Deterministic params (PyTorch layouts) and a pure-JAX reference
# ----------------------------------------------------------------------------
def init_params(key, in_ch=C_IN, num_classes=NUM_CLASSES):
    ks = jax.random.split(key, 6)

    def w_init(k, shape):
        fan_in = 1
        for s in shape[1:]:
            fan_in *= s
        return jax.random.normal(k, shape, jnp.float32) / jnp.sqrt(float(fan_in))

    return {
        "enc1_w": w_init(ks[0], (C_E1, in_ch, 3, 3)),      # Conv2d  [out, in, kh, kw]
        "enc1_b": jnp.zeros((C_E1,), jnp.float32),
        "enc2_w": w_init(ks[1], (C_E2, C_E1, 3, 3)),
        "enc2_b": jnp.zeros((C_E2,), jnp.float32),
        "dec1_w": w_init(ks[2], (C_E2, C_D1, 3, 3)),       # ConvT  [in, out, kh, kw]
        "dec1_b": jnp.zeros((C_D1,), jnp.float32),
        "dec2_w": w_init(ks[3], (C_D1, in_ch, 3, 3)),
        "dec2_b": jnp.zeros((in_ch,), jnp.float32),
        "cls_w": w_init(ks[4], (num_classes, C_E2)),       # Linear [out, in]
        "cls_b": jnp.zeros((num_classes,), jnp.float32),
    }


def _reference_forward(params, x):
    """Pure-JAX (XLA conv) reference of the same inferred architecture."""
    dn = ("NCHW", "OIHW", "NCHW")
    h = jax.lax.conv_general_dilated(x, params["enc1_w"], (2, 2),
                                     ((1, 1), (1, 1)), dimension_numbers=dn)
    h = jax.nn.relu(h + params["enc1_b"][None, :, None, None])
    e = jax.lax.conv_general_dilated(h, params["enc2_w"], (2, 2),
                                     ((1, 1), (1, 1)), dimension_numbers=dn)
    e = jax.nn.relu(e + params["enc2_b"][None, :, None, None])

    def convT(z, w, bias):   # stride 2, pad 1, output_padding 1
        wf = jnp.flip(w, (2, 3)).transpose(1, 0, 2, 3)
        y = jax.lax.conv_general_dilated(z, wf, (1, 1), ((1, 2), (1, 2)),
                                         lhs_dilation=(2, 2), dimension_numbers=dn)
        return y + bias[None, :, None, None]

    d1 = jax.nn.relu(convT(e, params["dec1_w"], params["dec1_b"]))
    d2 = jax.nn.sigmoid(convT(d1, params["dec2_w"], params["dec2_b"]))
    pooled = e.mean(axis=(2, 3))
    cls = pooled @ params["cls_w"].T + params["cls_b"]
    return cls, d2


# ----------------------------------------------------------------------------
if __name__ == "__main__":
    key = jax.random.PRNGKey(0)
    k_param, k_x = jax.random.split(key)
    params = init_params(k_param)
    packed = pack_params(params, height=16, width=16)     # one-time weight packing
    x = jax.random.uniform(k_x, (2, 3, 16, 16), jnp.float32)

    forward = jax.jit(model_v3_forward)
    x_cls, x_dec = forward(packed, x)
    jax.block_until_ready((x_cls, x_dec))

    assert x_cls.shape == (2, NUM_CLASSES), x_cls.shape
    assert x_dec.shape == (2, 3, 16, 16), x_dec.shape

    # numerical sanity check vs. the pure-JAX reference (bf16 MXU operands -> loose tol)
    ref_cls, ref_dec = _reference_forward(params, x)
    assert jnp.allclose(x_cls, ref_cls, atol=5e-2, rtol=5e-2), \
        float(jnp.max(jnp.abs(x_cls - ref_cls)))
    assert jnp.allclose(x_dec, ref_dec, atol=5e-2, rtol=5e-2), \
        float(jnp.max(jnp.abs(x_dec - ref_dec)))

    print("KERNEL_OK")
</pallas_src>

<mosaic_0001>
module attributes {stable_mosaic.version = 11 : i64} {
  func.func @kernel(%arg0: i32, %arg1: memref<1x18x144xf32, #tpu.memory_space<vmem>>, %arg2: memref<432x256xbf16, #tpu.memory_space<vmem>>, %arg3: memref<1x256xf32, #tpu.memory_space<vmem>>, %arg4: memref<960x256xbf16, #tpu.memory_space<vmem>>, %arg5: memref<1x256xf32, #tpu.memory_space<vmem>>, %arg6: memref<320x512xbf16, #tpu.memory_space<vmem>>, %arg7: memref<320x512xbf16, #tpu.memory_space<vmem>>, %arg8: memref<1x512xf32, #tpu.memory_space<vmem>>, %arg9: memref<288x256xbf16, #tpu.memory_space<vmem>>, %arg10: memref<288x256xbf16, #tpu.memory_space<vmem>>, %arg11: memref<1x256xf32, #tpu.memory_space<vmem>>, %arg12: memref<256x128xbf16, #tpu.memory_space<vmem>>, %arg13: memref<1x128xf32, #tpu.memory_space<vmem>>, %arg14: memref<1x1x128xf32, #tpu.memory_space<vmem>>, %arg15: memref<8x256xf32, #tpu.memory_space<vmem>>, %arg16: memref<10x320xf32, #tpu.memory_space<vmem>>, %arg17: memref<5x320xf32, #tpu.memory_space<vmem>>, %arg18: memref<9x288xf32, #tpu.memory_space<vmem>>, %arg19: memref<8x432xf32, #tpu.memory_space<vmem>>, %arg20: memref<4x960xf32, #tpu.memory_space<vmem>>) attributes {dimension_semantics = [#tpu.dimension_semantics<parallel>], iteration_bounds = array<i64: 2>, scalar_prefetch = 0 : i64, scratch_operands = 5 : i64, tpu.core_type = #tpu.core_type<tc>, window_params = [{transform_indices = @transform_0, window_bounds = array<i64: 1, 18, 144>}, {pipeline_mode = #tpu.pipeline_mode<synchronous>, transform_indices = @transform_1, window_bounds = array<i64: 432, 256>}, {pipeline_mode = #tpu.pipeline_mode<synchronous>, transform_indices = @transform_2, window_bounds = array<i64: 1, 256>}, {pipeline_mode = #tpu.pipeline_mode<synchronous>, transform_indices = @transform_3, window_bounds = array<i64: 960, 256>}, {pipeline_mode = #tpu.pipeline_mode<synchronous>, transform_indices = @transform_4, window_bounds = array<i64: 1, 256>}, {pipeline_mode = #tpu.pipeline_mode<synchronous>, transform_indices = @transform_5, window_bounds = array<i64: 320, 512>}, {pipeline_mode = #tpu.pipeline_mode<synchronous>, transform_indices = @transform_6, window_bounds = array<i64: 320, 512>}, {pipeline_mode = #tpu.pipeline_mode<synchronous>, transform_indices = @transform_7, window_bounds = array<i64: 1, 512>}, {pipeline_mode = #tpu.pipeline_mode<synchronous>, transform_indices = @transform_8, window_bounds = array<i64: 288, 256>}, {pipeline_mode = #tpu.pipeline_mode<synchronous>, transform_indices = @transform_9, window_bounds = array<i64: 288, 256>}, {pipeline_mode = #tpu.pipeline_mode<synchronous>, transform_indices = @transform_10, window_bounds = array<i64: 1, 256>}, {pipeline_mode = #tpu.pipeline_mode<synchronous>, transform_indices = @transform_11, window_bounds = array<i64: 256, 128>}, {pipeline_mode = #tpu.pipeline_mode<synchronous>, transform_indices = @transform_12, window_bounds = array<i64: 1, 128>}, {transform_indices = @transform_13, window_bounds = array<i64: 1, 1, 128>}, {transform_indices = @transform_14, window_bounds = array<i64: 8, 256>}]} {
    %cst = arith.constant 0.000000e+00 : f32
    %0 = vector.broadcast %cst : f32 to vector<10x320xf32>
    %c0 = arith.constant 0 : index
    %c0_0 = arith.constant 0 : index
    %1 = vector.load %arg16[%c0, %c0_0] : memref<10x320xf32, #tpu.memory_space<vmem>>, vector<10x320xf32>
    tpu.vector_store %arg16[%c0, %c0_0], %0 {strides = array<i32>} : memref<10x320xf32, #tpu.memory_space<vmem>>, vector<10x320xf32>,
    %cst_1 = arith.constant 0.000000e+00 : f32
    %2 = vector.broadcast %cst_1 : f32 to vector<5x320xf32>
    %c0_2 = arith.constant 0 : index
    %c0_3 = arith.constant 0 : index
    %3 = vector.load %arg17[%c0_2, %c0_3] : memref<5x320xf32, #tpu.memory_space<vmem>>, vector<5x320xf32>
    tpu.vector_store %arg17[%c0_2, %c0_3], %2 {strides = array<i32>} : memref<5x320xf32, #tpu.memory_space<vmem>>, vector<5x320xf32>,
    %cst_4 = arith.constant 0.000000e+00 : f32
    %4 = vector.broadcast %cst_4 : f32 to vector<9x288xf32>
    %c0_5 = arith.constant 0 : index
    %c0_6 = arith.constant 0 : index
    %5 = vector.load %arg18[%c0_5, %c0_6] : memref<9x288xf32, #tpu.memory_space<vmem>>, vector<9x288xf32>
    tpu.vector_store %arg18[%c0_5, %c0_6], %4 {strides = array<i32>} : memref<9x288xf32, #tpu.memory_space<vmem>>, vector<9x288xf32>,
    %c0_7 = arith.constant 0 : index
    %c0_8 = arith.constant 0 : index
    %c0_9 = arith.constant 0 : index
    %6 = vector.load %arg1[%c0_7, %c0_8, %c0_9] : memref<1x18x144xf32, #tpu.memory_space<vmem>>, vector<1x1x144xf32>
    %7 = vector.shape_cast %6 : vector<1x1x144xf32> to vector<1x144xf32>
    %c0_10 = arith.constant 0 : index
    %c0_11 = arith.constant 0 : index
    %8 = vector.load %arg19[%c0_10, %c0_11] : memref<8x432xf32, #tpu.memory_space<vmem>>, vector<1x144xf32>
    tpu.vector_store %arg19[%c0_10, %c0_11], %7 {strides = array<i32>} : memref<8x432xf32, #tpu.memory_space<vmem>>, vector<1x144xf32>,
    %c0_12 = arith.constant 0 : index
    %c1 = arith.constant 1 : index
    %c0_13 = arith.constant 0 : index
    %9 = vector.load %arg1[%c0_12, %c1, %c0_13] : memref<1x18x144xf32, #tpu.memory_space<vmem>>, vector<1x1x144xf32>
    %10 = vector.shape_cast %9 : vector<1x1x144xf32> to vector<1x144xf32>
    %c0_14 = arith.constant 0 : index
    %c144 = arith.constant 144 : index
    %11 = vector.load %arg19[%c0_14, %c144] : memref<8x432xf32, #tpu.memory_space<vmem>>, vector<1x144xf32>
    tpu.vector_store %arg19[%c0_14, %c144], %10 {strides = array<i32>} : memref<8x432xf32, #tpu.memory_space<vmem>>, vector<1x144xf32>,
    %c0_15 = arith.constant 0 : index
    %c2 = arith.constant 2 : index
    %c0_16 = arith.constant 0 : index
    %12 = vector.load %arg1[%c0_15, %c2, %c0_16] : memref<1x18x144xf32, #tpu.memory_space<vmem>>, vector<1x1x144xf32>
    %13 = vector.shape_cast %12 : vector<1x1x144xf32> to vector<1x144xf32>
    %c0_17 = arith.constant 0 : index
    %c288 = arith.constant 288 : index
    %14 = vector.load %arg19[%c0_17, %c288] : memref<8x432xf32, #tpu.memory_space<vmem>>, vector<1x144xf32>
    tpu.vector_store %arg19[%c0_17, %c288], %13 {strides = array<i32>} : memref<8x432xf32, #tpu.memory_space<vmem>>, vector<1x144xf32>,
    %c0_18 = arith.constant 0 : index
    %c2_19 = arith.constant 2 : index
    %c0_20 = arith.constant 0 : index
    %15 = vector.load %arg1[%c0_18, %c2_19, %c0_20] : memref<1x18x144xf32, #tpu.memory_space<vmem>>, vector<1x1x144xf32>
    %16 = vector.shape_cast %15 : vector<1x1x144xf32> to vector<1x144xf32>
    %c1_21 = arith.constant 1 : index
    %c0_22 = arith.constant 0 : index
    %17 = vector.load %arg19[%c1_21, %c0_22] : memref<8x432xf32, #tpu.memory_space<vmem>>, vector<1x144xf32>
    tpu.vector_store %arg19[%c1_21, %c0_22], %16 {strides = array<i32>} : memref<8x432xf32, #tpu.memory_space<vmem>>, vector<1x144xf32>,
    %c0_23 = arith.constant 0 : index
    %c3 = arith.constant 3 : index
    %c0_24 = arith.constant 0 : index
    %18 = vector.load %arg1[%c0_23, %c3, %c0_24] : memref<1x18x144xf32, #tpu.memory_space<vmem>>, vector<1x1x144xf32>
    %19 = vector.shape_cast %18 : vector<1x1x144xf32> to vector<1x144xf32>
    %c1_25 = arith.constant 1 : index
    %c144_26 = arith.constant 144 : index
    %20 = vector.load %arg19[%c1_25, %c144_26] : memref<8x432xf32, #tpu.memory_space<vmem>>, vector<1x144xf32>
    tpu.vector_store %arg19[%c1_25, %c144_26], %19 {strides = array<i32>} : memref<8x432xf32, #tpu.memory_space<vmem>>, vector<1x144xf32>,
    %c0_27 = arith.constant 0 : index
    %c4 = arith.constant 4 : index
    %c0_28 = arith.constant 0 : index
    %21 = vector.load %arg1[%c0_27, %c4, %c0_28] : memref<1x18x144xf32, #tpu.memory_space<vmem>>, vector<1x1x144xf32>
    %22 = vector.shape_cast %21 : vector<1x1x144xf32> to vector<1x144xf32>
    %c1_29 = arith.constant 1 : index
    %c288_30 = arith.constant 288 : index
    %23 = vector.load %arg19[%c1_29, %c288_30] : memref<8x432xf32, #tpu.memory_space<vmem>>, vector<1x144xf32>
    tpu.vector_store %arg19[%c1_29, %c288_30], %22 {strides = array<i32>} : memref<8x432xf32, #tpu.memory_space<vmem>>, vector<1x144xf32>,
    %c0_31 = arith.constant 0 : index
    %c4_32 = arith.constant 4 : index
    %c0_33 = arith.constant 0 : index
    %24 = vector.load %arg1[%c0_31, %c4_32, %c0_33] : memref<1x18x144xf32, #tpu.memory_space<vmem>>, vector<1x1x144xf32>
    %25 = vector.shape_cast %24 : vector<1x1x144xf32> to vector<1x144xf32>
    %c2_34 = arith.constant 2 : index
    %c0_35 = arith.constant 0 : index
    %26 = vector.load %arg19[%c2_34, %c0_35] : memref<8x432xf32, #tpu.memory_space<vmem>>, vector<1x144xf32>
    tpu.vector_store %arg19[%c2_34, %c0_35], %25 {strides = array<i32>} : memref<8x432xf32, #tpu.memory_space<vmem>>, vector<1x144xf32>,
    %c0_36 = arith.constant 0 : index
    %c5 = arith.constant 5 : index
    %c0_37 = arith.constant 0 : index
    %27 = vector.load %arg1[%c0_36, %c5, %c0_37] : memref<1x18x144xf32, #tpu.memory_space<vmem>>, vector<1x1x144xf32>
    %28 = vector.shape_cast %27 : vector<1x1x144xf32> to vector<1x144xf32>
    %c2_38 = arith.constant 2 : index
    %c144_39 = arith.constant 144 : index
    %29 = vector.load %arg19[%c2_38, %c144_39] : memref<8x432xf32, #tpu.memory_space<vmem>>, vector<1x144xf32>
    tpu.vector_store %arg19[%c2_38, %c144_39], %28 {strides = array<i32>} : memref<8x432xf32, #tpu.memory_space<vmem>>, vector<1x144xf32>,
    %c0_40 = arith.constant 0 : index
    %c6 = arith.constant 6 : index
    %c0_41 = arith.constant 0 : index
    %30 = vector.load %arg1[%c0_40, %c6, %c0_41] : memref<1x18x144xf32, #tpu.memory_space<vmem>>, vector<1x1x144xf32>
    %31 = vector.shape_cast %30 : vector<1x1x144xf32> to vector<1x144xf32>
    %c2_42 = arith.constant 2 : index
    %c288_43 = arith.constant 288 : index
    %32 = vector.load %arg19[%c2_42, %c288_43] : memref<8x432xf32, #tpu.memory_space<vmem>>, vector<1x144xf32>
    tpu.vector_store %arg19[%c2_42, %c288_43], %31 {strides = array<i32>} : memref<8x432xf32, #tpu.memory_space<vmem>>, vector<1x144xf32>,
    %c0_44 = arith.constant 0 : index
    %c6_45 = arith.constant 6 : index
    %c0_46 = arith.constant 0 : index
    %33 = vector.load %arg1[%c0_44, %c6_45, %c0_46] : memref<1x18x144xf32, #tpu.memory_space<vmem>>, vector<1x1x144xf32>
    %34 = vector.shape_cast %33 : vector<1x1x144xf32> to vector<1x144xf32>
    %c3_47 = arith.constant 3 : index
    %c0_48 = arith.constant 0 : index
    %35 = vector.load %arg19[%c3_47, %c0_48] : memref<8x432xf32, #tpu.memory_space<vmem>>, vector<1x144xf32>
    tpu.vector_store %arg19[%c3_47, %c0_48], %34 {strides = array<i32>} : memref<8x432xf32, #tpu.memory_space<vmem>>, vector<1x144xf32>,
    %c0_49 = arith.constant 0 : index
    %c7 = arith.constant 7 : index
    %c0_50 = arith.constant 0 : index
    %36 = vector.load %arg1[%c0_49, %c7, %c0_50] : memref<1x18x144xf32, #tpu.memory_space<vmem>>, vector<1x1x144xf32>
    %37 = vector.shape_cast %36 : vector<1x1x144xf32> to vector<1x144xf32>
    %c3_51 = arith.constant 3 : index
    %c144_52 = arith.constant 144 : index
    %38 = vector.load %arg19[%c3_51, %c144_52] : memref<8x432xf32, #tpu.memory_space<vmem>>, vector<1x144xf32>
    tpu.vector_store %arg19[%c3_51, %c144_52], %37 {strides = array<i32>} : memref<8x432xf32, #tpu.memory_space<vmem>>, vector<1x144xf32>,
    %c0_53 = arith.constant 0 : index
    %c8 = arith.constant 8 : index
    %c0_54 = arith.constant 0 : index
    %39 = vector.load %arg1[%c0_53, %c8, %c0_54] : memref<1x18x144xf32, #tpu.memory_space<vmem>>, vector<1x1x144xf32>
    %40 = vector.shape_cast %39 : vector<1x1x144xf32> to vector<1x144xf32>
    %c3_55 = arith.constant 3 : index
    %c288_56 = arith.constant 288 : index
    %41 = vector.load %arg19[%c3_55, %c288_56] : memref<8x432xf32, #tpu.memory_space<vmem>>, vector<1x144xf32>
    tpu.vector_store %arg19[%c3_55, %c288_56], %40 {strides = array<i32>} : memref<8x432xf32, #tpu.memory_space<vmem>>, vector<1x144xf32>,
    %c0_57 = arith.constant 0 : index
    %c8_58 = arith.constant 8 : index
    %c0_59 = arith.constant 0 : index
    %42 = vector.load %arg1[%c0_57, %c8_58, %c0_59] : memref<1x18x144xf32, #tpu.memory_space<vmem>>, vector<1x1x144xf32>
    %43 = vector.shape_cast %42 : vector<1x1x144xf32> to vector<1x144xf32>
    %c4_60 = arith.constant 4 : index
    %c0_61 = arith.constant 0 : index
    %44 = vector.load %arg19[%c4_60, %c0_61] : memref<8x432xf32, #tpu.memory_space<vmem>>, vector<1x144xf32>
    tpu.vector_store %arg19[%c4_60, %c0_61], %43 {strides = array<i32>} : memref<8x432xf32, #tpu.memory_space<vmem>>, vector<1x144xf32>,
    %c0_62 = arith.constant 0 : index
    %c9 = arith.constant 9 : index
    %c0_63 = arith.constant 0 : index
    %45 = vector.load %arg1[%c0_62, %c9, %c0_63] : memref<1x18x144xf32, #tpu.memory_space<vmem>>, vector<1x1x144xf32>
    %46 = vector.shape_cast %45 : vector<1x1x144xf32> to vector<1x144xf32>
    %c4_64 = arith.constant 4 : index
    %c144_65 = arith.constant 144 : index
    %47 = vector.load %arg19[%c4_64, %c144_65] : memref<8x432xf32, #tpu.memory_space<vmem>>, vector<1x144xf32>
    tpu.vector_store %arg19[%c4_64, %c144_65], %46 {strides = array<i32>} : memref<8x432xf32, #tpu.memory_space<vmem>>, vector<1x144xf32>,
    %c0_66 = arith.constant 0 : index
    %c10 = arith.constant 10 : index
    %c0_67 = arith.constant 0 : index
    %48 = vector.load %arg1[%c0_66, %c10, %c0_67] : memref<1x18x144xf32, #tpu.memory_space<vmem>>, vector<1x1x144xf32>
    %49 = vector.shape_cast %48 : vector<1x1x144xf32> to vector<1x144xf32>
    %c4_68 = arith.constant 4 : index
    %c288_69 = arith.constant 288 : index
    %50 = vector.load %arg19[%c4_68, %c288_69] : memref<8x432xf32, #tpu.memory_space<vmem>>, vector<1x144xf32>
    tpu.vector_store %arg19[%c4_68, %c288_69], %49 {strides = array<i32>} : memref<8x432xf32, #tpu.memory_space<vmem>>, vector<1x144xf32>,
    %c0_70 = arith.constant 0 : index
    %c10_71 = arith.constant 10 : index
    %c0_72 = arith.constant 0 : index
    %51 = vector.load %arg1[%c0_70, %c10_71, %c0_72] : memref<1x18x144xf32, #tpu.memory_space<vmem>>, vector<1x1x144xf32>
    %52 = vector.shape_cast %51 : vector<1x1x144xf32> to vector<1x144xf32>
    %c5_73 = arith.constant 5 : index
    %c0_74 = arith.constant 0 : index
    %53 = vector.load %arg19[%c5_73, %c0_74] : memref<8x432xf32, #tpu.memory_space<vmem>>, vector<1x144xf32>
    tpu.vector_store %arg19[%c5_73, %c0_74], %52 {strides = array<i32>} : memref<8x432xf32, #tpu.memory_space<vmem>>, vector<1x144xf32>,
    %c0_75 = arith.constant 0 : index
    %c11 = arith.constant 11 : index
    %c0_76 = arith.constant 0 : index
    %54 = vector.load %arg1[%c0_75, %c11, %c0_76] : memref<1x18x144xf32, #tpu.memory_space<vmem>>, vector<1x1x144xf32>
    %55 = vector.shape_cast %54 : vector<1x1x144xf32> to vector<1x144xf32>
    %c5_77 = arith.constant 5 : index
    %c144_78 = arith.constant 144 : index
    %56 = vector.load %arg19[%c5_77, %c144_78] : memref<8x432xf32, #tpu.memory_space<vmem>>, vector<1x144xf32>
    tpu.vector_store %arg19[%c5_77, %c144_78], %55 {strides = array<i32>} : memref<8x432xf32, #tpu.memory_space<vmem>>, vector<1x144xf32>,
    %c0_79 = arith.constant 0 : index
    %c12 = arith.constant 12 : index
    %c0_80 = arith.constant 0 : index
    %57 = vector.load %arg1[%c0_79, %c12, %c0_80] : memref<1x18x144xf32, #tpu.memory_space<vmem>>, vector<1x1x144xf32>
    %58 = vector.shape_cast %57 : vector<1x1x144xf32> to vector<1x144xf32>
    %c5_81 = arith.constant 5 : index
    %c288_82 = arith.constant 288 : index
    %59 = vector.load %arg19[%c5_81, %c288_82] : memref<8x432xf32, #tpu.memory_space<vmem>>, vector<1x144xf32>
    tpu.vector_store %arg19[%c5_81, %c288_82], %58 {strides = array<i32>} : memref<8x432xf32, #tpu.memory_space<vmem>>, vector<1x144xf32>,
    %c0_83 = arith.constant 0 : index
    %c12_84 = arith.constant 12 : index
    %c0_85 = arith.constant 0 : index
    %60 = vector.load %arg1[%c0_83, %c12_84, %c0_85] : memref<1x18x144xf32, #tpu.memory_space<vmem>>, vector<1x1x144xf32>
    %61 = vector.shape_cast %60 : vector<1x1x144xf32> to vector<1x144xf32>
    %c6_86 = arith.constant 6 : index
    %c0_87 = arith.constant 0 : index
    %62 = vector.load %arg19[%c6_86, %c0_87] : memref<8x432xf32, #tpu.memory_space<vmem>>, vector<1x144xf32>
    tpu.vector_store %arg19[%c6_86, %c0_87], %61 {strides = array<i32>} : memref<8x432xf32, #tpu.memory_space<vmem>>, vector<1x144xf32>,
    %c0_88 = arith.constant 0 : index
    %c13 = arith.constant 13 : index
    %c0_89 = arith.constant 0 : index
    %63 = vector.load %arg1[%c0_88, %c13, %c0_89] : memref<1x18x144xf32, #tpu.memory_space<vmem>>, vector<1x1x144xf32>
    %64 = vector.shape_cast %63 : vector<1x1x144xf32> to vector<1x144xf32>
    %c6_90 = arith.constant 6 : index
    %c144_91 = arith.constant 144 : index
    %65 = vector.load %arg19[%c6_90, %c144_91] : memref<8x432xf32, #tpu.memory_space<vmem>>, vector<1x144xf32>
    tpu.vector_store %arg19[%c6_90, %c144_91], %64 {strides = array<i32>} : memref<8x432xf32, #tpu.memory_space<vmem>>, vector<1x144xf32>,
    %c0_92 = arith.constant 0 : index
    %c14 = arith.constant 14 : index
    %c0_93 = arith.constant 0 : index
    %66 = vector.load %arg1[%c0_92, %c14, %c0_93] : memref<1x18x144xf32, #tpu.memory_space<vmem>>, vector<1x1x144xf32>
    %67 = vector.shape_cast %66 : vector<1x1x144xf32> to vector<1x144xf32>
    %c6_94 = arith.constant 6 : index
    %c288_95 = arith.constant 288 : index
    %68 = vector.load %arg19[%c6_94, %c288_95] : memref<8x432xf32, #tpu.memory_space<vmem>>, vector<1x144xf32>
    tpu.vector_store %arg19[%c6_94, %c288_95], %67 {strides = array<i32>} : memref<8x432xf32, #tpu.memory_space<vmem>>, vector<1x144xf32>,
    %c0_96 = arith.constant 0 : index
    %c14_97 = arith.constant 14 : index
    %c0_98 = arith.constant 0 : index
    %69 = vector.load %arg1[%c0_96, %c14_97, %c0_98] : memref<1x18x144xf32, #tpu.memory_space<vmem>>, vector<1x1x144xf32>
    %70 = vector.shape_cast %69 : vector<1x1x144xf32> to vector<1x144xf32>
    %c7_99 = arith.constant 7 : index
    %c0_100 = arith.constant 0 : index
    %71 = vector.load %arg19[%c7_99, %c0_100] : memref<8x432xf32, #tpu.memory_space<vmem>>, vector<1x144xf32>
    tpu.vector_store %arg19[%c7_99, %c0_100], %70 {strides = array<i32>} : memref<8x432xf32, #tpu.memory_space<vmem>>, vector<1x144xf32>,
    %c0_101 = arith.constant 0 : index
    %c15 = arith.constant 15 : index
    %c0_102 = arith.constant 0 : index
    %72 = vector.load %arg1[%c0_101, %c15, %c0_102] : memref<1x18x144xf32, #tpu.memory_space<vmem>>, vector<1x1x144xf32>
    %73 = vector.shape_cast %72 : vector<1x1x144xf32> to vector<1x144xf32>
    %c7_103 = arith.constant 7 : index
    %c144_104 = arith.constant 144 : index
    %74 = vector.load %arg19[%c7_103, %c144_104] : memref<8x432xf32, #tpu.memory_space<vmem>>, vector<1x144xf32>
    tpu.vector_store %arg19[%c7_103, %c144_104], %73 {strides = array<i32>} : memref<8x432xf32, #tpu.memory_space<vmem>>, vector<1x144xf32>,
    %c0_105 = arith.constant 0 : index
    %c16 = arith.constant 16 : index
    %c0_106 = arith.constant 0 : index
    %75 = vector.load %arg1[%c0_105, %c16, %c0_106] : memref<1x18x144xf32, #tpu.memory_space<vmem>>, vector<1x1x144xf32>
    %76 = vector.shape_cast %75 : vector<1x1x144xf32> to vector<1x144xf32>
    %c7_107 = arith.constant 7 : index
    %c288_108 = arith.constant 288 : index
    %77 = vector.load %arg19[%c7_107, %c288_108] : memref<8x432xf32, #tpu.memory_space<vmem>>, vector<1x144xf32>
    tpu.vector_store %arg19[%c7_107, %c288_108], %76 {strides = array<i32>} : memref<8x432xf32, #tpu.memory_space<vmem>>, vector<1x144xf32>,
    %c0_109 = arith.constant 0 : index
    %c0_110 = arith.constant 0 : index
    %78 = vector.load %arg19[%c0_109, %c0_110] : memref<8x432xf32, #tpu.memory_space<vmem>>, vector<8x432xf32>
    %79 = arith.truncf %78 : vector<8x432xf32> to vector<8x432xbf16>
    %c0_111 = arith.constant 0 : index
    %c0_112 = arith.constant 0 : index
    %80 = vector.load %arg2[%c0_111, %c0_112] : memref<432x256xbf16, #tpu.memory_space<vmem>>, vector<432x256xbf16>
    %cst_113 = arith.constant dense<0.000000e+00> : vector<8x256xf32>
    %81 = tpu.matmul %79, %80, %cst_113 {dimension_numbers = #tpu.dot_dimension_numbers<[1], [0], [0], [1], [0, 0, 1, 1], [], []>} : vector<8x432xbf16>, vector<432x256xbf16>, vector<8x256xf32> -> vector<8x256xf32>
    %c0_114 = arith.constant 0 : index
    %c0_115 = arith.constant 0 : index
    %82 = vector.load %arg3[%c0_114, %c0_115] : memref<1x256xf32, #tpu.memory_space<vmem>>, vector<1x256xf32>
    %83 = vector.broadcast %82 : vector<1x256xf32> to vector<8x256xf32>
    %84 = arith.addf %81, %83 : vector<8x256xf32>
    %cst_116 = arith.constant 0.000000e+00 : f32
    %85 = vector.broadcast %cst_116 : f32 to vector<8x256xf32>
    %86 = arith.maximumf %84, %85 : vector<8x256xf32>
    %87 = vector.extract_strided_slice %86 {offsets = [0, 0], sizes = [1, 256], strides = [1, 1]} : vector<8x256xf32> to vector<1x256xf32>
    %c1_117 = arith.constant 1 : index
    %c32 = arith.constant 32 : index
    %88 = vector.load %arg16[%c1_117, %c32] : memref<10x320xf32, #tpu.memory_space<vmem>>, vector<1x256xf32>
    tpu.vector_store %arg16[%c1_117, %c32], %87 {strides = array<i32>} : memref<10x320xf32, #tpu.memory_space<vmem>>, vector<1x256xf32>,
    %89 = vector.extract_strided_slice %86 {offsets = [1, 0], sizes = [1, 256], strides = [1, 1]} : vector<8x256xf32> to vector<1x256xf32>
    %c2_118 = arith.constant 2 : index
    %c32_119 = arith.constant 32 : index
    %90 = vector.load %arg16[%c2_118, %c32_119] : memref<10x320xf32, #tpu.memory_space<vmem>>, vector<1x256xf32>
    tpu.vector_store %arg16[%c2_118, %c32_119], %89 {strides = array<i32>} : memref<10x320xf32, #tpu.memory_space<vmem>>, vector<1x256xf32>,
    %91 = vector.extract_strided_slice %86 {offsets = [2, 0], sizes = [1, 256], strides = [1, 1]} : vector<8x256xf32> to vector<1x256xf32>
    %c3_120 = arith.constant 3 : index
    %c32_121 = arith.constant 32 : index
    %92 = vector.load %arg16[%c3_120, %c32_121] : memref<10x320xf32, #tpu.memory_space<vmem>>, vector<1x256xf32>
    tpu.vector_store %arg16[%c3_120, %c32_121], %91 {strides = array<i32>} : memref<10x320xf32, #tpu.memory_space<vmem>>, vector<1x256xf32>,
    %93 = vector.extract_strided_slice %86 {offsets = [3, 0], sizes = [1, 256], strides = [1, 1]} : vector<8x256xf32> to vector<1x256xf32>
    %c4_122 = arith.constant 4 : index
    %c32_123 = arith.constant 32 : index
    %94 = vector.load %arg16[%c4_122, %c32_123] : memref<10x320xf32, #tpu.memory_space<vmem>>, vector<1x256xf32>
    tpu.vector_store %arg16[%c4_122, %c32_123], %93 {strides = array<i32>} : memref<10x320xf32, #tpu.memory_space<vmem>>, vector<1x256xf32>,
    %95 = vector.extract_strided_slice %86 {offsets = [4, 0], sizes = [1, 256], strides = [1, 1]} : vector<8x256xf32> to vector<1x256xf32>
    %c5_124 = arith.constant 5 : index
    %c32_125 = arith.constant 32 : index
    %96 = vector.load %arg16[%c5_124, %c32_125] : memref<10x320xf32, #tpu.memory_space<vmem>>, vector<1x256xf32>
    tpu.vector_store %arg16[%c5_124, %c32_125], %95 {strides = array<i32>} : memref<10x320xf32, #tpu.memory_space<vmem>>, vector<1x256xf32>,
    %97 = vector.extract_strided_slice %86 {offsets = [5, 0], sizes = [1, 256], strides = [1, 1]} : vector<8x256xf32> to vector<1x256xf32>
    %c6_126 = arith.constant 6 : index
    %c32_127 = arith.constant 32 : index
    %98 = vector.load %arg16[%c6_126, %c32_127] : memref<10x320xf32, #tpu.memory_space<vmem>>, vector<1x256xf32>
    tpu.vector_store %arg16[%c6_126, %c32_127], %97 {strides = array<i32>} : memref<10x320xf32, #tpu.memory_space<vmem>>, vector<1x256xf32>,
    %99 = vector.extract_strided_slice %86 {offsets = [6, 0], sizes = [1, 256], strides = [1, 1]} : vector<8x256xf32> to vector<1x256xf32>
    %c7_128 = arith.constant 7 : index
    %c32_129 = arith.constant 32 : index
    %100 = vector.load %arg16[%c7_128, %c32_129] : memref<10x320xf32, #tpu.memory_space<vmem>>, vector<1x256xf32>
    tpu.vector_store %arg16[%c7_128, %c32_129], %99 {strides = array<i32>} : memref<10x320xf32, #tpu.memory_space<vmem>>, vector<1x256xf32>,
    %101 = vector.extract_strided_slice %86 {offsets = [7, 0], sizes = [1, 256], strides = [1, 1]} : vector<8x256xf32> to vector<1x256xf32>
    %c8_130 = arith.constant 8 : index
    %c32_131 = arith.constant 32 : index
    %102 = vector.load %arg16[%c8_130, %c32_131] : memref<10x320xf32, #tpu.memory_space<vmem>>, vector<1x256xf32>
    tpu.vector_store %arg16[%c8_130, %c32_131], %101 {strides = array<i32>} : memref<10x320xf32, #tpu.memory_space<vmem>>, vector<1x256xf32>,
    %c0_132 = arith.constant 0 : index
    %c0_133 = arith.constant 0 : index
    %103 = vector.load %arg16[%c0_132, %c0_133] : memref<10x320xf32, #tpu.memory_space<vmem>>, vector<1x320xf32>
    %c0_134 = arith.constant 0 : index
    %c0_135 = arith.constant 0 : index
    %104 = vector.load %arg20[%c0_134, %c0_135] : memref<4x960xf32, #tpu.memory_space<vmem>>, vector<1x320xf32>
    tpu.vector_store %arg20[%c0_134, %c0_135], %103 {strides = array<i32>} : memref<4x960xf32, #tpu.memory_space<vmem>>, vector<1x320xf32>,
    %c1_136 = arith.constant 1 : index
    %c0_137 = arith.constant 0 : index
    %105 = vector.load %arg16[%c1_136, %c0_137] : memref<10x320xf32, #tpu.memory_space<vmem>>, vector<1x320xf32>
    %c0_138 = arith.constant 0 : index
    %c320 = arith.constant 320 : index
    %106 = vector.load %arg20[%c0_138, %c320] : memref<4x960xf32, #tpu.memory_space<vmem>>, vector<1x320xf32>
    tpu.vector_store %arg20[%c0_138, %c320], %105 {strides = array<i32>} : memref<4x960xf32, #tpu.memory_space<vmem>>, vector<1x320xf32>,
    %c2_139 = arith.constant 2 : index
    %c0_140 = arith.constant 0 : index
    %107 = vector.load %arg16[%c2_139, %c0_140] : memref<10x320xf32, #tpu.memory_space<vmem>>, vector<1x320xf32>
    %c0_141 = arith.constant 0 : index
    %c640 = arith.constant 640 : index
    %108 = vector.load %arg20[%c0_141, %c640] : memref<4x960xf32, #tpu.memory_space<vmem>>, vector<1x320xf32>
    tpu.vector_store %arg20[%c0_141, %c640], %107 {strides = array<i32>} : memref<4x960xf32, #tpu.memory_space<vmem>>, vector<1x320xf32>,
    %c2_142 = arith.constant 2 : index
    %c0_143 = arith.constant 0 : index
    %109 = vector.load %arg16[%c2_142, %c0_143] : memref<10x320xf32, #tpu.memory_space<vmem>>, vector<1x320xf32>
    %c1_144 = arith.constant 1 : index
    %c0_145 = arith.constant 0 : index
    %110 = vector.load %arg20[%c1_144, %c0_145] : memref<4x960xf32, #tpu.memory_space<vmem>>, vector<1x320xf32>
    tpu.vector_store %arg20[%c1_144, %c0_145], %109 {strides = array<i32>} : memref<4x960xf32, #tpu.memory_space<vmem>>, vector<1x320xf32>,
    %c3_146 = arith.constant 3 : index
    %c0_147 = arith.constant 0 : index
    %111 = vector.load %arg16[%c3_146, %c0_147] : memref<10x320xf32, #tpu.memory_space<vmem>>, vector<1x320xf32>
    %c1_148 = arith.constant 1 : index
    %c320_149 = arith.constant 320 : index
    %112 = vector.load %arg20[%c1_148, %c320_149] : memref<4x960xf32, #tpu.memory_space<vmem>>, vector<1x320xf32>
    tpu.vector_store %arg20[%c1_148, %c320_149], %111 {strides = array<i32>} : memref<4x960xf32, #tpu.memory_space<vmem>>, vector<1x320xf32>,
    %c4_150 = arith.constant 4 : index
    %c0_151 = arith.constant 0 : index
    %113 = vector.load %arg16[%c4_150, %c0_151] : memref<10x320xf32, #tpu.memory_space<vmem>>, vector<1x320xf32>
    %c1_152 = arith.constant 1 : index
    %c640_153 = arith.constant 640 : index
    %114 = vector.load %arg20[%c1_152, %c640_153] : memref<4x960xf32, #tpu.memory_space<vmem>>, vector<1x320xf32>
    tpu.vector_store %arg20[%c1_152, %c640_153], %113 {strides = array<i32>} : memref<4x960xf32, #tpu.memory_space<vmem>>, vector<1x320xf32>,
    %c4_154 = arith.constant 4 : index
    %c0_155 = arith.constant 0 : index
    %115 = vector.load %arg16[%c4_154, %c0_155] : memref<10x320xf32, #tpu.memory_space<vmem>>, vector<1x320xf32>
    %c2_156 = arith.constant 2 : index
    %c0_157 = arith.constant 0 : index
    %116 = vector.load %arg20[%c2_156, %c0_157] : memref<4x960xf32, #tpu.memory_space<vmem>>, vector<1x320xf32>
    tpu.vector_store %arg20[%c2_156, %c0_157], %115 {strides = array<i32>} : memref<4x960xf32, #tpu.memory_space<vmem>>, vector<1x320xf32>,
    %c5_158 = arith.constant 5 : index
    %c0_159 = arith.constant 0 : index
    %117 = vector.load %arg16[%c5_158, %c0_159] : memref<10x320xf32, #tpu.memory_space<vmem>>, vector<1x320xf32>
    %c2_160 = arith.constant 2 : index
    %c320_161 = arith.constant 320 : index
    %118 = vector.load %arg20[%c2_160, %c320_161] : memref<4x960xf32, #tpu.memory_space<vmem>>, vector<1x320xf32>
    tpu.vector_store %arg20[%c2_160, %c320_161], %117 {strides = array<i32>} : memref<4x960xf32, #tpu.memory_space<vmem>>, vector<1x320xf32>,
    %c6_162 = arith.constant 6 : index
    %c0_163 = arith.constant 0 : index
    %119 = vector.load %arg16[%c6_162, %c0_163] : memref<10x320xf32, #tpu.memory_space<vmem>>, vector<1x320xf32>
    %c2_164 = arith.constant 2 : index
    %c640_165 = arith.constant 640 : index
    %120 = vector.load %arg20[%c2_164, %c640_165] : memref<4x960xf32, #tpu.memory_space<vmem>>, vector<1x320xf32>
    tpu.vector_store %arg20[%c2_164, %c640_165], %119 {strides = array<i32>} : memref<4x960xf32, #tpu.memory_space<vmem>>, vector<1x320xf32>,
    %c6_166 = arith.constant 6 : index
    %c0_167 = arith.constant 0 : index
    %121 = vector.load %arg16[%c6_166, %c0_167] : memref<10x320xf32, #tpu.memory_space<vmem>>, vector<1x320xf32>
    %c3_168 = arith.constant 3 : index
    %c0_169 = arith.constant 0 : index
    %122 = vector.load %arg20[%c3_168, %c0_169] : memref<4x960xf32, #tpu.memory_space<vmem>>, vector<1x320xf32>
    tpu.vector_store %arg20[%c3_168, %c0_169], %121 {strides = array<i32>} : memref<4x960xf32, #tpu.memory_space<vmem>>, vector<1x320xf32>,
    %c7_170 = arith.constant 7 : index
    %c0_171 = arith.constant 0 : index
    %123 = vector.load %arg16[%c7_170, %c0_171] : memref<10x320xf32, #tpu.memory_space<vmem>>, vector<1x320xf32>
    %c3_172 = arith.constant 3 : index
    %c320_173 = arith.constant 320 : index
    %124 = vector.load %arg20[%c3_172, %c320_173] : memref<4x960xf32, #tpu.memory_space<vmem>>, vector<1x320xf32>
    tpu.vector_store %arg20[%c3_172, %c320_173], %123 {strides = array<i32>} : memref<4x960xf32, #tpu.memory_space<vmem>>, vector<1x320xf32>,
    %c8_174 = arith.constant 8 : index
    %c0_175 = arith.constant 0 : index
    %125 = vector.load %arg16[%c8_174, %c0_175] : memref<10x320xf32, #tpu.memory_space<vmem>>, vector<1x320xf32>
    %c3_176 = arith.constant 3 : index
    %c640_177 = arith.constant 640 : index
    %126 = vector.load %arg20[%c3_176, %c640_177] : memref<4x960xf32, #tpu.memory_space<vmem>>, vector<1x320xf32>
    tpu.vector_store %arg20[%c3_176, %c640_177], %125 {strides = array<i32>} : memref<4x960xf32, #tpu.memory_space<vmem>>, vector<1x320xf32>,
    %c0_178 = arith.constant 0 : index
    %c0_179 = arith.constant 0 : index
    %127 = vector.load %arg20[%c0_178, %c0_179] : memref<4x960xf32, #tpu.memory_space<vmem>>, vector<4x960xf32>
    %128 = arith.truncf %127 : vector<4x960xf32> to vector<4x960xbf16>
    %c0_180 = arith.constant 0 : index
    %c0_181 = arith.constant 0 : index
    %129 = vector.load %arg4[%c0_180, %c0_181] : memref<960x256xbf16, #tpu.memory_space<vmem>>, vector<960x256xbf16>
    %cst_182 = arith.constant dense<0.000000e+00> : vector<4x256xf32>
    %130 = tpu.matmul %128, %129, %cst_182 {dimension_numbers = #tpu.dot_dimension_numbers<[1], [0], [0], [1], [0, 0, 1, 1], [], []>} : vector<4x960xbf16>, vector<960x256xbf16>, vector<4x256xf32> -> vector<4x256xf32>
    %c0_183 = arith.constant 0 : index
    %c0_184 = arith.constant 0 : index
    %131 = vector.load %arg5[%c0_183, %c0_184] : memref<1x256xf32, #tpu.memory_space<vmem>>, vector<1x256xf32>
    %132 = vector.broadcast %131 : vector<1x256xf32> to vector<4x256xf32>
    %133 = arith.addf %130, %132 : vector<4x256xf32>
    %cst_185 = arith.constant 0.000000e+00 : f32
    %134 = vector.broadcast %cst_185 : f32 to vector<4x256xf32>
    %135 = arith.maximumf %133, %134 : vector<4x256xf32>
    %c0_186 = arith.constant 0 : index
    %c0_187 = arith.constant 0 : index
    %136 = vector.load %arg17[%c0_186, %c0_187] : memref<5x320xf32, #tpu.memory_space<vmem>>, vector<4x256xf32>
    tpu.vector_store %arg17[%c0_186, %c0_187], %135 {strides = array<i32>} : memref<5x320xf32, #tpu.memory_space<vmem>>, vector<4x256xf32>,
    %cst_188 = arith.constant dense<0.000000e+00> : vector<256xf32>
    %137 = vector.multi_reduction <add>, %135, %cst_188 [0] : vector<4x256xf32> to vector<256xf32>
    %138 = vector.shape_cast %137 : vector<256xf32> to vector<1x256xf32>
    %139 = arith.truncf %138 : vector<1x256xf32> to vector<1x256xbf16>
    %c0_189 = arith.constant 0 : index
    %c0_190 = arith.constant 0 : index
    %140 = vector.load %arg12[%c0_189, %c0_190] : memref<256x128xbf16, #tpu.memory_space<vmem>>, vector<256x128xbf16>
    %cst_191 = arith.constant dense<0.000000e+00> : vector<1x128xf32>
    %141 = tpu.matmul %139, %140, %cst_191 {dimension_numbers = #tpu.dot_dimension_numbers<[1], [0], [0], [1], [0, 0, 1, 1], [], []>} : vector<1x256xbf16>, vector<256x128xbf16>, vector<1x128xf32> -> vector<1x128xf32>
    %c0_192 = arith.constant 0 : index
    %c0_193 = arith.constant 0 : index
    %142 = vector.load %arg13[%c0_192, %c0_193] : memref<1x128xf32, #tpu.memory_space<vmem>>, vector<1x128xf32>
    %143 = arith.addf %141, %142 : vector<1x128xf32>
    %c0_194 = arith.constant 0 : index
    %c0_195 = arith.constant 0 : index
    %c0_196 = arith.constant 0 : index
    %144 = vector.load %arg14[%c0_194, %c0_195, %c0_196] : memref<1x1x128xf32, #tpu.memory_space<vmem>>, vector<1x1x128xf32>
    %145 = vector.shape_cast %144 : vector<1x1x128xf32> to vector<1x128xf32>
    %146 = vector.shape_cast %143 : vector<1x128xf32> to vector<1x1x128xf32>
    tpu.vector_store %arg14[%c0_194, %c0_195, %c0_196], %146 {strides = array<i32>} : memref<1x1x128xf32, #tpu.memory_space<vmem>>, vector<1x1x128xf32>,
    %c0_197 = arith.constant 0 : index
    %c0_198 = arith.constant 0 : index
    %147 = vector.load %arg17[%c0_197, %c0_198] : memref<5x320xf32, #tpu.memory_space<vmem>>, vector<5x320xf32>
    %148 = vector.extract_strided_slice %147 {offsets = [0, 0], sizes = [4, 320], strides = [1, 1]} : vector<5x320xf32> to vector<4x320xf32>
    %149 = arith.truncf %148 : vector<4x320xf32> to vector<4x320xbf16>
    %c0_199 = arith.constant 0 : index
    %c0_200 = arith.constant 0 : index
    %150 = vector.load %arg6[%c0_199, %c0_200] : memref<320x512xbf16, #tpu.memory_space<vmem>>, vector<320x512xbf16>
    %cst_201 = arith.constant dense<0.000000e+00> : vector<4x512xf32>
    %151 = tpu.matmul %149, %150, %cst_201 {dimension_numbers = #tpu.dot_dimension_numbers<[1], [0], [0], [1], [0, 0, 1, 1], [], []>} : vector<4x320xbf16>, vector<320x512xbf16>, vector<4x512xf32> -> vector<4x512xf32>
    %152 = vector.extract_strided_slice %147 {offsets = [1, 0], sizes = [4, 320], strides = [1, 1]} : vector<5x320xf32> to vector<4x320xf32>
    %153 = arith.truncf %152 : vector<4x320xf32> to vector<4x320xbf16>
    %c0_202 = arith.constant 0 : index
    %c0_203 = arith.constant 0 : index
    %154 = vector.load %arg7[%c0_202, %c0_203] : memref<320x512xbf16, #tpu.memory_space<vmem>>, vector<320x512xbf16>
    %cst_204 = arith.constant dense<0.000000e+00> : vector<4x512xf32>
    %155 = tpu.matmul %153, %154, %cst_204 {dimension_numbers = #tpu.dot_dimension_numbers<[1], [0], [0], [1], [0, 0, 1, 1], [], []>} : vector<4x320xbf16>, vector<320x512xbf16>, vector<4x512xf32> -> vector<4x512xf32>
    %156 = arith.addf %151, %155 : vector<4x512xf32>
    %c0_205 = arith.constant 0 : index
    %c0_206 = arith.constant 0 : index
    %157 = vector.load %arg8[%c0_205, %c0_206] : memref<1x512xf32, #tpu.memory_space<vmem>>, vector<1x512xf32>
    %158 = vector.broadcast %157 : vector<1x512xf32> to vector<4x512xf32>
    %159 = arith.addf %156, %158 : vector<4x512xf32>
    %cst_207 = arith.constant 0.000000e+00 : f32
    %160 = vector.broadcast %cst_207 : f32 to vector<4x512xf32>
    %161 = arith.maximumf %159, %160 : vector<4x512xf32>
    %162 = vector.extract_strided_slice %161 {offsets = [0, 0], sizes = [1, 256], strides = [1, 1]} : vector<4x512xf32> to vector<1x256xf32>
    %c0_208 = arith.constant 0 : index
    %c0_209 = arith.constant 0 : index
    %163 = vector.load %arg18[%c0_208, %c0_209] : memref<9x288xf32, #tpu.memory_space<vmem>>, vector<1x256xf32>
    tpu.vector_store %arg18[%c0_208, %c0_209], %162 {strides = array<i32>} : memref<9x288xf32, #tpu.memory_space<vmem>>, vector<1x256xf32>,
    %164 = vector.extract_strided_slice %161 {offsets = [0, 256], sizes = [1, 256], strides = [1, 1]} : vector<4x512xf32> to vector<1x256xf32>
    %c1_210 = arith.constant 1 : index
    %c0_211 = arith.constant 0 : index
    %165 = vector.load %arg18[%c1_210, %c0_211] : memref<9x288xf32, #tpu.memory_space<vmem>>, vector<1x256xf32>
    tpu.vector_store %arg18[%c1_210, %c0_211], %164 {strides = array<i32>} : memref<9x288xf32, #tpu.memory_space<vmem>>, vector<1x256xf32>,
    %166 = vector.extract_strided_slice %161 {offsets = [1, 0], sizes = [1, 256], strides = [1, 1]} : vector<4x512xf32> to vector<1x256xf32>
    %c2_212 = arith.constant 2 : index
    %c0_213 = arith.constant 0 : index
    %167 = vector.load %arg18[%c2_212, %c0_213] : memref<9x288xf32, #tpu.memory_space<vmem>>, vector<1x256xf32>
    tpu.vector_store %arg18[%c2_212, %c0_213], %166 {strides = array<i32>} : memref<9x288xf32, #tpu.memory_space<vmem>>, vector<1x256xf32>,
    %168 = vector.extract_strided_slice %161 {offsets = [1, 256], sizes = [1, 256], strides = [1, 1]} : vector<4x512xf32> to vector<1x256xf32>
    %c3_214 = arith.constant 3 : index
    %c0_215 = arith.constant 0 : index
    %169 = vector.load %arg18[%c3_214, %c0_215] : memref<9x288xf32, #tpu.memory_space<vmem>>, vector<1x256xf32>
    tpu.vector_store %arg18[%c3_214, %c0_215], %168 {strides = array<i32>} : memref<9x288xf32, #tpu.memory_space<vmem>>, vector<1x256xf32>,
    %170 = vector.extract_strided_slice %161 {offsets = [2, 0], sizes = [1, 256], strides = [1, 1]} : vector<4x512xf32> to vector<1x256xf32>
    %c4_216 = arith.constant 4 : index
    %c0_217 = arith.constant 0 : index
    %171 = vector.load %arg18[%c4_216, %c0_217] : memref<9x288xf32, #tpu.memory_space<vmem>>, vector<1x256xf32>
    tpu.vector_store %arg18[%c4_216, %c0_217], %170 {strides = array<i32>} : memref<9x288xf32, #tpu.memory_space<vmem>>, vector<1x256xf32>,
    %172 = vector.extract_strided_slice %161 {offsets = [2, 256], sizes = [1, 256], strides = [1, 1]} : vector<4x512xf32> to vector<1x256xf32>
    %c5_218 = arith.constant 5 : index
    %c0_219 = arith.constant 0 : index
    %173 = vector.load %arg18[%c5_218, %c0_219] : memref<9x288xf32, #tpu.memory_space<vmem>>, vector<1x256xf32>
    tpu.vector_store %arg18[%c5_218, %c0_219], %172 {strides = array<i32>} : memref<9x288xf32, #tpu.memory_space<vmem>>, vector<1x256xf32>,
    %174 = vector.extract_strided_slice %161 {offsets = [3, 0], sizes = [1, 256], strides = [1, 1]} : vector<4x512xf32> to vector<1x256xf32>
    %c6_220 = arith.constant 6 : index
    %c0_221 = arith.constant 0 : index
    %175 = vector.load %arg18[%c6_220, %c0_221] : memref<9x288xf32, #tpu.memory_space<vmem>>, vector<1x256xf32>
    tpu.vector_store %arg18[%c6_220, %c0_221], %174 {strides = array<i32>} : memref<9x288xf32, #tpu.memory_space<vmem>>, vector<1x256xf32>,
    %176 = vector.extract_strided_slice %161 {offsets = [3, 256], sizes = [1, 256], strides = [1, 1]} : vector<4x512xf32> to vector<1x256xf32>
    %c7_222 = arith.constant 7 : index
    %c0_223 = arith.constant 0 : index
    %177 = vector.load %arg18[%c7_222, %c0_223] : memref<9x288xf32, #tpu.memory_space<vmem>>, vector<1x256xf32>
    tpu.vector_store %arg18[%c7_222, %c0_223], %176 {strides = array<i32>} : memref<9x288xf32, #tpu.memory_space<vmem>>, vector<1x256xf32>,
    %c0_224 = arith.constant 0 : index
    %c0_225 = arith.constant 0 : index
    %178 = vector.load %arg18[%c0_224, %c0_225] : memref<9x288xf32, #tpu.memory_space<vmem>>, vector<9x288xf32>
    %179 = vector.extract_strided_slice %178 {offsets = [0, 0], sizes = [8, 288], strides = [1, 1]} : vector<9x288xf32> to vector<8x288xf32>
    %180 = arith.truncf %179 : vector<8x288xf32> to vector<8x288xbf16>
    %c0_226 = arith.constant 0 : index
    %c0_227 = arith.constant 0 : index
    %181 = vector.load %arg9[%c0_226, %c0_227] : memref<288x256xbf16, #tpu.memory_space<vmem>>, vector<288x256xbf16>
    %cst_228 = arith.constant dense<0.000000e+00> : vector<8x256xf32>
    %182 = tpu.matmul %180, %181, %cst_228 {dimension_numbers = #tpu.dot_dimension_numbers<[1], [0], [0], [1], [0, 0, 1, 1], [], []>} : vector<8x288xbf16>, vector<288x256xbf16>, vector<8x256xf32> -> vector<8x256xf32>
    %183 = vector.extract_strided_slice %178 {offsets = [1, 0], sizes = [8, 288], strides = [1, 1]} : vector<9x288xf32> to vector<8x288xf32>
    %184 = arith.truncf %183 : vector<8x288xf32> to vector<8x288xbf16>
    %c0_229 = arith.constant 0 : index
    %c0_230 = arith.constant 0 : index
    %185 = vector.load %arg10[%c0_229, %c0_230] : memref<288x256xbf16, #tpu.memory_space<vmem>>, vector<288x256xbf16>
    %cst_231 = arith.constant dense<0.000000e+00> : vector<8x256xf32>
    %186 = tpu.matmul %184, %185, %cst_231 {dimension_numbers = #tpu.dot_dimension_numbers<[1], [0], [0], [1], [0, 0, 1, 1], [], []>} : vector<8x288xbf16>, vector<288x256xbf16>, vector<8x256xf32> -> vector<8x256xf32>
    %187 = arith.addf %182, %186 : vector<8x256xf32>
    %c0_232 = arith.constant 0 : index
    %c0_233 = arith.constant 0 : index
    %188 = vector.load %arg11[%c0_232, %c0_233] : memref<1x256xf32, #tpu.memory_space<vmem>>, vector<1x256xf32>
    %189 = vector.broadcast %188 : vector<1x256xf32> to vector<8x256xf32>
    %190 = arith.addf %187, %189 : vector<8x256xf32>
    %191 = arith.negf %190 : vector<8x256xf32>
    %192 = math.exp %191 : vector<8x256xf32>
    %cst_234 = arith.constant 1.000000e+00 : f32
    %193 = vector.broadcast %cst_234 : f32 to vector<8x256xf32>
    %194 = arith.addf %193, %192 : vector<8x256xf32>
    %195 = arith.divf %193, %194 : vector<8x256xf32>
    %c0_235 = arith.constant 0 : index
    %c0_236 = arith.constant 0 : index
    %196 = vector.load %arg15[%c0_235, %c0_236] : memref<8x256xf32, #tpu.memory_space<vmem>>, vector<8x256xf32>
    tpu.vector_store %arg15[%c0_235, %c0_236], %195 {strides = array<i32>} : memref<8x256xf32, #tpu.memory_space<vmem>>, vector<8x256xf32>,
    return
  }
  func.func @transform_0(%arg0: i32) -> (i32, i32, i32) {
    %c0_i32 = arith.constant 0 : i32
    %c0_i32_0 = arith.constant 0 : i32
    %c0_i32_1 = arith.constant 0 : i32
    return %arg0, %c0_i32, %c0_i32_0 : i32, i32, i32
  }
  func.func @transform_1(%arg0: i32) -> (i32, i32) {
    %c0_i32 = arith.constant 0 : i32
    %c0_i32_0 = arith.constant 0 : i32
    %c0_i32_1 = arith.constant 0 : i32
    return %c0_i32, %c0_i32_0 : i32, i32
  }
  func.func @transform_2(%arg0: i32) -> (i32, i32) {
    %c0_i32 = arith.constant 0 : i32
    %c0_i32_0 = arith.constant 0 : i32
    %c0_i32_1 = arith.constant 0 : i32
    return %c0_i32, %c0_i32_0 : i32, i32
  }
  func.func @transform_3(%arg0: i32) -> (i32, i32) {
    %c0_i32 = arith.constant 0 : i32
    %c0_i32_0 = arith.constant 0 : i32
    %c0_i32_1 = arith.constant 0 : i32
    return %c0_i32, %c0_i32_0 : i32, i32
  }
  func.func @transform_4(%arg0: i32) -> (i32, i32) {
    %c0_i32 = arith.constant 0 : i32
    %c0_i32_0 = arith.constant 0 : i32
    %c0_i32_1 = arith.constant 0 : i32
    return %c0_i32, %c0_i32_0 : i32, i32
  }
  func.func @transform_5(%arg0: i32) -> (i32, i32) {
    %c0_i32 = arith.constant 0 : i32
    %c0_i32_0 = arith.constant 0 : i32
    %c0_i32_1 = arith.constant 0 : i32
    return %c0_i32, %c0_i32_0 : i32, i32
  }
  func.func @transform_6(%arg0: i32) -> (i32, i32) {
    %c0_i32 = arith.constant 0 : i32
    %c0_i32_0 = arith.constant 0 : i32
    %c0_i32_1 = arith.constant 0 : i32
    return %c0_i32, %c0_i32_0 : i32, i32
  }
  func.func @transform_7(%arg0: i32) -> (i32, i32) {
    %c0_i32 = arith.constant 0 : i32
    %c0_i32_0 = arith.constant 0 : i32
    %c0_i32_1 = arith.constant 0 : i32
    return %c0_i32, %c0_i32_0 : i32, i32
  }
  func.func @transform_8(%arg0: i32) -> (i32, i32) {
    %c0_i32 = arith.constant 0 : i32
    %c0_i32_0 = arith.constant 0 : i32
    %c0_i32_1 = arith.constant 0 : i32
    return %c0_i32, %c0_i32_0 : i32, i32
  }
  func.func @transform_9(%arg0: i32) -> (i32, i32) {
    %c0_i32 = arith.constant 0 : i32
    %c0_i32_0 = arith.constant 0 : i32
    %c0_i32_1 = arith.constant 0 : i32
    return %c0_i32, %c0_i32_0 : i32, i32
  }
  func.func @transform_10(%arg0: i32) -> (i32, i32) {
    %c0_i32 = arith.constant 0 : i32
    %c0_i32_0 = arith.constant 0 : i32
    %c0_i32_1 = arith.constant 0 : i32
    return %c0_i32, %c0_i32_0 : i32, i32
  }
  func.func @transform_11(%arg0: i32) -> (i32, i32) {
    %c0_i32 = arith.constant 0 : i32
    %c0_i32_0 = arith.constant 0 : i32
    %c0_i32_1 = arith.constant 0 : i32
    return %c0_i32, %c0_i32_0 : i32, i32
  }
  func.func @transform_12(%arg0: i32) -> (i32, i32) {
    %c0_i32 = arith.constant 0 : i32
    %c0_i32_0 = arith.constant 0 : i32
    %c0_i32_1 = arith.constant 0 : i32
    return %c0_i32, %c0_i32_0 : i32, i32
  }
  func.func @transform_13(%arg0: i32) -> (i32, i32, i32) {
    %c0_i32 = arith.constant 0 : i32
    %c0_i32_0 = arith.constant 0 : i32
    %c0_i32_1 = arith.constant 0 : i32
    return %arg0, %c0_i32, %c0_i32_0 : i32, i32, i32
  }
  func.func @transform_14(%arg0: i32) -> (i32, i32) {
    %c0_i32 = arith.constant 0 : i32
    %c0_i32_0 = arith.constant 0 : i32
    return %arg0, %c0_i32 : i32, i32
  }
}

</mosaic_0001>

<bundles_post_ra>
// kernel: model_v3_forward.1
= control target key start
LH: loop header
LB: loop body
LE: loop exit
PB: predicated region body
PF: predicated region fallthrough
CT: control target
= control target key end

     0   :  { %s8788_s0 = inlined_call_operand.vmem [shape: f32[2,18,144], index: 0, kind: input, shape index: {}]   ;;  %s8789_s1 = inlined_call_operand.hbm [shape: bf16[432,256], index: 1, kind: input, shape index: {}]   ;;  %s8790_s2 = inlined_call_operand.vmem [shape: f32[1,256], index: 2, kind: input, shape index: {}]   ;;  %s8791_s3 = inlined_call_operand.vmem [shape: bf16[960,256], index: 3, kind: input, shape index: {}]   ;;  %s8792_s4 = inlined_call_operand.vmem [shape: f32[1,256], index: 4, kind: input, shape index: {}]   ;;  %s8793_s5 = inlined_call_operand.hbm [shape: bf16[320,512], index: 5, kind: input, shape index: {}]   ;;  %s8794_s6 = inlined_call_operand.hbm [shape: bf16[320,512], index: 6, kind: input, shape index: {}]   ;;  %s8795_s7 = inlined_call_operand.vmem [shape: f32[1,512], index: 7, kind: input, shape index: {}]   ;;  %s8796_s8 = inlined_call_operand.hbm [shape: bf16[288,256], index: 8, kind: input, shape index: {}]   ;;  %s8797_s9 = inlined_call_operand.hbm [shape: bf16[288,256], index: 9, kind: input, shape index: {}]   ;;  %s8798_s10 = inlined_call_operand.vmem [shape: f32[1,256], index: 10, kind: input, shape index: {}]   ;;  %s8799_s11 = inlined_call_operand.hbm [shape: bf16[256,128], index: 11, kind: input, shape index: {}]   ;;  %s8800_s12 = inlined_call_operand.vmem [shape: f32[1,128], index: 12, kind: input, shape index: {}]   ;;  %s8801_s13 = inlined_call_operand.hbm [shape: f32[2,1,128], index: 13, kind: output, shape index: {0}]   ;;  %s8802_s14 = inlined_call_operand.vmem [shape: f32[16,256], index: 14, kind: output, shape index: {1}]  }
   0x1   :  { %8810 = sst [smem:[#allocation30_spill]] %s8789_s1 }
   0x2   :  { %8811 = sst [smem:[#allocation31_spill]] %s8793_s5 }
   0x3   :  { %8812 = sst [smem:[#allocation32_spill]] %s8796_s8 }
   0x4   :  { %8813 = sst [smem:[#allocation33_spill]] %s8798_s10 }
   0x5   :  { %8814 = sst [smem:[#allocation34_spill]] %s8801_s13 }
   0x6   :  { %8815 = sst [smem:[#allocation35_spill]] %s8802_s14 }
   0x7   :  { %20 = vsyncpa [#allocation8], 0 }
   0x8   :  { %21 = vsyncpa [#allocation11], 0 }
   0x9   :  { %22 = vsyncpa [#allocation14], 0 }
   0xa   :  { %23 = vsyncpa [#allocation17], 0 }
   0xb   :  { %24 = vsyncpa [#allocation9], 0 }
   0xc   :  { %26 = vsyncpa [#allocation9 + $0x1], 0  ;;  %s7452_s29 = smov 0   ;;  %s7454_s30 = smov 0  }
   0xd   :  { %s7456_s15 = smov 0   ;;  %s7458_s16 = smov 0  }
   0xe LB: > { %8816 = sst [smem:[#allocation24_spill]] %s7347_s29  ;;  %s7473_s17 = sadd.s32 4294967295, %s7359_s16   ;;  %s7359_s16 = sphi %s7458_s16, %s8859_s16   ;;  %s7355_s15 = sphi %s7456_s15, %s8861_s15   ;;  %s7351_s30 = sphi %s7454_s30, %s8863_s30   ;;  %s7347_s29 = sphi %s7452_s29, %s8862_s29  }
   0xf   : > { %8817 = sst [smem:[#allocation25_spill]] %s7355_s15  ;;  %s4808_s18 = sadd.s32 4294967294, %s7359_s16  }
  0x10   : > { %8818 = sst [smem:[#allocation26_spill]] %s7359_s16  ;;  %s7477_s19 = sadd.s32 1, %s7359_s16  }
  0x11   : > { %8819 = sst [smem:[#allocation27_spill]] %s7477_s19  ;;  %s317_s20 = sadd.s32 1, %s7355_s15 }
  0x12   : > { %s314_s21 = ssub.s32 %s7359_s16, %s7477_s19  ;;  %p327_p0 = scmp.ne.s32.totalorder %s7355_s15, %s7351_s30 }
  0x13   : > { %p315_p1 = scmp.eq.s32.totalorder %s314_s21, 0  ;;  %p328_p2 = scmp.eq.s32.totalorder %s7473_s17, 1 }
  0x14   : > { %p333_p3 = scmp.ne.s32.totalorder %s7351_s30, %s7347_s29  ;;  %p334_p4 = scmp.eq.s32.totalorder %s4808_s18, 1 }
  0x15   : > { %s7488_s22 = scalar_select %p315_p1, %s7355_s15, %s317_s20  }
  0x16   : > { %p7490_p5 = por %p328_p2, %p327_p0  ;;  %p7494_p6 = por %p334_p4, %p333_p3 }
  0x17   : > { %8820 = sst [smem:[#allocation28_spill]] %s7488_s22  ;;  %p4809_p7 = scmp.ge.s32.totalorder %s7359_s16, 1 }
  0x18   : > { %s8822_s24 = scalar_select %p7494_p6, 1, 0 }
  0x19   : > { %p367_p8 = scmp.lt.s32.totalorder %s7359_s16, 3  ;;  %p7031_p9 = scmp.eq.s32.totalorder %s7473_s17, 0 }
  0x1a   : > { %8823 = sst [smem:[#allocation29_spill]] %s8822_s24  ;;  %s7361_s18 = smov [#allocation10]  }
  0x1b   : > { %p7501_p10 = pnand %p4809_p7, %p367_p8  ;;  %s8825_s5 = sld [smem:[#allocation31_spill]] }
  0x1c   : > { %s403_s20 = sshll.u32 %s7361_s18, 4  ;;  %s8827_s8 = sld [smem:[#allocation32_spill]]  ;;  %s404_s20 = int_to_ptr.vmem [resolvable:$true] %s403_s20 }
  0x1d   : > { %p7008_p11 = pneg %p7501_p10  ;;  %s7362_s26 = smov 256  }
  0x1e   : > { %s7363_s27 = smov 16   ;;  %s8828_s1 = sld [smem:[#allocation30_spill]] }
  0x1f   : > { %p7512_p12 = pnand %p7031_p9, %p7008_p11  ;;  %s7365_s14 = smov 128  }
  0x20   : > { %s7366_s15 = smov 8   ;;  %s415_s10 = sshll.u32 %s8794_s6, 4  ;;  %s416_s10 = int_to_ptr.hbm [resolvable:$true] %s415_s10 }
  0x21   : > { %s401_s28 = sshll.u32 %s8825_s5, 4  ;;  %s7364_s5 = smov [#allocation13]   ;;  %s402_s28 = int_to_ptr.hbm [resolvable:$true] %s401_s28 }
  0x22   : > { %s432_s19 = sshll.u32 %s8827_s8, 4  ;;  %s434_s18 = sshll.u32 %s7364_s5, 4  ;;  %s433_s19 = int_to_ptr.hbm [resolvable:$true] %s432_s19  ;;  %s435_s18 = int_to_ptr.vmem [resolvable:$true] %s434_s18 }
  0x23   : > { %7014 = dma.hbm_to_vmem [thread:$0]  (!%p7512_p12), %s402_s28, 10240, %s404_s20, [#allocation11], %s7362_s26, %s7362_s26, %s7363_s27  }
  0x24   : > { %s378_s16 = sshll.u32 %s8828_s1, 4  ;;  %s7367_s13 = smov [#allocation7]   ;;  %s379_s16 = int_to_ptr.hbm [resolvable:$true] %s378_s16 }
  0x25   : > { %7020 = dma.hbm_to_vmem [thread:$0]  (!%p7512_p12), %s433_s19, 4608, %s435_s18, [#allocation14], %s7365_s14, %s7365_s14, %s7366_s15  }
  0x26   : > { %s380_s28 = sshll.u32 %s7367_s13, 4  ;;  %s7368_s5 = smov [#allocation12]   ;;  %s381_s28 = int_to_ptr.vmem [resolvable:$true] %s380_s28 }
  0x27   : > { %7011 = dma.hbm_to_vmem [thread:$0]  (!%p7512_p12), %s379_s16, 6912, %s381_s28, [#allocation8], %s7365_s14, %s7365_s14, %s7366_s15  }
  0x28   : > { %s417_s29 = sshll.u32 %s7368_s5, 4  ;;  %s446_s1 = sshll.u32 %s8797_s9, 4  ;;  %s418_s29 = int_to_ptr.vmem [resolvable:$true] %s417_s29  ;;  %s447_s1 = int_to_ptr.hbm [resolvable:$true] %s446_s1 }
  0x29   : > { %7017 = dma.hbm_to_vmem [thread:$0]  (!%p7512_p12), %s416_s10, 10240, %s418_s29, [#allocation11], %s7362_s26, %s7362_s26, %s7363_s27  }
  0x2a   : > { %s463_s18 = sshll.u32 %s8799_s11, 4  ;;  %s7369_s13 = smov [#allocation15]   ;;  %s464_s18 = int_to_ptr.hbm [resolvable:$true] %s463_s18 }
  0x2b   : > { %s448_s22 = sshll.u32 %s7369_s13, 4  ;;  %s7370_s16 = smov [#allocation16]   ;;  %s449_s22 = int_to_ptr.vmem [resolvable:$true] %s448_s22 }
  0x2c   : > { %7023 = dma.hbm_to_vmem [thread:$0]  (!%p7512_p12), %s447_s1, 4608, %s449_s22, [#allocation14], %s7365_s14, %s7365_s14, %s7366_s15  }
  0x2d   : > { %s465_s28 = sshll.u32 %s7370_s16, 4  ;;  %s7371_s5 = smov 64   ;;  %s466_s28 = int_to_ptr.vmem [resolvable:$true] %s465_s28 }
  0x2e   : > { %s7372_s24 = smov 4   ;;  %492 = sbr.rel (%p7501_p10) target bundleno = 1449 (0x5a9), region = 72 }
  0x2f   : > { %7026 = dma.hbm_to_vmem [thread:$0]  (!%p7512_p12), %s464_s18, 2048, %s466_s28, [#allocation17], %s7371_s5, %s7371_s5, %s7372_s24  }
  0x33   : > { %7326 = dma.done.wait (%p7031_p9), [#allocation8], 6912  }
  0x34   : > { %7328 = vsyncadd (%p7031_p9), [#allocation8], 4294960384 }
  0x35   : > { %7330 = dma.done.wait (%p7031_p9), [#allocation11], 20480  }
  0x36   : > { %7332 = vsyncadd (%p7031_p9), [#allocation11], 4294946816 }
  0x37   : > { %7334 = dma.done.wait (%p7031_p9), [#allocation14], 9216  }
  0x38   : > { %7336 = vsyncadd (%p7031_p9), [#allocation14], 4294958080 }
  0x39   : > { %7338 = dma.done.wait (%p7031_p9), [#allocation17], 2048  }
  0x3a   : > { %7340 = vsyncadd (%p7031_p9), [#allocation17], 4294965248  ;;  %p568_p13 = scmp.lt.s32.totalorder %s7473_s17, 1  ;;  %s7373_s26 = smov 16   ;;  %v4908_v6 = vld [vmem:[#allocation7 + $0x70] sm:$0xf]  ;;  %v600_v58 = vlaneseq }
  0x3b   : > { %v6574_v7 = vld [vmem:[#allocation7 + $0x74] sm:$0xf0]  ;;  %v4900_v8 = vld [vmem:[#allocation7 + $0x60] sm:$0xf]  ;;  %v6572_v9 = vld [vmem:[#allocation7 + $0x64] sm:$0xf0] }
  0x3c   : > { %s7563_s1 = scalar_select %p568_p13, %s7473_s17, 1  ;;  %v4909_v10 = vor.u32 %v6574_v7, %v4908_v6  ;;  %v4901_v13 = vor.u32 %v6572_v9, %v4900_v8  ;;  %v6573_v14 = vld [vmem:[#allocation7 + $0x74] sm:$0xf]  ;;  %v4892_v15 = vld [vmem:[#allocation7 + $0x50] sm:$0xf]  ;;  %vm7596_vm0 = vcmp.lt.s32.totalorder %v600_v58, 144 }
  0x3d   : > { %v6570_v16 = vld [vmem:[#allocation7 + $0x54] sm:$0xf0]  ;;  %v4910_v17 = vld [vmem:[#allocation7 + $0x78] sm:$0xf0]  ;;  %v4972_v19 = vld [vmem:[#allocation7 + $0xf0] sm:$0xf] }
  0x3e   : > { %s6981_s10 = smul.u32 48, %s7563_s1  ;;  %1159 = vmatpush.bf16.msra.mxu0 %v4909_v10  ;;  %v4913_v18 = vor.u32 %v6573_v14, %v4910_v17  ;;  %v6590_v20 = vld [vmem:[#allocation7 + $0xf4] sm:$0xf0]  ;;  %v6571_v21 = vld [vmem:[#allocation7 + $0x64] sm:$0xf]  ;;  %v4893_v25 = vor.u32 %v6570_v16, %v4892_v15  ;;  %s7374_s27 = smov 32  }
  0x3f   : > { %v4973_v23 = vor.u32 %v6590_v20, %v4972_v19  ;;  %v4902_v24 = vld [vmem:[#allocation7 + $0x68] sm:$0xf0]  ;;  %v4884_v26 = vld [vmem:[#allocation7 + $0x40] sm:$0xf]  ;;  %v6588_v29 = vld [vmem:[#allocation7 + $0xe4] sm:$0xf0] }
  0x40   : > { %s7569_s21 = scalar_lea.vmem %s8788_s0, %s6981_s10  ;;  %1211 = vmatpush.bf16.msra.mxu3 %v4913_v18  ;;  %v4905_v27 = vor.u32 %v6571_v21, %v4902_v24  ;;  %v4964_v28 = vld [vmem:[#allocation7 + $0xe0] sm:$0xf]  ;;  %v6568_v30 = vld [vmem:[#allocation7 + $0x44] sm:$0xf0]  ;;  %v6569_v32 = vld [vmem:[#allocation7 + $0x54] sm:$0xf] }
  0x41   : > { %v4833_v0 = vld [vmem:[%s7569_s21 + $0x5] ss:$8 sm:$0x3]  ;;  %v4827_v1 = vld [vmem:[%s7569_s21 + $0x1] ss:$8 sm:$0x3]  ;;  %1172 = vmatpush.bf16.msra.mxu1 %v4973_v23  ;;  %v4965_v31 = vor.u32 %v6588_v29, %v4964_v28  ;;  %v4885_v36 = vor.u32 %v6568_v30, %v4884_v26 }
  0x42   : > { %668 = vrot.lane.b32.xlu1 %v4833_v0, %s7373_s26  ;;  %609 = vrot.lane.b32.xlu0 %v4827_v1, %s7373_s26  ;;  %v4839_v2 = vld [vmem:[%s7569_s21 + $0x11] ss:$8 sm:$0x3]  ;;  %v4836_v3 = vld [vmem:[%s7569_s21 + $0x7] ss:$8 sm:$0x3] }
  0x43   : > { %720 = vrot.lane.b32.xlu2 %v4839_v2, %s7373_s26  ;;  %v4830_v4 = vld [vmem:[%s7569_s21 + $0x3] ss:$8 sm:$0x3]  ;;  %v4842_v5 = vld [vmem:[%s7569_s21 + $0x13] ss:$8 sm:$0x3]  ;;  %1160 = vmatpush.bf16.msra.mxu0 %v4901_v13 }
  0x44   : > { %v4848_v11 = vld [vmem:[%s7569_s21 + $0x17] ss:$8 sm:$0x3]  ;;  %v4845_v12 = vld [vmem:[%s7569_s21 + $0x15] ss:$8 sm:$0x3]  ;;  %1212 = vmatpush.bf16.msra.mxu3 %v4905_v27 }
  0x45   : > { %v4828_v22 = vld [vmem:[%s7569_s21 + $0x2] ss:$8 sm:$0x3]  ;;  %v4894_v33 = vld [vmem:[#allocation7 + $0x58] sm:$0xf0]  ;;  %1173 = vmatpush.bf16.msra.mxu1 %v4965_v31  ;;  %vm7612_vm1 = vcmp.ge.s32.totalorder %v600_v58, 16 }
  0x46   : > { %v4831_v34 = vld [vmem:[%s7569_s21 + $0x4] ss:$8 sm:$0x3]  ;;  %v4834_v35 = vld [vmem:[%s7569_s21 + $0x6] ss:$8 sm:$0x3]  ;;  %v4897_v37 = vor.u32 %v6569_v32, %v4894_v33 }
  0x47   : > { %1161 = vmatpush.bf16.msra.mxu0 %v4893_v25  ;;  %v4876_v38 = vld [vmem:[#allocation7 + $0x30] sm:$0xf]  ;;  %v6566_v39 = vld [vmem:[#allocation7 + $0x34] sm:$0xf0]  ;;  %v4868_v42 = vld [vmem:[#allocation7 + $0x20] sm:$0xf] }
  0x48   : > { %v4837_v40 = vld [vmem:[%s7569_s21 + $0x10] ss:$8 sm:$0x3]  ;;  %v4877_v41 = vor.u32 %v6566_v39, %v4876_v38  ;;  %1213 = vmatpush.bf16.msra.mxu3 %v4897_v37  ;;  %v6564_v43 = vld [vmem:[#allocation7 + $0x24] sm:$0xf0]  ;;  %vm7619_vm2 = vcmp.lt.s32.totalorder %v600_v58, 160 }
  0x49   : > { %v4840_v44 = vld [vmem:[%s7569_s21 + $0x12] ss:$8 sm:$0x3]  ;;  %v4843_v45 = vld [vmem:[%s7569_s21 + $0x14] ss:$8 sm:$0x3]  ;;  %v4869_v46 = vor.u32 %v6564_v43, %v4868_v42  ;;  %vm7630_vm4 = vmand %vm7612_vm1, %vm7619_vm2 }
  0x4a   : > { %694 = vrot.lane.b32.xlu1 %v4836_v3, %s7373_s26  ;;  %642 = vrot.lane.b32.xlu0 %v4830_v4, %s7373_s26  ;;  %v4860_v47 = vld [vmem:[#allocation7 + $0x10] sm:$0xf]  ;;  %v6562_v48 = vld [vmem:[#allocation7 + $0x14] sm:$0xf0]  ;;  %v4852_v51 = vld [vmem:[#allocation7] sm:$0xf] }
  0x4b   : > { %746 = vrot.lane.b32.xlu2 %v4842_v5, %s7373_s26  ;;  %1162 = vmatpush.bf16.msra.mxu0 %v4885_v36  ;;  %v4846_v49 = vld [vmem:[%s7569_s21 + $0x16] ss:$8 sm:$0x3]  ;;  %v4861_v50 = vor.u32 %v6562_v48, %v4860_v47  ;;  %v6560_v52 = vld [vmem:[#allocation7 + $0x4] sm:$0xf0]  ;;  %vm612_vm3 = vcmask 130048  }
  0x4c   : > { %v6589_v53 = vld [vmem:[#allocation7 + $0xf4] sm:$0xf]  ;;  %v4974_v54 = vld [vmem:[#allocation7 + $0xf8] sm:$0xf0]  ;;  %v4853_v56 = vor.u32 %v6560_v52, %v4852_v51  ;;  %v4956_v61 = vld [vmem:[#allocation7 + $0xd0] sm:$0xf] }
  0x4d   : > { %v4849_v55 = vld [vmem:[%s7569_s21 + $0x20] ss:$8 sm:$0x3]  ;;  %v4977_v57 = vor.u32 %v6589_v53, %v4974_v54  ;;  %v4832_v60 = vld [vmem:[%s7569_s21 + $0x4] ss:$8 sm:$0x3] }
  0x4e   : > { %663 = vst.msk [vmem:[#allocation5 + $0x2] ss:$8 sm:$0x3] %vm7596_vm0, %v4832_v60  ;;  %v6586_v62 = vld [vmem:[#allocation7 + $0xd4] sm:$0xf0]  ;;  %vm593_vm5 = vcmask 261120  }
  0x4f   : > { %1163 = vmatpush.bf16.msra.mxu0 %v4877_v41  ;;  %v599_v63 = vld [vmem:[%s7569_s21] ss:$8 sm:$0x3]  ;;  %v4957_v0 = vor.u32 %v6586_v62, %v4956_v61  ;;  %v6567_v1 = vld [vmem:[#allocation7 + $0x44] sm:$0xf]  ;;  %vm7649_vm6 = vcmp.ge.s32.totalorder %v600_v58, 32 }
  0x50   : > { %604 = vst.msk [vmem:[#allocation5] ss:$8 sm:$0x3] %vm7596_vm0, %v599_v63  ;;  %v4886_v2 = vld [vmem:[#allocation7 + $0x48] sm:$0xf0]  ;;  %vm630_vm7 = vcmp.lt.s32.totalorder %v600_v58, 176 }
  0x51   : > { %1174 = vmatpush.bf16.msra.mxu1 %v4957_v0  ;;  %v4889_v3 = vor.u32 %v6567_v1, %v4886_v2  ;;  %v6587_v4 = vld [vmem:[#allocation7 + $0xe4] sm:$0xf]  ;;  %v4966_v5 = vld [vmem:[#allocation7 + $0xe8] sm:$0xf0]  ;;  %v4948_v6 = vld [vmem:[#allocation7 + $0xc0] sm:$0xf] }
  0x52   : > { %798 = vrot.lane.b32.xlu1 %v4848_v11, %s7373_s26  ;;  %772 = vrot.lane.b32.xlu0 %v4845_v12, %s7373_s26  ;;  %v4969_v7 = vor.u32 %v6587_v4, %v4966_v5  ;;  %v6584_v8 = vld [vmem:[#allocation7 + $0xc4] sm:$0xf0]  ;;  %v4838_v9 = vld [vmem:[%s7569_s21 + $0x10] ss:$8 sm:$0x3]  ;;  %vm7658_vm8 = vmand %vm7649_vm6, %vm630_vm7  ;;  %vm1155_vm9 = vcmask 392192  }
  0x53   : > { %624 = vrot.lane.b32.xlu2 %v4828_v22, %s7374_s27  ;;  %1164 = vmatpush.bf16.msra.mxu0 %v4869_v46  ;;  %v4949_v10 = vor.u32 %v6584_v8, %v4948_v6  ;;  %715 = vst.msk [vmem:[#allocation5 + $0x4] ss:$8 sm:$0x3] %vm7596_vm0, %v4838_v9  ;;  %v6565_v11 = vld [vmem:[#allocation7 + $0x34] sm:$0xf]  ;;  %vm1268_vm10 = vcmask 1040384  }
  0x54   : > { %1214 = vmatpush.bf16.msra.mxu3 %v4889_v3  ;;  %v4878_v12 = vld [vmem:[#allocation7 + $0x38] sm:$0xf0]  ;;  %v6585_v13 = vld [vmem:[#allocation7 + $0xd4] sm:$0xf]  ;;  %v4940_v20 = vld [vmem:[#allocation7 + $0xb0] sm:$0xf] }
  0x55   : > { %v4958_v14 = vld [vmem:[#allocation7 + $0xd8] sm:$0xf0]  ;;  %1175 = vmatpush.bf16.msra.mxu1 %v4949_v10  ;;  %v4881_v15 = vor.u32 %v6565_v11, %v4878_v12  ;;  %v4835_v17 = vld [vmem:[%s7569_s21 + $0x6] ss:$8 sm:$0x3]  ;;  %vm581_vm11 = vcmask 523264  }
  0x56   : > { %v4961_v16 = vor.u32 %v6585_v13, %v4958_v14  ;;  %v4829_v18 = vld [vmem:[%s7569_s21 + $0x2] ss:$8 sm:$0x3]  ;;  %689 = vst.msk [vmem:[#allocation5 + $0x3] ss:$8 sm:$0x3] %vm7596_vm0, %v4835_v17 }
  0x57   : > { %1165 = vmatpush.bf16.msra.mxu0 %v4861_v50  ;;  %637 = vst.msk [vmem:[#allocation5 + $0x1] ss:$8 sm:$0x3] %vm7596_vm0, %v4829_v18  ;;  %v6582_v22 = vld [vmem:[#allocation7 + $0xb4] sm:$0xf0]  ;;  %vm7717_vm12 = vcmp.lt.s32.totalorder %v600_v58, 320 }
  0x58   : > { %1215 = vmatpush.bf16.msra.mxu3 %v4881_v15  ;;  %v4941_v24 = vor.u32 %v6582_v22, %v4940_v20  ;;  %v6563_v25 = vld [vmem:[#allocation7 + $0x24] sm:$0xf]  ;;  %v4870_v26 = vld [vmem:[#allocation7 + $0x28] sm:$0xf0]  ;;  %v4932_v31 = vld [vmem:[#allocation7 + $0xa0] sm:$0xf] }
  0x59   : > { %v6583_v27 = vld [vmem:[#allocation7 + $0xc4] sm:$0xf]  ;;  %v4873_v29 = vor.u32 %v6563_v25, %v4870_v26  ;;  %v4950_v30 = vld [vmem:[#allocation7 + $0xc8] sm:$0xf0]  ;;  %v6580_v33 = vld [vmem:[#allocation7 + $0xa4] sm:$0xf0] }
  0x5a   : > { %653 = vrot.lane.b32.xlu0 %v4831_v34, %s7374_s27  ;;  %679 = vrot.lane.b32.xlu1 %v4834_v35, %s7374_s27  ;;  %v4953_v32 = vor.u32 %v6583_v27, %v4950_v30  ;;  %v4841_v34 = vld [vmem:[%s7569_s21 + $0x12] ss:$8 sm:$0x3]  ;;  %v4933_v37 = vor.u32 %v6580_v33, %v4932_v31  ;;  %v4844_v38 = vld [vmem:[%s7569_s21 + $0x14] ss:$8 sm:$0x3] }
  0x5b   : > { %705 = vrot.lane.b32.xlu2 %v4837_v40, %s7374_s27  ;;  %1166 = vmatpush.bf16.msra.mxu0 %v4853_v56  ;;  %741 = vst.msk [vmem:[#allocation5 + $0x5] ss:$8 sm:$0x3] %vm7596_vm0, %v4841_v34  ;;  %v4847_v39 = vld [vmem:[%s7569_s21 + $0x16] ss:$8 sm:$0x3] }
  0x5c   : > { %1176 = vmatpush.bf16.msra.mxu1 %v4941_v24  ;;  %1216 = vmatpush.bf16.msra.mxu3 %v4873_v29  ;;  %767 = vst.msk [vmem:[#allocation5 + $0x6] ss:$8 sm:$0x3] %vm7596_vm0, %v4844_v38  ;;  %v6561_v40 = vld [vmem:[#allocation7 + $0x14] sm:$0xf]  ;;  %vm1275_vm13 = vcmp.lt.s32.totalorder %v600_v58, 288 }
  0x5d   : > { %793 = vst.msk [vmem:[#allocation5 + $0x7] ss:$8 sm:$0x3] %vm7596_vm0, %v4847_v39  ;;  %v4862_v41 = vld [vmem:[#allocation7 + $0x18] sm:$0xf0]  ;;  %vm7726_vm14 = vmand %vm7649_vm6, %vm1275_vm13  ;;  %s7376_s20 = smov 64  }
  0x5e   : > { %v4865_v42 = vor.u32 %v6561_v40, %v4862_v41  ;;  %v6581_v43 = vld [vmem:[#allocation7 + $0xb4] sm:$0xf]  ;;  %v6578_v48 = vld [vmem:[#allocation7 + $0x94] sm:$0xf0]  ;;  %v4854_v50 = vld [vmem:[#allocation7 + $0x8] sm:$0xf0] }
  0x5f   : > { %1224 = vmatpush.bf16.msrb.mxu0 %v4977_v57  ;;  %v6579_v54 = vld [vmem:[#allocation7 + $0xa4] sm:$0xf]  ;;  %v4916_v57 = vld [vmem:[#allocation7 + $0x80] sm:$0xf]  ;;  %v6576_v59 = vld [vmem:[#allocation7 + $0x84] sm:$0xf0] }
  0x60   : > { %1177 = vmatpush.bf16.msra.mxu1 %v4933_v37  ;;  %1217 = vmatpush.bf16.msra.mxu3 %v4865_v42  ;;  %v4917_v61 = vor.u32 %v6576_v59, %v4916_v57  ;;  %v5036_v62 = vld [vmem:[#allocation7 + $0x170] sm:$0xf]  ;;  %v6606_v63 = vld [vmem:[#allocation7 + $0x174] sm:$0xf0]  ;;  %v6577_v1 = vld [vmem:[#allocation7 + $0x94] sm:$0xf] }
  0x61   : > { %v5037_v0 = vor.u32 %v6606_v63, %v5036_v62  ;;  %v4926_v3 = vld [vmem:[#allocation7 + $0x98] sm:$0xf0]  ;;  %v6605_v6 = vld [vmem:[#allocation7 + $0x174] sm:$0xf]  ;;  %v5028_v8 = vld [vmem:[#allocation7 + $0x160] sm:$0xf] }
  0x62   : > { %731 = vrot.lane.b32.xlu0 %v4840_v44, %s7374_s27  ;;  %757 = vrot.lane.b32.xlu1 %v4843_v45, %s7374_s27  ;;  %v4942_v44 = vld [vmem:[#allocation7 + $0xb8] sm:$0xf0]  ;;  %v4924_v45 = vld [vmem:[#allocation7 + $0x90] sm:$0xf]  ;;  %v4929_v5 = vor.u32 %v6577_v1, %v4926_v3  ;;  %v6604_v10 = vld [vmem:[#allocation7 + $0x164] sm:$0xf0] }
  0x63   : > { %783 = vrot.lane.b32.xlu2 %v4846_v49, %s7374_s27  ;;  %1225 = vmatpush.bf16.msrb.mxu0 %v4969_v7  ;;  %v4945_v47 = vor.u32 %v6581_v43, %v4942_v44  ;;  %v6559_v49 = vld [vmem:[#allocation7 + $0x4] sm:$0xf]  ;;  %v4925_v52 = vor.u32 %v6578_v48, %v4924_v45  ;;  %v5038_v7 = vld [vmem:[#allocation7 + $0x178] sm:$0xf0]  ;;  %v4918_v12 = vld [vmem:[#allocation7 + $0x88] sm:$0xf0]  ;;  %v5029_v14 = vor.u32 %v6604_v10, %v5028_v8 }
  0x64   : > { %v4857_v53 = vor.u32 %v6559_v49, %v4854_v50  ;;  %v817_v2 = vld [vmem:[#allocation5] sm:$0xff]  ;;  %1185 = vmatpush.bf16.msra.mxu2 %v5037_v0  ;;  %v5041_v9 = vor.u32 %v6605_v6, %v5038_v7  ;;  %v5020_v19 = vld [vmem:[#allocation7 + $0x150] sm:$0xf]  ;;  %v6602_v20 = vld [vmem:[#allocation7 + $0x154] sm:$0xf0]  ;;  %vm585_vm15 = vcmask 517120  }
  0x65   : > { %1178 = vmatpush.bf16.msra.mxu1 %v4925_v52  ;;  %v821_v4 = vpack.c.bf16 %v817_v2, %v817_v2  ;;  %v6575_v11 = vld [vmem:[#allocation7 + $0x84] sm:$0xf]  ;;  %v6601_v21 = vld [vmem:[#allocation7 + $0x154] sm:$0xf]  ;;  %v5021_v22 = vor.u32 %v6602_v20, %v5020_v19  ;;  %v5012_v31 = vld [vmem:[#allocation7 + $0x140] sm:$0xf] }
  0x66   : > { %1218 = vmatpush.bf16.msra.mxu3 %v4857_v53  ;;  %v6603_v15 = vld [vmem:[#allocation7 + $0x164] sm:$0xf]  ;;  %v4921_v18 = vor.u32 %v6575_v11, %v4918_v12  ;;  %v5004_v43 = vld [vmem:[#allocation7 + $0x130] sm:$0xf]  ;;  %v6598_v44 = vld [vmem:[#allocation7 + $0x134] sm:$0xf0] }
  0x67   : > { %1226 = vmatpush.bf16.msrb.mxu0 %v4961_v16  ;;  %v5030_v16 = vld [vmem:[#allocation7 + $0x168] sm:$0xf0]  ;;  %v6599_v34 = vld [vmem:[#allocation7 + $0x144] sm:$0xf]  ;;  %v5006_v48 = vld [vmem:[#allocation7 + $0x138] sm:$0xf0] }
  0x68   : > { %1167 = vmatmul.bf16.vlgmr.msra.gmra.mxu0 %v821_v4  ;;  %v5033_v17 = vor.u32 %v6603_v15, %v5030_v16  ;;  %1186 = vmatpush.bf16.msra.mxu2 %v5029_v14  ;;  %v6595_v57 = vld [vmem:[#allocation7 + $0x124] sm:$0xf]  ;;  %v4998_v59 = vld [vmem:[#allocation7 + $0x128] sm:$0xf0]  ;;  %v4988_v1 = vld [vmem:[#allocation7 + $0x110] sm:$0xf] }
  0x69   : > { %1179 = vmatpush.bf16.msra.mxu1 %v4917_v61  ;;  %1219 = vmatmul.bf16.vlgmr.msra.gmra.mxu3 %v821_v4  ;;  %v5001_v0 = vor.u32 %v6595_v57, %v4998_v59  ;;  %v6594_v2 = vld [vmem:[#allocation7 + $0x114] sm:$0xf0]  ;;  %v4990_v6 = vld [vmem:[#allocation7 + $0x118] sm:$0xf0]  ;;  %v4980_v7 = vld [vmem:[#allocation7 + $0x100] sm:$0xf] }
  0x6a   : > { %809 = vrot.lane.b32.xlu0 %v4849_v55, %s7374_s27  ;;  %v4934_v55 = vld [vmem:[#allocation7 + $0xa8] sm:$0xf0]  ;;  %v4989_v4 = vor.u32 %v6594_v2, %v4988_v1  ;;  %v6592_v8 = vld [vmem:[#allocation7 + $0x104] sm:$0xf0]  ;;  %v6591_v15 = vld [vmem:[#allocation7 + $0x104] sm:$0xf] }
  0x6b   : > { %1227 = vmatpush.bf16.msrb.mxu0 %v4953_v32  ;;  %v4937_v56 = vor.u32 %v6579_v54, %v4934_v55  ;;  %v6600_v32 = vld [vmem:[#allocation7 + $0x144] sm:$0xf0]  ;;  %v4996_v54 = vld [vmem:[#allocation7 + $0x120] sm:$0xf]  ;;  %v4981_v14 = vor.u32 %v6592_v8, %v4980_v7  ;;  %v4982_v16 = vld [vmem:[#allocation7 + $0x108] sm:$0xf0] }
  0x6c   : > { %1187 = vmatpush.bf16.msra.mxu2 %v5021_v22  ;;  %v5013_v33 = vor.u32 %v6600_v32, %v5012_v31  ;;  %v6596_v55 = vld [vmem:[#allocation7 + $0x124] sm:$0xf0]  ;;  %v4985_v20 = vor.u32 %v6591_v15, %v4982_v16  ;;  %v6607_v57 = vld [vmem:[#allocation7 + $0x184] sm:$0xf]  ;;  %v5046_v59 = vld [vmem:[#allocation7 + $0x188] sm:$0xf0] }
  0x6d   : > { %1237 = vmatpush.bf16.msrb.mxu1 %v5041_v9  ;;  %v6612_v22 = vld [vmem:[#allocation7 + $0x1a4] sm:$0xf0]  ;;  %v879_v8 = vld [vmem:[%s8790_s2] sm:$0x3]  ;;  %vm7929_vm0 = vcmp.ge.s32.totalorder %v600_v58, 64  ;;  %vm7934_vm1 = vcmp.lt.s32.totalorder %v600_v58, 384 }
  0x6e   : > { %vm7969_vm2 = vmand %vm7929_vm0, %vm7934_vm1  ;;  %s559_s19 = sand.u32 1, %s7351_s30   ;;  %vm8674_vm6 = vcmp.lt.s32.totalorder %v600_v58, 256  ;;  %vm597_vm7 = vcmask 253952   ;;  %s8853_s5 = sld [smem:[#allocation34_spill]] }
  0x6f   : > { %1228 = vmatpush.bf16.msrb.mxu0 %v4945_v47  ;;  %v6597_v47 = vld [vmem:[#allocation7 + $0x134] sm:$0xf]  ;;  %s8647_s18 = scalar_lea.vmem [#allocation18], %s559_s19  ;;  %s4648_s25 = scalar_lea.sflag [#allocation9], %s559_s19 }
  0x70   : > { %1188 = vmatpush.bf16.msra.mxu2 %v5013_v33  ;;  %v5044_v33 = vld [vmem:[#allocation7 + $0x180] sm:$0xf]  ;;  %s4663_s10 = sshll.u32 %s8647_s18, 4  ;;  %s4664_s10 = int_to_ptr.vmem [resolvable:$true] %s4663_s10 }
  0x71   : > { %1238 = vmatpush.bf16.msrb.mxu1 %v5033_v17 }
  0x73   : > { %1229 = vmatpush.bf16.msrb.mxu0 %v4937_v56  ;;  %v4997_v56 = vor.u32 %v6596_v55, %v4996_v54  ;;  %v6609_v54 = vld [vmem:[#allocation7 + $0x194] sm:$0xf]  ;;  %v5054_v55 = vld [vmem:[#allocation7 + $0x198] sm:$0xf0] }
  0x74   : > { %s4661_s24 = scalar_lea.hbm %s8853_s5, %s7473_s17  ;;  %s7301_s15 = scalar_lea.hbm %s8853_s5, 2 }
  0x75   : > { %s4665_s14 = sshll.u32 %s4661_s24, 4  ;;  %s4666_s14 = int_to_ptr.hbm [resolvable:$true] %s4665_s14 }
  0x76   : > { %s7295_s21 = sshra.s32 %s4666_s14, 4  ;;  %s7296_s21 = int_to_ptr.hbm [resolvable:$true] %s7295_s21 }
  0x77   : > { %1230 = vmatpush.bf16.msrb.mxu0 %v4929_v5  ;;  %v6593_v5 = vld [vmem:[#allocation7 + $0x114] sm:$0xf]  ;;  %p7302_p3 = scmp.lt.s32.totalorder %s7296_s21, %s8853_s5 }
  0x78   : > { %v4993_v11 = vor.u32 %v6593_v5, %v4990_v6 }
  0x7b   : > { %1231 = vmatpush.bf16.msrb.mxu0 %v4921_v18 }
  0x9d   : > { %v721_v23 = vpop.permute.xlu2 %720 }
  0x9e   : > { %v722_v28 = vrot.slane %v721_v23, 7 }
  0xa0   : > { %v723_v36 = vsel %vm612_vm3, %v722_v28, %v721_v23  ;;  %v5022_v23 = vld [vmem:[#allocation7 + $0x158] sm:$0xf0] }
  0xa1   : > { %726 = vst.msk [vmem:[#allocation5 + $0xc] ss:$8 sm:$0x3] %vm7630_vm4, %v723_v36  ;;  %v5025_v28 = vor.u32 %v6601_v21, %v5022_v23  ;;  %v5014_v36 = vld [vmem:[#allocation7 + $0x148] sm:$0xf0] }
  0xa2   : > { %v5017_v42 = vor.u32 %v6599_v34, %v5014_v36  ;;  %v5060_v21 = vld [vmem:[#allocation7 + $0x1a0] sm:$0xf]  ;;  %v5052_v23 = vld [vmem:[#allocation7 + $0x190] sm:$0xf]  ;;  %v6608_v34 = vld [vmem:[#allocation7 + $0x184] sm:$0xf0] }
  0xa3   : > { %1239 = vmatpush.bf16.msrb.mxu1 %v5025_v28  ;;  %v5061_v28 = vor.u32 %v6612_v22, %v5060_v21 }
  0xa5   : > { %v747_v46 = vpop.permute.xlu2 %746 }
  0xa6   : > { %v748_v51 = vrot.slane %v747_v46, 7 }
  0xa7   : > { %1240 = vmatpush.bf16.msrb.mxu1 %v5017_v42 }
  0xa8   : > { %v749_v60 = vsel %vm612_vm3, %v748_v51, %v747_v46  ;;  %v5005_v46 = vor.u32 %v6598_v44, %v5004_v43  ;;  %v5009_v51 = vor.u32 %v6597_v47, %v5006_v48 }
  0xa9   : > { %752 = vst.msk [vmem:[#allocation5 + $0xd] ss:$8 sm:$0x3] %vm7630_vm4, %v749_v60 }
  0xaa   : > { %1189 = vmatpush.bf16.msra.mxu2 %v5005_v46 }
  0xab   : > { %1241 = vmatpush.bf16.msrb.mxu1 %v5009_v51 }
  0xad   : > { %v625_v13 = vpop.permute.xlu2 %624 }
  0xae   : > { %v626_v24 = vrot.slane %v625_v13, 7  ;;  %1190 = vmatpush.bf16.msra.mxu2 %v4997_v56  ;;  %v5057_v56 = vor.u32 %v6609_v54, %v5054_v55  ;;  %v5126_v54 = vld [vmem:[%s8791_s3 + $0x70] sm:$0xf]  ;;  %v6628_v55 = vld [vmem:[%s8791_s3 + $0x74] sm:$0xf0] }
  0xaf   : > { %1242 = vmatpush.bf16.msrb.mxu1 %v5001_v0 }
  0xb0   : > { %v627_v40 = vsel %vm593_vm5, %v626_v24, %v625_v13  ;;  %v6610_v24 = vld [vmem:[#allocation7 + $0x194] sm:$0xf0] }
  0xb1   : > { %v5053_v31 = vor.u32 %v6610_v24, %v5052_v23 }
  0xb2   : > { %1191 = vmatpush.bf16.msra.mxu2 %v4989_v4 }
  0xb3   : > { %1243 = vmatpush.bf16.msrb.mxu1 %v4993_v11 }
  0xb4   : > { %v669_v25 = vpop.permute.xlu1 %668  ;;  %v610_v26 = vpop.permute.xlu0 %609 }
  0xb5   : > { %v670_v29 = vrot.slane %v669_v25, 7  ;;  %v611_v30 = vrot.slane %v610_v26, 7  ;;  %v706_v41 = vpop.permute.xlu2 %705 }
  0xb6   : > { %v707_v45 = vrot.slane %v706_v41, 7  ;;  %1192 = vmatpush.bf16.msra.mxu2 %v4981_v14 }
  0xb7   : > { %v671_v37 = vsel %vm612_vm3, %v670_v29, %v669_v25  ;;  %v613_v38 = vsel %vm612_vm3, %v611_v30, %v610_v26  ;;  %1244 = vmatpush.bf16.msrb.mxu1 %v4985_v20 }
  0xb8   : > { %674 = vst.msk [vmem:[#allocation5 + $0xa] ss:$8 sm:$0x3] %vm7630_vm4, %v671_v37  ;;  %v708_v62 = vsel %vm593_vm5, %v707_v45, %v706_v41 }
  0xb9   : > { %619 = vst.msk [vmem:[#allocation5 + $0x8] ss:$8 sm:$0x3] %vm7630_vm4, %v613_v38  ;;  %v5045_v38 = vor.u32 %v6608_v34, %v5044_v33 }
  0xba   : > { %633 = vst.msk [vmem:[#allocation5 + $0x10] ss:$8 sm:$0x3] %vm7658_vm8, %v627_v40  ;;  %1203 = vmatpush.bf16.msrb.mxu2 %v5061_v28 }
  0xbc   : > { %v695_v49 = vpop.permute.xlu1 %694  ;;  %v643_v50 = vpop.permute.xlu0 %642 }
  0xbd   : > { %v696_v52 = vrot.slane %v695_v49, 7  ;;  %v644_v53 = vrot.slane %v643_v50, 7  ;;  %v784_v63 = vpop.permute.xlu2 %783 }
  0xbe   : > { %v785_v3 = vrot.slane %v784_v63, 7  ;;  %1204 = vmatpush.bf16.msrb.mxu2 %v5053_v31 }
  0xbf   : > { %v697_v60 = vsel %vm612_vm3, %v696_v52, %v695_v49  ;;  %v645_v61 = vsel %vm612_vm3, %v644_v53, %v643_v50  ;;  %v6611_v49 = vld [vmem:[#allocation7 + $0x1a4] sm:$0xf]  ;;  %v5062_v50 = vld [vmem:[#allocation7 + $0x1a8] sm:$0xf0] }
  0xc0   : > { %700 = vst.msk [vmem:[#allocation5 + $0xb] ss:$8 sm:$0x3] %vm7630_vm4, %v697_v60  ;;  %v786_v19 = vsel %vm593_vm5, %v785_v3, %v784_v63  ;;  %v5065_v52 = vor.u32 %v6611_v49, %v5062_v50  ;;  %v5049_v60 = vor.u32 %v6607_v57, %v5046_v59  ;;  %v5127_v57 = vor.u32 %v6628_v55, %v5126_v54  ;;  %v6644_v59 = vld [vmem:[%s8791_s3 + $0xf4] sm:$0xf0] }
  0xc1   : > { %648 = vst.msk [vmem:[#allocation5 + $0x9] ss:$8 sm:$0x3] %vm7630_vm4, %v645_v61 }
  0xc2   : > { %711 = vst.msk [vmem:[#allocation5 + $0x13] ss:$8 sm:$0x3] %vm7658_vm8, %v708_v62  ;;  %1205 = vmatpush.bf16.msrb.mxu2 %v5045_v38  ;;  %2196 = vmatpush.bf16.msrb.mxu3 %v5127_v57  ;;  %v6660_v38 = vld [vmem:[%s8791_s3 + $0x174] sm:$0xf0] }
  0xc4   : > { %v799_v9 = vpop.permute.xlu1 %798  ;;  %v773_v10 = vpop.permute.xlu0 %772 }
  0xc5   : > { %v800_v12 = vrot.slane %v799_v9, 7  ;;  %v774_v13 = vrot.slane %v773_v10, 7 }
  0xc7   : > { %v801_v17 = vsel %vm612_vm3, %v800_v12, %v799_v9  ;;  %v775_v18 = vsel %vm612_vm3, %v774_v13, %v773_v10  ;;  %v881_v10 = vperm.slane %v879_v8, 0  ;;  %vm589_vm3 = vcmask 520192  }
  0xc8   : > { %804 = vst.msk [vmem:[#allocation5 + $0xf] ss:$8 sm:$0x3] %vm7630_vm4, %v801_v17 }
  0xc9   : > { %778 = vst.msk [vmem:[#allocation5 + $0xe] ss:$8 sm:$0x3] %vm7630_vm4, %v775_v18  ;;  %v882_v18 = vperm.slane %v879_v8, 1  ;;  %vm2408_vm4 = vcmask 1043456  }
  0xca   : > { %789 = vst.msk [vmem:[#allocation5 + $0x16] ss:$8 sm:$0x3] %vm7658_vm8, %v786_v19 }
  0xcc   : > { %v654_v25 = vpop.permute.xlu0 %653  ;;  %v680_v26 = vpop.permute.xlu1 %679 }
  0xcd   : > { %v655_v29 = vrot.slane %v654_v25, 7  ;;  %v681_v30 = vrot.slane %v680_v26, 7 }
  0xcf   : > { %v656_v32 = vsel %vm593_vm5, %v655_v29, %v654_v25  ;;  %v682_v35 = vsel %vm593_vm5, %v681_v30, %v680_v26 }
  0xd0   : > { %659 = vst.msk [vmem:[#allocation5 + $0x11] ss:$8 sm:$0x3] %vm7658_vm8, %v656_v32  ;;  %v818_v36 = vld [vmem:[#allocation5 + $0x8] sm:$0xff] }
  0xd1   : > { %685 = vst.msk [vmem:[#allocation5 + $0x12] ss:$8 sm:$0x3] %vm7658_vm8, %v682_v35  ;;  %v822_v37 = vpack.c.bf16 %v818_v36, %v818_v36  ;;  %v7375_v35 = vmov 0.0  }
  0xd2   : > { %579 = vst [vmem:[#allocation2] sm:$0xff] %v7375_v35 }
  0xd3   : > { %1180 = vmatmul.bf16.vlgmr.msra.gmra.mxu1 %v822_v37  ;;  %1232 = vmatmul.bf16.vlgmr.msrb.gmra.mxu0 %v822_v37  ;;  %580 = vst [vmem:[#allocation2 + $0x8] sm:$0xff] %v7375_v35 }
  0xd4   : > { %v732_v40 = vpop.permute.xlu0 %731  ;;  %v758_v41 = vpop.permute.xlu1 %757  ;;  %582 = vst.msk [vmem:[#allocation2 + $0x10] sm:$0xff] %vm581_vm11, %v7375_v35 }
  0xd5   : > { %v733_v42 = vrot.slane %v732_v40, 7  ;;  %v759_v43 = vrot.slane %v758_v41, 7  ;;  %583 = vst [vmem:[#allocation2 + $0x18] sm:$0x3] %v7375_v35 }
  0xd6   : > { %584 = vst [vmem:[#allocation2 + $0x20] sm:$0x3] %v7375_v35 }
  0xd7   : > { %v734_v44 = vsel %vm593_vm5, %v733_v42, %v732_v40  ;;  %v760_v45 = vsel %vm593_vm5, %v759_v43, %v758_v41  ;;  %587 = vst [vmem:[#allocation3] sm:$0x1f] %v7375_v35 }
  0xd8   : > { %737 = vst.msk [vmem:[#allocation5 + $0x14] ss:$8 sm:$0x3] %vm7658_vm8, %v734_v44 }
  0xd9   : > { %763 = vst.msk [vmem:[#allocation5 + $0x15] ss:$8 sm:$0x3] %vm7658_vm8, %v760_v45 }
  0xda   : > { %588 = vst [vmem:[#allocation3 + $0x8] sm:$0x1f] %v7375_v35 }
  0xdb   : > { %591 = vst [vmem:[#allocation4] sm:$0xff] %v7375_v35  ;;  %v1364_v40 = vld [vmem:[#allocation2] ss:$8 sm:$0x7] }
  0xdc   : > { %v810_v46 = vpop.permute.xlu0 %809  ;;  %592 = vst [vmem:[#allocation4 + $0x8] sm:$0xff] %v7375_v35 }
  0xdd   : > { %v811_v47 = vrot.slane %v810_v46, 7  ;;  %594 = vst.msk [vmem:[#allocation4 + $0x10] sm:$0xff] %vm593_vm5, %v7375_v35 }
  0xde   : > { %595 = vst [vmem:[#allocation4 + $0x18] sm:$0x1] %v7375_v35 }
  0xdf   : > { %v812_v48 = vsel %vm593_vm5, %v811_v47, %v810_v46  ;;  %596 = vst [vmem:[#allocation4 + $0x20] sm:$0x1] %v7375_v35 }
  0xe0   : > { %815 = vst.msk [vmem:[#allocation5 + $0x17] ss:$8 sm:$0x3] %vm7658_vm8, %v812_v48 }
  0xe1   : > { %1367 = vst.msk [vmem:[#allocation6] ss:$4 sm:$0x7] %vm7717_vm12, %v1364_v40  ;;  %v6616_v40 = vld [vmem:[%s8791_s3 + $0x14] sm:$0xf0] }
  0xe2   : > { %586 = vst.msk [vmem:[#allocation2 + $0x28] sm:$0x3] %vm585_vm15, %v7375_v35  ;;  %v5078_v35 = vld [vmem:[%s8791_s3 + $0x10] sm:$0xf] }
  0xe5   : > { %v1168_v62 = vpop.f32.mrf.mxu0 }
  0xe6   : > { %v1169_v12 = vadd.f32 %v1168_v62, %v881_v10  ;;  %v5182_v62 = vld [vmem:[%s8791_s3 + $0xe0] sm:$0xf] }
  0xe7   : > { %v819_v51 = vld [vmem:[#allocation5 + $0x10] sm:$0xff]  ;;  %v820_v61 = vld [vmem:[#allocation5 + $0x18] sm:$0xff] }
  0xe8   : > { %v823_v53 = vpack.c.bf16 %v819_v51, %v819_v51  ;;  %v824_v39 = vpack.c.bf16 %v820_v61, %v820_v61  ;;  %v5118_v61 = vld [vmem:[%s8791_s3 + $0x60] sm:$0xf] }
  0xea   : > { %1193 = vmatmul.bf16.vlgmr.msra.gmra.mxu2 %v823_v53  ;;  %1245 = vmatmul.bf16.vlgmr.msrb.gmra.mxu1 %v823_v53 }
  0xeb   : > { %1255 = vmatpush.bf16.msra.mxu2 %v5065_v52 }
  0xec   : > { %v1220_v63 = vpop.f32.mrf.mxu3 }
  0xed   : > { %v1170_v0 = vpop.f32.mrf.mxu0  ;;  %v1221_v20 = vadd.f32 %v1220_v63, %v882_v18 }
  0xee   : > { %v6642_v0 = vld [vmem:[%s8791_s3 + $0xe4] sm:$0xf0] }
  0xef   : > { %1256 = vmatpush.bf16.msra.mxu2 %v5057_v56  ;;  %v5190_v56 = vld [vmem:[%s8791_s3 + $0xf0] sm:$0xf] }
  0xf3   : > { %1257 = vmatpush.bf16.msra.mxu2 %v5049_v60  ;;  %v5191_v60 = vor.u32 %v6644_v59, %v5190_v56 }
  0xf4   : > { %v1222_v1 = vpop.f32.mrf.mxu3 }
  0xf5   : > { %v5183_v1 = vor.u32 %v6642_v0, %v5182_v62 }
  0xfa   : > { %5066 = vmatmul.msk.bf16.vlgmr.msrb.gmra.mxu2 %vm1155_vm9, %v824_v39 }
  0xfb   : > { %2209 = vmatpush.bf16.msrb.mxu2 %v5191_v60 }
  0xff   : > { %2210 = vmatpush.bf16.msrb.mxu2 %v5183_v1 }
 0x10a   : > { %5067 = vmatmul.msk.bf16.vlgmr.msra.gmra.mxu2 %vm1155_vm9, %v824_v39  ;;  %v6626_v39 = vld [vmem:[%s8791_s3 + $0x64] sm:$0xf0] }
 0x10b   : > { %v5119_v63 = vor.u32 %v6626_v39, %v5118_v61 }
 0x10d   : > { %2197 = vmatpush.bf16.msrb.mxu3 %v5119_v63 }
 0x150   : > { %v1181_v2 = vpop.f32.mrf.mxu1  ;;  %v1233_v3 = vpop.f32.mrf.mxu0 }
 0x151   : > { %v1182_v13 = vadd.f32 %v1181_v2, %v1169_v12  ;;  %v1234_v21 = vadd.f32 %v1233_v3, %v1221_v20  ;;  %v5110_v2 = vld [vmem:[%s8791_s3 + $0x50] sm:$0xf]  ;;  %v6624_v3 = vld [vmem:[%s8791_s3 + $0x54] sm:$0xf0]  ;;  %v5102_v12 = vld [vmem:[%s8791_s3 + $0x40] sm:$0xf] }
 0x152   : > { %v5094_v20 = vld [vmem:[%s8791_s3 + $0x30] sm:$0xf] }
 0x158   : > { %v1183_v4 = vpop.f32.mrf.mxu1  ;;  %v1235_v5 = vpop.f32.mrf.mxu0 }
 0x159   : > { %v5174_v4 = vld [vmem:[%s8791_s3 + $0xd0] sm:$0xf] }
 0x167   : > { %v1246_v6 = vpop.f32.mrf.mxu1 }
 0x168   : > { %v1247_v22 = vadd.f32 %v1246_v6, %v1234_v21  ;;  %v5111_v6 = vor.u32 %v6624_v3, %v5110_v2 }
 0x16a   : > { %2198 = vmatpush.bf16.msrb.mxu3 %v5111_v6 }
 0x16d   : > { %v1194_v7 = vpop.f32.mrf.mxu2 }
 0x16e   : > { %v1195_v14 = vadd.f32 %v1194_v7, %v1182_v13  ;;  %v6640_v7 = vld [vmem:[%s8791_s3 + $0xd4] sm:$0xf0]  ;;  %v6622_v13 = vld [vmem:[%s8791_s3 + $0x44] sm:$0xf0] }
 0x16f   : > { %v1248_v9 = vpop.f32.mrf.mxu1 }
 0x170   : > { %v5175_v9 = vor.u32 %v6640_v7, %v5174_v4  ;;  %v5254_v4 = vld [vmem:[%s8791_s3 + $0x170] sm:$0xf]  ;;  %v6692_v7 = vld [vmem:[%s8791_s3 + $0x274] sm:$0xf0] }
 0x171   : > { %v5255_v6 = vor.u32 %v6660_v38, %v5254_v4  ;;  %v5342_v38 = vld [vmem:[%s8791_s3 + $0x220] sm:$0xf] }
 0x172   : > { %2211 = vmatpush.bf16.msrb.mxu2 %v5175_v9  ;;  %v6708_v9 = vld [vmem:[%s8791_s3 + $0x2f4] sm:$0xf0] }
 0x173   : > { %2222 = vmatpush.bf16.msra.mxu0 %v5255_v6  ;;  %v5406_v6 = vld [vmem:[%s8791_s3 + $0x2a0] sm:$0xf] }
 0x175   : > { %v1196_v11 = vpop.f32.mrf.mxu2 }
 0x17d   : > { %v1207_v15 = vpop.f32.mrf.mxu2 }
 0x17e   : > { %v1208_v16 = vadd.f32 %v1207_v15, %v1195_v14  ;;  %v5166_v14 = vld [vmem:[%s8791_s3 + $0xc0] sm:$0xf] }
 0x180   : > { %v1263_v17 = vmax.f32 %v1208_v16, 0.0  ;;  %v5103_v16 = vor.u32 %v6622_v13, %v5102_v12  ;;  %v5246_v12 = vld [vmem:[%s8791_s3 + $0x160] sm:$0xf]  ;;  %v6658_v13 = vld [vmem:[%s8791_s3 + $0x164] sm:$0xf0] }
 0x182   : > { %1280 = vst [vmem:[#allocation1] sm:$0xff] %v1263_v17  ;;  %2199 = vmatpush.bf16.msrb.mxu3 %v5103_v16  ;;  %v6690_v16 = vld [vmem:[%s8791_s3 + $0x264] sm:$0xf0] }
 0x185   : > { %v1209_v19 = vpop.f32.mrf.mxu2 }
 0x18d   : > { %v1259_v23 = vpop.f32.mrf.mxu2 }
 0x18e   : > { %v1260_v24 = vadd.f32 %v1259_v23, %v1247_v22  ;;  %v6620_v22 = vld [vmem:[%s8791_s3 + $0x34] sm:$0xf0]  ;;  %v5158_v23 = vld [vmem:[%s8791_s3 + $0xb0] sm:$0xf] }
 0x190   : > { %v1264_v25 = vmax.f32 %v1260_v24, 0.0  ;;  %v6636_v24 = vld [vmem:[%s8791_s3 + $0xb4] sm:$0xf0] }
 0x192   : > { %1281 = vst [vmem:[#allocation1 + $0x9] sm:$0xff] %v1264_v25  ;;  %v1267_v26 = vrot.slane %v1264_v25, 7 }
 0x194   : > { %v1269_v28 = vsel %vm1268_vm10, %v1263_v17, %v1267_v26  ;;  %v5095_v26 = vor.u32 %v6620_v22, %v5094_v20  ;;  %v6656_v22 = vld [vmem:[%s8791_s3 + $0x154] sm:$0xf0] }
 0x195   : > { %v1261_v29 = vpop.f32.mrf.mxu2  ;;  %1270 = vrot.lane.b32.xlu1 %v1269_v28, %s7374_s27  ;;  %v5159_v28 = vor.u32 %v6636_v24, %v5158_v23  ;;  %v5366_v23 = vld [vmem:[%s8791_s3 + $0x250] sm:$0xf]  ;;  %v6688_v24 = vld [vmem:[%s8791_s3 + $0x254] sm:$0xf0] }
 0x196   : > { %v5086_v29 = vld [vmem:[%s8791_s3 + $0x20] sm:$0xf]  ;;  %2200 = vmatpush.bf16.msrb.mxu3 %v5095_v26  ;;  %v6704_v26 = vld [vmem:[%s8791_s3 + $0x2d4] sm:$0xf0] }
 0x199   : > { %v1283_v30 = vld [vmem:[#allocation1 + $0x1] ss:$9 sm:$0xff] }
 0x19a   : > { %1292 = vst [vmem:[#allocation1] sm:$0xff] %v1263_v17 }
 0x19b   : > { %1293 = vst [vmem:[#allocation1 + $0x9] sm:$0xff] %v1264_v25 }
 0x1a2   : > { %v1295_v31 = vld [vmem:[#allocation1 + $0x2] ss:$9 sm:$0xff] }
 0x1a3   : > { %1304 = vst [vmem:[#allocation1] sm:$0xff] %v1263_v17  ;;  %1296 = vrot.lane.b32.xlu2 %v1295_v31, %s7374_s27  ;;  %v5150_v31 = vld [vmem:[%s8791_s3 + $0xa0] sm:$0xf] }
 0x1a4   : > { %1305 = vst [vmem:[#allocation1 + $0x9] sm:$0xff] %v1264_v25 }
 0x1ab   : > { %v1307_v32 = vld [vmem:[#allocation1 + $0x3] ss:$9 sm:$0xff]  ;;  %1284 = vrot.lane.b32.xlu2 %v1283_v30, %s7374_s27  ;;  %v6618_v30 = vld [vmem:[%s8791_s3 + $0x24] sm:$0xf0] }
 0x1ac   : > { %1316 = vst [vmem:[#allocation1] sm:$0xff] %v1263_v17 }
 0x1ad   : > { %1317 = vst [vmem:[#allocation1 + $0x9] sm:$0xff] %v1264_v25 }
 0x1b4   : > { %v1319_v33 = vld [vmem:[#allocation1 + $0x4] ss:$9 sm:$0xff] }
 0x1b5   : > { %1328 = vst [vmem:[#allocation1] sm:$0xff] %v1263_v17  ;;  %1320 = vrot.lane.b32.xlu0 %v1319_v33, %s7374_s27 }
 0x1b6   : > { %1329 = vst [vmem:[#allocation1 + $0x9] sm:$0xff] %v1264_v25 }
 0x1bd   : > { %v1331_v34 = vld [vmem:[#allocation1 + $0x5] ss:$9 sm:$0xff]  ;;  %1308 = vrot.lane.b32.xlu0 %v1307_v32, %s7374_s27 }
 0x1be   : > { %1340 = vst [vmem:[#allocation1] sm:$0xff] %v1263_v17  ;;  %v6634_v32 = vld [vmem:[%s8791_s3 + $0xa4] sm:$0xf0] }
 0x1bf   : > { %1341 = vst [vmem:[#allocation1 + $0x9] sm:$0xff] %v1264_v25 }
 0x1c6   : > { %v1343_v36 = vld [vmem:[#allocation1 + $0x6] ss:$9 sm:$0xff] }
 0x1c7   : > { %1353 = vst [vmem:[#allocation1 + $0x9] sm:$0xff] %v1264_v25  ;;  %1344 = vrot.lane.b32.xlu1 %v1343_v36, %s7374_s27  ;;  %v5087_v36 = vor.u32 %v6618_v30, %v5086_v29  ;;  %v5326_v29 = vld [vmem:[%s8791_s3 + $0x200] sm:$0xf] }
 0x1c8   : > { %1352 = vst [vmem:[#allocation1] sm:$0xff] %v1263_v17  ;;  %v6638_v17 = vld [vmem:[%s8791_s3 + $0xc4] sm:$0xf0] }
 0x1c9   : > { %v5167_v18 = vor.u32 %v6638_v17, %v5166_v14  ;;  %2201 = vmatpush.bf16.msrb.mxu3 %v5087_v36  ;;  %v5374_v14 = vld [vmem:[%s8791_s3 + $0x260] sm:$0xf]  ;;  %v5318_v36 = vld [vmem:[%s8791_s3 + $0x1f0] sm:$0xf] }
 0x1ca   : > { %v5438_v17 = vld [vmem:[%s8791_s3 + $0x2e0] sm:$0xf] }
 0x1cb   : > { %2212 = vmatpush.bf16.msrb.mxu2 %v5167_v18  ;;  %v6706_v18 = vld [vmem:[%s8791_s3 + $0x2e4] sm:$0xf0] }
 0x1cc   : > { %v5439_v20 = vor.u32 %v6706_v18, %v5438_v17  ;;  %v5334_v17 = vld [vmem:[%s8791_s3 + $0x210] sm:$0xf]  ;;  %v6680_v18 = vld [vmem:[%s8791_s3 + $0x214] sm:$0xf0] }
 0x1cf   : > { %v1355_v37 = vld [vmem:[#allocation1 + $0x7] ss:$9 sm:$0xff]  ;;  %1332 = vrot.lane.b32.xlu1 %v1331_v34, %s7374_s27  ;;  %2213 = vmatpush.bf16.msrb.mxu2 %v5159_v28 }
 0x1d0   : > { %1356 = vrot.lane.b32.xlu2 %v1355_v37, %s7374_s27  ;;  %v5151_v37 = vor.u32 %v6634_v32, %v5150_v31  ;;  %v5230_v31 = vld [vmem:[%s8791_s3 + $0x140] sm:$0xf]  ;;  %v6654_v32 = vld [vmem:[%s8791_s3 + $0x144] sm:$0xf0] }
 0x1d3   : > { %2214 = vmatpush.bf16.msrb.mxu2 %v5151_v37  ;;  %v6676_v37 = vld [vmem:[%s8791_s3 + $0x1f4] sm:$0xf0] }
 0x1fd   : > { %v1297_v41 = vpop.permute.xlu2 %1296 }
 0x1fe   : > { %v1298_v43 = vrot.slane %v1297_v41, 7 }
 0x200   : > { %v1299_v44 = vsel %vm593_vm5, %v1298_v43, %v1297_v41  ;;  %v5142_v41 = vld [vmem:[%s8791_s3 + $0x90] sm:$0xf]  ;;  %v6632_v43 = vld [vmem:[%s8791_s3 + $0x94] sm:$0xf0] }
 0x201   : > { %1302 = vst.msk [vmem:[#allocation2 + $0x3] ss:$8 sm:$0x7] %vm7726_vm14, %v1299_v44 }
 0x205   : > { %v1285_v45 = vpop.permute.xlu2 %1284 }
 0x206   : > { %v1286_v46 = vrot.slane %v1285_v45, 7 }
 0x207   : > { %v1271_v47 = vpop.permute.xlu1 %1270 }
 0x208   : > { %v1287_v48 = vsel %vm593_vm5, %v1286_v46, %v1285_v45  ;;  %v1272_v49 = vrot.slane %v1271_v47, 7  ;;  %v1386_v50 = vld [vmem:[#allocation2 + $0x3] ss:$8 sm:$0x7]  ;;  %v5079_v45 = vor.u32 %v6616_v40, %v5078_v35  ;;  %v5143_v46 = vor.u32 %v6632_v43, %v5142_v41  ;;  %v5422_v41 = vld [vmem:[%s8791_s3 + $0x2c0] sm:$0xf] }
 0x209   : > { %1290 = vst.msk [vmem:[#allocation2 + $0x2] ss:$8 sm:$0x7] %vm7726_vm14, %v1287_v48  ;;  %1388 = vrot.lane.b32.xlu1 %v1386_v50, %s7376_s20  ;;  %v6614_v48 = vld [vmem:[%s8791_s3 + $0x4] sm:$0xf0]  ;;  %v5367_v35 = vor.u32 %v6688_v24, %v5366_v23 }
 0x20a   : > { %v1273_v27 = vsel %vm593_vm5, %v1272_v49, %v1271_v47  ;;  %v5070_v47 = vld [vmem:[%s8791_s3] sm:$0xf]  ;;  %v6630_v50 = vld [vmem:[%s8791_s3 + $0x84] sm:$0xf0]  ;;  %2202 = vmatpush.bf16.msrb.mxu3 %v5079_v45  ;;  %2215 = vmatpush.bf16.msrb.mxu2 %v5143_v46  ;;  %v5286_v24 = vld [vmem:[%s8791_s3 + $0x1b0] sm:$0xf] }
 0x20b   : > { %1278 = vst.msk [vmem:[#allocation2 + $0x1] ss:$8 sm:$0x7] %vm7726_vm14, %v1273_v27  ;;  %v5134_v49 = vld [vmem:[%s8791_s3 + $0x80] sm:$0xf] }
 0x20c   : > { %v5135_v54 = vor.u32 %v6630_v50, %v5134_v49  ;;  %v6686_v40 = vld [vmem:[%s8791_s3 + $0x244] sm:$0xf0]  ;;  %v5310_v46 = vld [vmem:[%s8791_s3 + $0x1e0] sm:$0xf]  ;;  %v5231_v49 = vor.u32 %v6654_v32, %v5230_v31  ;;  %v5222_v50 = vld [vmem:[%s8791_s3 + $0x130] sm:$0xf] }
 0x20d   : > { %v6702_v43 = vld [vmem:[%s8791_s3 + $0x2c4] sm:$0xf0]  ;;  %v5390_v31 = vld [vmem:[%s8791_s3 + $0x280] sm:$0xf] }
 0x20e   : > { %2216 = vmatpush.bf16.msrb.mxu2 %v5135_v54  ;;  %v5350_v54 = vld [vmem:[%s8791_s3 + $0x230] sm:$0xf]  ;;  %v6646_v23 = vld [vmem:[%s8791_s3 + $0x104] sm:$0xf0] }
 0x210   : > { %v1380_v51 = vld [vmem:[#allocation2 + $0x2] ss:$8 sm:$0x7] }
 0x211   : > { %v1383_v52 = vld [vmem:[#allocation2 + $0x2] ss:$8 sm:$0x7]  ;;  %1382 = vst.msk [vmem:[#allocation6 + $0x14] ss:$4 sm:$0x7] %vm7717_vm12, %v1380_v51 }
 0x212   : > { %1385 = vst.msk [vmem:[#allocation6 + $0x1] ss:$4 sm:$0x7] %vm7717_vm12, %v1383_v52  ;;  %v1368_v53 = vld [vmem:[#allocation2 + $0x1] ss:$8 sm:$0x7] }
 0x213   : > { %1370 = vrot.lane.b32.xlu0 %v1368_v53, %s7376_s20  ;;  %v5071_v53 = vor.u32 %v6614_v48, %v5070_v47  ;;  %v5320_v47 = vld [vmem:[%s8791_s3 + $0x1f8] sm:$0xf0] }
 0x215   : > { %2203 = vmatpush.bf16.msrb.mxu3 %v5071_v53  ;;  %v6652_v53 = vld [vmem:[%s8791_s3 + $0x134] sm:$0xf0] }
 0x227   : > { %v1321_v5 = vpop.permute.xlu0 %1320 }
 0x228   : > { %v1322_v8 = vrot.slane %v1321_v5, 7 }
 0x22a   : > { %v1323_v10 = vsel %vm593_vm5, %v1322_v8, %v1321_v5  ;;  %v1357_v11 = vpop.permute.xlu2 %1356  ;;  %v5382_v5 = vld [vmem:[%s8791_s3 + $0x270] sm:$0xf] }
 0x22b   : > { %1326 = vst.msk [vmem:[#allocation2 + $0x5] ss:$8 sm:$0x7] %vm7726_vm14, %v1323_v10  ;;  %v1358_v15 = vrot.slane %v1357_v11, 7  ;;  %v5446_v8 = vld [vmem:[%s8791_s3 + $0x2f0] sm:$0xf]  ;;  %v5383_v10 = vor.u32 %v6692_v7, %v5382_v5 }
 0x22c   : > { %v6682_v5 = vld [vmem:[%s8791_s3 + $0x224] sm:$0xf0] }
 0x22d   : > { %v1359_v19 = vsel %vm593_vm5, %v1358_v15, %v1357_v11  ;;  %v5447_v11 = vor.u32 %v6708_v9, %v5446_v8  ;;  %v5247_v15 = vor.u32 %v6658_v13, %v5246_v12  ;;  %2248 = vmatpush.bf16.msra.mxu3 %v5383_v10  ;;  %v6698_v7 = vld [vmem:[%s8791_s3 + $0x2a4] sm:$0xf0]  ;;  %v5294_v8 = vld [vmem:[%s8791_s3 + $0x1c0] sm:$0xf] }
 0x22e   : > { %1362 = vst.msk [vmem:[#allocation2 + $0x18] ss:$8 sm:$0x7] %vm7726_vm14, %v1359_v19  ;;  %v5375_v19 = vor.u32 %v6690_v16, %v5374_v14  ;;  %v6670_v9 = vld [vmem:[%s8791_s3 + $0x1c4] sm:$0xf0]  ;;  %v5343_v14 = vor.u32 %v6682_v5, %v5342_v38 }
 0x22f   : > { %v1309_v21 = vpop.permute.xlu0 %1308  ;;  %2261 = vmatpush.bf16.msra.mxu2 %v5447_v11  ;;  %2223 = vmatpush.bf16.msra.mxu0 %v5247_v15  ;;  %v5206_v11 = vld [vmem:[%s8791_s3 + $0x110] sm:$0xf]  ;;  %v5295_v12 = vor.u32 %v6670_v9, %v5294_v8  ;;  %v5407_v15 = vor.u32 %v6698_v7, %v5406_v6  ;;  %v6648_v16 = vld [vmem:[%s8791_s3 + $0x114] sm:$0xf0]  ;;  %v6623_v38 = vld [vmem:[%s8791_s3 + $0x54] sm:$0xf] }
 0x230   : > { %v1310_v25 = vrot.slane %v1309_v21, 7  ;;  %v5207_v28 = vor.u32 %v6648_v16, %v5206_v11  ;;  %v5112_v6 = vld [vmem:[%s8791_s3 + $0x58] sm:$0xf0]  ;;  %v6655_v7 = vld [vmem:[%s8791_s3 + $0x154] sm:$0xf] }
 0x231   : > { %2249 = vmatpush.bf16.msra.mxu3 %v5375_v19  ;;  %v5240_v8 = vld [vmem:[%s8791_s3 + $0x158] sm:$0xf0]  ;;  %v5115_v9 = vor.u32 %v6623_v38, %v5112_v6  ;;  %v5270_v11 = vld [vmem:[%s8791_s3 + $0x190] sm:$0xf]  ;;  %v6621_v16 = vld [vmem:[%s8791_s3 + $0x44] sm:$0xf] }
 0x232   : > { %v1311_v33 = vsel %vm593_vm5, %v1310_v25, %v1309_v21  ;;  %v1401_v34 = vld [vmem:[#allocation2 + $0x5] ss:$8 sm:$0x7]  ;;  %v5238_v21 = vld [vmem:[%s8791_s3 + $0x150] sm:$0xf] }
 0x233   : > { %1314 = vst.msk [vmem:[#allocation2 + $0x4] ss:$8 sm:$0x7] %vm7726_vm14, %v1311_v33  ;;  %1403 = vrot.lane.b32.xlu2 %v1401_v34, %s7376_s20  ;;  %v5430_v25 = vld [vmem:[%s8791_s3 + $0x2d0] sm:$0xf]  ;;  %v5239_v30 = vor.u32 %v6656_v22, %v5238_v21  ;;  %2262 = vmatpush.bf16.msra.mxu2 %v5439_v20 }
 0x234   : > { %v5431_v33 = vor.u32 %v6704_v26, %v5430_v25  ;;  %v5358_v34 = vld [vmem:[%s8791_s3 + $0x240] sm:$0xf]  ;;  %v5398_v20 = vld [vmem:[%s8791_s3 + $0x290] sm:$0xf]  ;;  %v6696_v21 = vld [vmem:[%s8791_s3 + $0x294] sm:$0xf0] }
 0x235   : > { %v1425_v44 = vld [vmem:[#allocation2 + $0x18] ss:$8 sm:$0x7]  ;;  %2224 = vmatpush.bf16.msra.mxu0 %v5239_v30  ;;  %2250 = vmatpush.bf16.msra.mxu3 %v5367_v35  ;;  %v6668_v25 = vld [vmem:[%s8791_s3 + $0x1b4] sm:$0xf0]  ;;  %v5335_v35 = vor.u32 %v6680_v18, %v5334_v17 }
 0x236   : > { %1427 = vst.msk [vmem:[#allocation6 + $0x17] ss:$4 sm:$0x7] %vm7717_vm12, %v1425_v44  ;;  %v5319_v44 = vor.u32 %v6676_v37, %v5318_v36  ;;  %v5198_v22 = vld [vmem:[%s8791_s3 + $0x100] sm:$0xf]  ;;  %v5287_v32 = vor.u32 %v6668_v25, %v5286_v24 }
 0x237   : > { %2263 = vmatpush.bf16.msra.mxu2 %v5431_v33  ;;  %v6678_v30 = vld [vmem:[%s8791_s3 + $0x204] sm:$0xf0]  ;;  %v5399_v33 = vor.u32 %v6696_v21, %v5398_v20  ;;  %v5510_v36 = vld [vmem:[%s8791_s3 + $0x370] sm:$0xf]  ;;  %v5278_v37 = vld [vmem:[%s8791_s3 + $0x1a0] sm:$0xf] }
 0x238   : > { %2235 = vmatpush.bf16.msra.mxu1 %v5319_v44  ;;  %v5128_v44 = vld [vmem:[%s8791_s3 + $0x78] sm:$0xf0]  ;;  %v5104_v18 = vld [vmem:[%s8791_s3 + $0x48] sm:$0xf0]  ;;  %v6662_v24 = vld [vmem:[%s8791_s3 + $0x184] sm:$0xf0] }
 0x239   : > { %v1345_v27 = vpop.permute.xlu1 %1344  ;;  %2225 = vmatpush.bf16.msra.mxu0 %v5231_v49  ;;  %v5232_v20 = vld [vmem:[%s8791_s3 + $0x148] sm:$0xf0]  ;;  %v5107_v21 = vor.u32 %v6621_v16, %v5104_v18  ;;  %v6710_v6 = vld [vmem:[%s8791_s3 + $0x304] sm:$0xf0] }
 0x23a   : > { %v1395_v51 = vld [vmem:[#allocation2 + $0x4] ss:$8 sm:$0x7]  ;;  %v1346_v55 = vrot.slane %v1345_v27, 7 }
 0x23b   : > { %v1398_v52 = vld [vmem:[#allocation2 + $0x4] ss:$8 sm:$0x7]  ;;  %1397 = vst.msk [vmem:[#allocation6 + $0x15] ss:$4 sm:$0x7] %vm7717_vm12, %v1395_v51  ;;  %v5359_v51 = vor.u32 %v6686_v40, %v5358_v34 }
 0x23c   : > { %1400 = vst.msk [vmem:[#allocation6 + $0x2] ss:$4 sm:$0x7] %vm7717_vm12, %v1398_v52  ;;  %v1347_v56 = vsel %vm593_vm5, %v1346_v55, %v1345_v27  ;;  %v6674_v27 = vld [vmem:[%s8791_s3 + $0x1e4] sm:$0xf0]  ;;  %v5423_v52 = vor.u32 %v6702_v43, %v5422_v41 }
 0x23d   : > { %1350 = vst.msk [vmem:[#allocation2 + $0x7] ss:$8 sm:$0x7] %vm7726_vm14, %v1347_v56  ;;  %v6684_v55 = vld [vmem:[%s8791_s3 + $0x234] sm:$0xf0]  ;;  %v5311_v56 = vor.u32 %v6674_v27, %v5310_v46  ;;  %2251 = vmatpush.bf16.msra.mxu3 %v5359_v51  ;;  %v5327_v27 = vor.u32 %v6678_v30, %v5326_v29 }
 0x23e   : > { %2264 = vmatpush.bf16.msra.mxu2 %v5423_v52  ;;  %v6694_v34 = vld [vmem:[%s8791_s3 + $0x284] sm:$0xf0]  ;;  %v6724_v41 = vld [vmem:[%s8791_s3 + $0x374] sm:$0xf0]  ;;  %v6627_v43 = vld [vmem:[%s8791_s3 + $0x74] sm:$0xf] }
 0x23f   : > { %2236 = vmatpush.bf16.msra.mxu1 %v5311_v56  ;;  %v6666_v40 = vld [vmem:[%s8791_s3 + $0x1a4] sm:$0xf0]  ;;  %v6659_v46 = vld [vmem:[%s8791_s3 + $0x174] sm:$0xf]  ;;  %v5391_v51 = vor.u32 %v6694_v34, %v5390_v31  ;;  %v5478_v30 = vld [vmem:[%s8791_s3 + $0x330] sm:$0xf] }
 0x240   : > { %v5279_v49 = vor.u32 %v6666_v40, %v5278_v37  ;;  %v6716_v31 = vld [vmem:[%s8791_s3 + $0x334] sm:$0xf0]  ;;  %v6651_v34 = vld [vmem:[%s8791_s3 + $0x134] sm:$0xf] }
 0x241   : > { %v1333_v57 = vpop.permute.xlu1 %1332 }
 0x242   : > { %v1334_v59 = vrot.slane %v1333_v57, 7 }
 0x244   : > { %v1335_v60 = vsel %vm593_vm5, %v1334_v59, %v1333_v57  ;;  %v1416_v61 = vld [vmem:[#allocation2 + $0x7] ss:$8 sm:$0x7]  ;;  %v5414_v59 = vld [vmem:[%s8791_s3 + $0x2b0] sm:$0xf] }
 0x245   : > { %1338 = vst.msk [vmem:[#allocation2 + $0x6] ss:$8 sm:$0x7] %vm7726_vm14, %v1335_v60  ;;  %1418 = vrot.lane.b32.xlu0 %v1416_v61, %s7376_s20  ;;  %v6700_v60 = vld [vmem:[%s8791_s3 + $0x2b4] sm:$0xf0]  ;;  %s7297_s20 = scalar_lea.hbm %s7296_s21, 1 }
 0x246   : > { %v5302_v61 = vld [vmem:[%s8791_s3 + $0x1d0] sm:$0xf]  ;;  %v5415_v4 = vor.u32 %v6700_v60, %v5414_v59  ;;  %v6625_v59 = vld [vmem:[%s8791_s3 + $0x64] sm:$0xf]  ;;  %v5120_v60 = vld [vmem:[%s8791_s3 + $0x68] sm:$0xf0]  ;;  %p7298_p0 = scmp.ne.s32.totalorder %s7296_s21, %s7297_s20  ;;  %p7303_p4 = scmp.lt.s32.totalorder %s7301_s15, %s7297_s20 }
 0x248   : > { %2265 = vmatpush.bf16.msra.mxu2 %v5415_v4  ;;  %v6720_v4 = vld [vmem:[%s8791_s3 + $0x354] sm:$0xf0]  ;;  %p7299_p1 = pnand %p7298_p0, %p7490_p5  ;;  %p7304_p7 = por %p7303_p4, %p7302_p3 }
 0x24a   : > { %p7300_p2 = pneg %p7299_p1 }
 0x24c   : > { %v1410_v39 = vld [vmem:[#allocation2 + $0x6] ss:$8 sm:$0x7]  ;;  %2266 = vmatpush.bf16.msra.mxu2 %v5407_v15  ;;  %v6718_v15 = vld [vmem:[%s8791_s3 + $0x344] sm:$0xf0]  ;;  %p7305_p8 = pnand %p7304_p7, %p7300_p2 }
 0x24d   : > { %v1413_v62 = vld [vmem:[#allocation2 + $0x6] ss:$8 sm:$0x7]  ;;  %1412 = vst.msk [vmem:[#allocation6 + $0x16] ss:$4 sm:$0x7] %vm7717_vm12, %v1410_v39 }
 0x24e   : > { %1415 = vst.msk [vmem:[#allocation6 + $0x3] ss:$4 sm:$0x7] %vm7717_vm12, %v1413_v62  ;;  %v6672_v39 = vld [vmem:[%s8791_s3 + $0x1d4] sm:$0xf0]  ;;  %v5223_v62 = vor.u32 %v6652_v53, %v5222_v50  ;;  %v5511_v53 = vor.u32 %v6724_v41, %v5510_v36 }
 0x24f   : > { %v5224_v36 = vld [vmem:[%s8791_s3 + $0x138] sm:$0xf0]  ;;  %v5534_v41 = vld [vmem:[%s8791_s3 + $0x3a0] sm:$0xf] }
 0x250   : > { %2226 = vmatpush.bf16.msra.mxu0 %v5223_v62  ;;  %2267 = vmatpush.bf16.msra.mxu2 %v5399_v33  ;;  %v5248_v62 = vld [vmem:[%s8791_s3 + $0x168] sm:$0xf0]  ;;  %v5096_v33 = vld [vmem:[%s8791_s3 + $0x38] sm:$0xf0]  ;;  %v5227_v40 = vor.u32 %v6651_v34, %v5224_v36 }
 0x254   : > { %v1431_v63 = vld [vmem:[#allocation6 + $0x18] sm:$0xff]  ;;  %2268 = vmatpush.bf16.msra.mxu2 %v5391_v51  ;;  %v5216_v51 = vld [vmem:[%s8791_s3 + $0x128] sm:$0xf0] }
 0x255   : > { %v1428_v0 = vld [vmem:[#allocation6] sm:$0xff]  ;;  %1442 = vst [vmem:[#allocation1 + $0x30] ss:$2 sm:$0xff] %v1431_v63 }
 0x256   : > { %1436 = vst [vmem:[#allocation1] ss:$2 sm:$0xff] %v1428_v0  ;;  %v5214_v63 = vld [vmem:[%s8791_s3 + $0x120] sm:$0xf]  ;;  %v6650_v0 = vld [vmem:[%s8791_s3 + $0x124] sm:$0xf0] }
 0x257   : > { %v5215_v10 = vor.u32 %v6650_v0, %v5214_v63  ;;  %v5123_v0 = vor.u32 %v6625_v59, %v5120_v60  ;;  %v6712_v59 = vld [vmem:[%s8791_s3 + $0x314] sm:$0xf0]  ;;  %v6615_v60 = vld [vmem:[%s8791_s3 + $0x14] sm:$0xf] }
 0x259   : > { %2227 = vmatpush.bf16.msra.mxu0 %v5215_v10  ;;  %v5243_v10 = vor.u32 %v6655_v7, %v5240_v8  ;;  %v6613_v7 = vld [vmem:[%s8791_s3 + $0x4] sm:$0xf] }
 0x25d   : > { %v1443_v1 = vld.sshfl [vmem:[#allocation1] sm:$0xff pattern:$0x75316420]  ;;  %v1444_v2 = vld.sshfl [vmem:[#allocation1 + $0x8] sm:$0xff pattern:$0x75316420]  ;;  %2228 = vmatpush.bf16.msra.mxu0 %v5207_v28 }
 0x25e   : > { %v7868_v3 = vpack.c.bf16 %v1443_v1, %v1443_v1  ;;  %v7870_v42 = vpack.c.bf16 %v1444_v2, %v1444_v2  ;;  %v5303_v1 = vor.u32 %v6672_v39, %v5302_v61  ;;  %v5351_v2 = vor.u32 %v6684_v55, %v5350_v54  ;;  %v5502_v55 = vld [vmem:[%s8791_s3 + $0x360] sm:$0xf]  ;;  %v6657_v39 = vld [vmem:[%s8791_s3 + $0x164] sm:$0xf]  ;;  %v6732_v28 = vld [vmem:[%s8791_s3 + $0x3b4] sm:$0xf0] }
 0x25f   : > { %v5131_v54 = vor.u32 %v6627_v43, %v5128_v44  ;;  %v6730_v43 = vld [vmem:[%s8791_s3 + $0x3a4] sm:$0xf0] }
 0x260   : > { %2204 = vmatmul.bf16.vlgmr.msrb.gmra.mxu3 %v7868_v3  ;;  %2217 = vmatmul.bf16.vlgmr.msrb.gmra.mxu2 %v7870_v42  ;;  %v5535_v44 = vor.u32 %v6730_v43, %v5534_v41 }
 0x261   : > { %2237 = vmatpush.bf16.msra.mxu1 %v5303_v1  ;;  %2252 = vmatpush.bf16.msra.mxu3 %v5351_v2  ;;  %v5251_v1 = vor.u32 %v6657_v39, %v5248_v62  ;;  %v5494_v2 = vld [vmem:[%s8791_s3 + $0x350] sm:$0xf] }
 0x262   : > { %v5495_v5 = vor.u32 %v6720_v4, %v5494_v2  ;;  %v6726_v4 = vld [vmem:[%s8791_s3 + $0x384] sm:$0xf0] }
 0x265   : > { %2238 = vmatpush.bf16.msra.mxu1 %v5295_v12  ;;  %2253 = vmatpush.bf16.msra.mxu3 %v5343_v14  ;;  %v6664_v12 = vld [vmem:[%s8791_s3 + $0x194] sm:$0xf0]  ;;  %v5486_v14 = vld [vmem:[%s8791_s3 + $0x340] sm:$0xf] }
 0x266   : > { %v5487_v17 = vor.u32 %v6718_v15, %v5486_v14 }
 0x269   : > { %2239 = vmatpush.bf16.msra.mxu1 %v5287_v32  ;;  %2254 = vmatpush.bf16.msra.mxu3 %v5335_v35  ;;  %v6619_v32 = vld [vmem:[%s8791_s3 + $0x34] sm:$0xf]  ;;  %v5479_v35 = vor.u32 %v6716_v31, %v5478_v30  ;;  %v5184_v30 = vld [vmem:[%s8791_s3 + $0xe8] sm:$0xf0] }
 0x26a   : > { %v5099_v37 = vor.u32 %v6619_v32, %v5096_v33 }
 0x26d   : > { %2240 = vmatpush.bf16.msra.mxu1 %v5279_v49  ;;  %2255 = vmatpush.bf16.msra.mxu3 %v5327_v27  ;;  %v6649_v27 = vld [vmem:[%s8791_s3 + $0x124] sm:$0xf] }
 0x271   : > { %2300 = vmatpush.bf16.msrb.mxu3 %v5131_v54  ;;  %v5526_v54 = vld [vmem:[%s8791_s3 + $0x390] sm:$0xf] }
 0x275   : > { %2301 = vmatpush.bf16.msrb.mxu3 %v5123_v0  ;;  %v5208_v0 = vld [vmem:[%s8791_s3 + $0x118] sm:$0xf0] }
 0x279   : > { %2302 = vmatpush.bf16.msrb.mxu3 %v5115_v9  ;;  %v5072_v9 = vld [vmem:[%s8791_s3 + $0x8] sm:$0xf0] }
 0x27b   : > { %v1389_v45 = vpop.permute.xlu1 %1388 }
 0x27c   : > { %v1390_v48 = vrot.slane %v1389_v45, 7 }
 0x27d   : > { %2303 = vmatpush.bf16.msrb.mxu3 %v5107_v21  ;;  %v6675_v21 = vld [vmem:[%s8791_s3 + $0x1f4] sm:$0xf] }
 0x27e   : > { %v1391_v57 = vsel %vm581_vm11, %v1390_v48, %v1389_v45  ;;  %v5199_v45 = vor.u32 %v6646_v23, %v5198_v22  ;;  %v5256_v48 = vld [vmem:[%s8791_s3 + $0x178] sm:$0xf0]  ;;  %v5262_v23 = vld [vmem:[%s8791_s3 + $0x180] sm:$0xf]  ;;  %v5323_v36 = vor.u32 %v6675_v21, %v5320_v47  ;;  %v6715_v47 = vld [vmem:[%s8791_s3 + $0x334] sm:$0xf] }
 0x27f   : > { %1394 = vst.msk [vmem:[#allocation6 + $0x9] ss:$4 sm:$0x7] %vm7969_vm2, %v1391_v57  ;;  %v5259_v56 = vor.u32 %v6659_v46, %v5256_v48  ;;  %v6722_v57 = vld [vmem:[%s8791_s3 + $0x364] sm:$0xf0]  ;;  %v5263_v25 = vor.u32 %v6662_v24, %v5262_v23 }
 0x280   : > { %2229 = vmatpush.bf16.msra.mxu0 %v5199_v45  ;;  %v5503_v63 = vor.u32 %v6722_v57, %v5502_v55  ;;  %v5470_v45 = vld [vmem:[%s8791_s3 + $0x320] sm:$0xf]  ;;  %v6714_v46 = vld [vmem:[%s8791_s3 + $0x324] sm:$0xf0]  ;;  %v6617_v48 = vld [vmem:[%s8791_s3 + $0x24] sm:$0xf] }
 0x281   : > { %2326 = vmatpush.bf16.msrb.mxu2 %v5259_v56  ;;  %2304 = vmatpush.bf16.msrb.mxu3 %v5099_v37  ;;  %v5471_v49 = vor.u32 %v6714_v46, %v5470_v45  ;;  %v6728_v55 = vld [vmem:[%s8791_s3 + $0x394] sm:$0xf0]  ;;  %v5462_v56 = vld [vmem:[%s8791_s3 + $0x310] sm:$0xf]  ;;  %v5384_v23 = vld [vmem:[%s8791_s3 + $0x278] sm:$0xf0] }
 0x282   : > { %v5527_v57 = vor.u32 %v6728_v55, %v5526_v54  ;;  %v5463_v39 = vor.u32 %v6712_v59, %v5462_v56  ;;  %v6723_v24 = vld [vmem:[%s8791_s3 + $0x374] sm:$0xf]  ;;  %v5312_v45 = vld [vmem:[%s8791_s3 + $0x1e8] sm:$0xf0]  ;;  %v6689_v46 = vld [vmem:[%s8791_s3 + $0x264] sm:$0xf] }
 0x283   : > { %v6671_v56 = vld [vmem:[%s8791_s3 + $0x1d4] sm:$0xf]  ;;  %v5352_v21 = vld [vmem:[%s8791_s3 + $0x238] sm:$0xf0] }
 0x284   : > { %2274 = vmatpush.bf16.msrb.mxu0 %v5511_v53  ;;  %v5219_v53 = vor.u32 %v6649_v27, %v5216_v51  ;;  %v6687_v59 = vld [vmem:[%s8791_s3 + $0x254] sm:$0xf] }
 0x285   : > { %v1371_v13 = vpop.permute.xlu0 %1370  ;;  %2327 = vmatpush.bf16.msrb.mxu2 %v5251_v1  ;;  %v5518_v1 = vld [vmem:[%s8791_s3 + $0x380] sm:$0xf] }
 0x286   : > { %v1372_v19 = vrot.slane %v1371_v13, 7  ;;  %v5519_v38 = vor.u32 %v6726_v4, %v5518_v1  ;;  %v5168_v1 = vld [vmem:[%s8791_s3 + $0xc8] sm:$0xf0] }
 0x288   : > { %v1373_v26 = vsel %vm581_vm11, %v1372_v19, %v1371_v13  ;;  %2275 = vmatpush.bf16.msrb.mxu0 %v5503_v63  ;;  %v5271_v13 = vor.u32 %v6664_v12, %v5270_v11  ;;  %v6653_v19 = vld [vmem:[%s8791_s3 + $0x144] sm:$0xf]  ;;  %v6647_v63 = vld [vmem:[%s8791_s3 + $0x114] sm:$0xf]  ;;  %v5200_v12 = vld [vmem:[%s8791_s3 + $0x108] sm:$0xf0] }
 0x289   : > { %1379 = vst.msk [vmem:[#allocation6 + $0x8] ss:$4 sm:$0x7] %vm7969_vm2, %v1373_v26  ;;  %2328 = vmatpush.bf16.msrb.mxu2 %v5243_v10  ;;  %v5235_v22 = vor.u32 %v6653_v19, %v5232_v20  ;;  %v5542_v26 = vld [vmem:[%s8791_s3 + $0x3b0] sm:$0xf]  ;;  %v5211_v2 = vor.u32 %v6647_v63, %v5208_v0  ;;  %v5075_v10 = vor.u32 %v6613_v7, %v5072_v9 }
 0x28a   : > { %2241 = vmatpush.bf16.msra.mxu1 %v5271_v13  ;;  %v5543_v29 = vor.u32 %v6732_v28, %v5542_v26  ;;  %v6645_v11 = vld [vmem:[%s8791_s3 + $0x104] sm:$0xf]  ;;  %v6643_v19 = vld [vmem:[%s8791_s3 + $0xf4] sm:$0xf]  ;;  %v5192_v20 = vld [vmem:[%s8791_s3 + $0xf8] sm:$0xf0] }
 0x28b   : > { %v5203_v13 = vor.u32 %v6645_v11, %v5200_v12  ;;  %v5195_v34 = vor.u32 %v6643_v19, %v5192_v20  ;;  %v6637_v0 = vld [vmem:[%s8791_s3 + $0xc4] sm:$0xf]  ;;  %v5360_v7 = vld [vmem:[%s8791_s3 + $0x248] sm:$0xf0]  ;;  %v5288_v19 = vld [vmem:[%s8791_s3 + $0x1b8] sm:$0xf0] }
 0x28c   : > { %2276 = vmatpush.bf16.msrb.mxu0 %v5495_v5  ;;  %v5454_v5 = vld [vmem:[%s8791_s3 + $0x300] sm:$0xf]  ;;  %v5488_v9 = vld [vmem:[%s8791_s3 + $0x348] sm:$0xf0]  ;;  %v5171_v12 = vor.u32 %v6637_v0, %v5168_v1  ;;  %v6683_v20 = vld [vmem:[%s8791_s3 + $0x234] sm:$0xf] }
 0x28d   : > { %v1404_v50 = vpop.permute.xlu2 %1403  ;;  %2329 = vmatpush.bf16.msrb.mxu2 %v5235_v22  ;;  %v5455_v8 = vor.u32 %v6710_v6, %v5454_v5  ;;  %v6691_v22 = vld [vmem:[%s8791_s3 + $0x274] sm:$0xf]  ;;  %v5296_v5 = vld [vmem:[%s8791_s3 + $0x1c8] sm:$0xf0]  ;;  %v6685_v6 = vld [vmem:[%s8791_s3 + $0x244] sm:$0xf] }
 0x28e   : > { %v1405_v52 = vrot.slane %v1404_v50, 7  ;;  %2242 = vmatpush.bf16.msra.mxu1 %v5263_v25  ;;  %v5512_v25 = vld [vmem:[%s8791_s3 + $0x378] sm:$0xf0]  ;;  %v5387_v41 = vor.u32 %v6691_v22, %v5384_v23  ;;  %v6661_v0 = vld [vmem:[%s8791_s3 + $0x184] sm:$0xf] }
 0x28f   : > { %v5515_v43 = vor.u32 %v6723_v24, %v5512_v25  ;;  %v1450_v11 = vld.sshfl [vmem:[#allocation1 + $0x38] sm:$0xff pattern:$0x75316420] }
 0x290   : > { %v1406_v61 = vsel %vm581_vm11, %v1405_v52, %v1404_v50  ;;  %2277 = vmatpush.bf16.msrb.mxu0 %v5487_v17  ;;  %v5088_v50 = vld [vmem:[%s8791_s3 + $0x28] sm:$0xf0]  ;;  %v5480_v22 = vld [vmem:[%s8791_s3 + $0x338] sm:$0xf0]  ;;  %v8398_v24 = vpack.c.bf16 %v1450_v11, %v1450_v11  ;;  %v6731_v11 = vld [vmem:[%s8791_s3 + $0x3b4] sm:$0xf] }
 0x291   : > { %1409 = vst.msk [vmem:[#allocation6 + $0xa] ss:$4 sm:$0x7] %vm7969_vm2, %v1406_v61  ;;  %2330 = vmatpush.bf16.msrb.mxu2 %v5227_v40  ;;  %v5091_v52 = vor.u32 %v6617_v48, %v5088_v50  ;;  %v5080_v61 = vld [vmem:[%s8791_s3 + $0x18] sm:$0xf0] }
 0x292   : > { %2291 = vmatpush.bf16.msrb.mxu1 %v5543_v29  ;;  %v5083_v62 = vor.u32 %v6615_v60, %v5080_v61  ;;  %v6641_v29 = vld [vmem:[%s8791_s3 + $0xe4] sm:$0xf]  ;;  %v5376_v48 = vld [vmem:[%s8791_s3 + $0x268] sm:$0xf0]  ;;  %v5368_v60 = vld [vmem:[%s8791_s3 + $0x258] sm:$0xf0] }
 0x293   : > { %2305 = vmatpush.bf16.msrb.mxu3 %v5091_v52  ;;  %v5504_v50 = vld [vmem:[%s8791_s3 + $0x368] sm:$0xf0]  ;;  %v5187_v27 = vor.u32 %v6641_v29, %v5184_v30  ;;  %v6639_v52 = vld [vmem:[%s8791_s3 + $0xd4] sm:$0xf]  ;;  %v5379_v54 = vor.u32 %v6689_v46, %v5376_v48  ;;  %v6665_v30 = vld [vmem:[%s8791_s3 + $0x1a4] sm:$0xf] }
 0x294   : > { %2278 = vmatpush.bf16.msrb.mxu0 %v5479_v35  ;;  %v6719_v61 = vld [vmem:[%s8791_s3 + $0x354] sm:$0xf]  ;;  %v5152_v29 = vld [vmem:[%s8791_s3 + $0xa8] sm:$0xf0] }
 0x295   : > { %2331 = vmatpush.bf16.msrb.mxu2 %v5219_v53  ;;  %v5176_v53 = vld [vmem:[%s8791_s3 + $0xd8] sm:$0xf0] }
 0x296   : > { %2292 = vmatpush.bf16.msrb.mxu1 %v5535_v44  ;;  %v6673_v44 = vld [vmem:[%s8791_s3 + $0x1e4] sm:$0xf] }
 0x297   : > { %2306 = vmatpush.bf16.msrb.mxu3 %v5083_v62  ;;  %v5315_v51 = vor.u32 %v6673_v44, %v5312_v45  ;;  %v5179_v62 = vor.u32 %v6639_v52, %v5176_v53  ;;  %v6713_v44 = vld [vmem:[%s8791_s3 + $0x324] sm:$0xf]  ;;  %v5472_v45 = vld [vmem:[%s8791_s3 + $0x328] sm:$0xf0]  ;;  %v5272_v52 = vld [vmem:[%s8791_s3 + $0x198] sm:$0xf0] }
 0x298   : > { %2279 = vmatpush.bf16.msrb.mxu0 %v5471_v49  ;;  %v6721_v49 = vld [vmem:[%s8791_s3 + $0x364] sm:$0xf]  ;;  %v6679_v53 = vld [vmem:[%s8791_s3 + $0x214] sm:$0xf] }
 0x299   : > { %2332 = vmatpush.bf16.msrb.mxu2 %v5211_v2  ;;  %v5507_v55 = vor.u32 %v6721_v49, %v5504_v50  ;;  %v5371_v2 = vor.u32 %v6687_v59, %v5368_v60  ;;  %v6631_v50 = vld [vmem:[%s8791_s3 + $0x94] sm:$0xf] }
 0x29a   : > { %2293 = vmatpush.bf16.msrb.mxu1 %v5527_v57  ;;  %v5304_v57 = vld [vmem:[%s8791_s3 + $0x1d8] sm:$0xf0] }
 0x29b   : > { %2307 = vmatpush.bf16.msrb.mxu3 %v5075_v10  ;;  %v5307_v63 = vor.u32 %v6671_v56, %v5304_v57  ;;  %v1449_v10 = vld.sshfl [vmem:[#allocation1 + $0x30] sm:$0xff pattern:$0x75316420]  ;;  %v5464_v56 = vld [vmem:[%s8791_s3 + $0x318] sm:$0xf0] }
 0x29c   : > { %2280 = vmatpush.bf16.msrb.mxu0 %v5463_v39  ;;  %v5496_v39 = vld [vmem:[%s8791_s3 + $0x358] sm:$0xf0]  ;;  %v8396_v23 = vpack.c.bf16 %v1449_v10, %v1449_v10  ;;  %v5456_v10 = vld [vmem:[%s8791_s3 + $0x308] sm:$0xf0] }
 0x29d   : > { %2333 = vmatpush.bf16.msrb.mxu2 %v5203_v13  ;;  %v5499_v4 = vor.u32 %v6719_v61, %v5496_v39 }
 0x29e   : > { %2294 = vmatpush.bf16.msrb.mxu1 %v5519_v38  ;;  %v6669_v38 = vld [vmem:[%s8791_s3 + $0x1c4] sm:$0xf] }
 0x29f   : > { %v5299_v13 = vor.u32 %v6669_v38, %v5296_v5  ;;  %v6677_v38 = vld [vmem:[%s8791_s3 + $0x204] sm:$0xf]  ;;  %v5328_v5 = vld [vmem:[%s8791_s3 + $0x208] sm:$0xf0] }
 0x2a0   : > { %2281 = vmatpush.bf16.msrb.mxu0 %v5455_v8  ;;  %v6717_v8 = vld [vmem:[%s8791_s3 + $0x344] sm:$0xf] }
 0x2b7   : > { %v1419_v14 = vpop.permute.xlu0 %1418 }
 0x2b8   : > { %v1420_v15 = vrot.slane %v1419_v14, 7 }
 0x2ba   : > { %v1421_v16 = vsel %vm581_vm11, %v1420_v15, %v1419_v14  ;;  %v6635_v14 = vld [vmem:[%s8791_s3 + $0xb4] sm:$0xf]  ;;  %v5160_v15 = vld [vmem:[%s8791_s3 + $0xb8] sm:$0xf0] }
 0x2bb   : > { %1424 = vst.msk [vmem:[#allocation6 + $0xb] ss:$4 sm:$0x7] %vm7969_vm2, %v1421_v16  ;;  %v5363_v16 = vor.u32 %v6685_v6, %v5360_v7  ;;  %v5163_v25 = vor.u32 %v6635_v14, %v5160_v15  ;;  %v6707_v7 = vld [vmem:[%s8791_s3 + $0x2f4] sm:$0xf]  ;;  %v5331_v15 = vor.u32 %v6677_v38, %v5328_v5 }
 0x2bc   : > { %v6847_v38 = vld [vmem:[#allocation12 + $0x8c] sm:$0xf0] }
 0x2c2   : > { %v1429_v17 = vld [vmem:[#allocation6 + $0x8] sm:$0xff]  ;;  %v1430_v18 = vld [vmem:[#allocation6 + $0x10] sm:$0xff] }
 0x2c3   : > { %1438 = vst [vmem:[#allocation1 + $0x10] ss:$2 sm:$0xff] %v1429_v17  ;;  %v5491_v17 = vor.u32 %v6717_v8, %v5488_v9  ;;  %v5448_v8 = vld [vmem:[%s8791_s3 + $0x2f8] sm:$0xf0]  ;;  %v6709_v9 = vld [vmem:[%s8791_s3 + $0x304] sm:$0xf] }
 0x2c4   : > { %1440 = vst [vmem:[#allocation1 + $0x20] ss:$2 sm:$0xff] %v1430_v18  ;;  %v6667_v18 = vld [vmem:[%s8791_s3 + $0x1b4] sm:$0xf] }
 0x2ca   : > { %v1445_v26 = vld.sshfl [vmem:[#allocation1 + $0x10] sm:$0xff pattern:$0x75316420]  ;;  %v1446_v28 = vld.sshfl [vmem:[#allocation1 + $0x18] sm:$0xff pattern:$0x75316420] }
 0x2cb   : > { %v8294_v31 = vpack.c.bf16 %v1445_v26, %v1445_v26  ;;  %v8296_v32 = vpack.c.bf16 %v1446_v28, %v1446_v28  ;;  %v1447_v35 = vld.sshfl [vmem:[#allocation1 + $0x20] sm:$0xff pattern:$0x75316420]  ;;  %v1448_v33 = vld.sshfl [vmem:[#allocation1 + $0x28] sm:$0xff pattern:$0x75316420]  ;;  %v5291_v26 = vor.u32 %v6667_v18, %v5288_v19 }
 0x2cc   : > { %v8298_v37 = vpack.c.bf16 %v1447_v35, %v1447_v35  ;;  %v8300_v40 = vpack.c.bf16 %v1448_v33, %v1448_v33  ;;  %v6633_v28 = vld [vmem:[%s8791_s3 + $0xa4] sm:$0xf]  ;;  %v5355_v35 = vor.u32 %v6683_v20, %v5352_v21  ;;  %v5483_v33 = vor.u32 %v6715_v47, %v5480_v22  ;;  %v5440_v19 = vld [vmem:[%s8791_s3 + $0x2e8] sm:$0xf0] }
 0x2cd   : > { %2230 = vmatmul.bf16.vlgmr.msra.gmra.mxu0 %v8294_v31  ;;  %2243 = vmatmul.bf16.vlgmr.msra.gmra.mxu1 %v8296_v32  ;;  %v5155_v46 = vor.u32 %v6633_v28, %v5152_v29  ;;  %v6705_v18 = vld [vmem:[%s8791_s3 + $0x2e4] sm:$0xf]  ;;  %v6703_v28 = vld [vmem:[%s8791_s3 + $0x2d4] sm:$0xf]  ;;  %v5432_v29 = vld [vmem:[%s8791_s3 + $0x2d8] sm:$0xf0] }
 0x2ce   : > { %2256 = vmatmul.bf16.vlgmr.msra.gmra.mxu3 %v8298_v37  ;;  %2269 = vmatmul.bf16.vlgmr.msra.gmra.mxu2 %v8300_v40  ;;  %v6729_v22 = vld [vmem:[%s8791_s3 + $0x3a4] sm:$0xf] }
 0x2cf   : > { %2313 = vmatpush.bf16.msra.mxu1 %v5195_v34  ;;  %2339 = vmatpush.bf16.msra.mxu0 %v5323_v36  ;;  %v8412_v34 = vld [vmem:[%s8792_s4] sm:$0x3]  ;;  %v5280_v36 = vld [vmem:[%s8791_s3 + $0x1a8] sm:$0xf0] }
 0x2d0   : > { %2352 = vmatpush.bf16.msra.mxu3 %v5387_v41  ;;  %2378 = vmatpush.bf16.msra.mxu2 %v5515_v43  ;;  %v6681_v41 = vld [vmem:[%s8791_s3 + $0x224] sm:$0xf]  ;;  %v5344_v43 = vld [vmem:[%s8791_s3 + $0x228] sm:$0xf0]  ;;  %v1589_v48 = vperm.slane %v8412_v34, 0  ;;  %v5283_v49 = vor.u32 %v6665_v30, %v5280_v36 }
 0x2d1   : > { %v5528_v36 = vld [vmem:[%s8791_s3 + $0x398] sm:$0xf0] }
 0x2d3   : > { %2314 = vmatpush.bf16.msra.mxu1 %v5187_v27  ;;  %2340 = vmatpush.bf16.msra.mxu0 %v5315_v51  ;;  %v5144_v27 = vld [vmem:[%s8791_s3 + $0x98] sm:$0xf0]  ;;  %v5347_v51 = vor.u32 %v6681_v41, %v5344_v43  ;;  %v5435_v41 = vor.u32 %v6703_v28, %v5432_v29  ;;  %v6903_v28 = vld [vmem:[#allocation12 + $0x24c] sm:$0xf0]  ;;  %v6889_v29 = vld [vmem:[#allocation12 + $0x1e4] sm:$0xf] }
 0x2d4   : > { %2353 = vmatpush.bf16.msra.mxu3 %v5379_v54  ;;  %2379 = vmatpush.bf16.msra.mxu2 %v5507_v55  ;;  %v5336_v54 = vld [vmem:[%s8791_s3 + $0x218] sm:$0xf0]  ;;  %v6711_v55 = vld [vmem:[%s8791_s3 + $0x314] sm:$0xf]  ;;  %v5147_v61 = vor.u32 %v6631_v50, %v5144_v27  ;;  %v6697_v50 = vld [vmem:[%s8791_s3 + $0x2a4] sm:$0xf] }
 0x2d5   : > { %v5339_v1 = vor.u32 %v6679_v53, %v5336_v54  ;;  %v5408_v27 = vld [vmem:[%s8791_s3 + $0x2a8] sm:$0xf0]  ;;  %v6693_v53 = vld [vmem:[%s8791_s3 + $0x284] sm:$0xf] }
 0x2d6   : > { %v5392_v54 = vld [vmem:[%s8791_s3 + $0x288] sm:$0xf0] }
 0x2d7   : > { %2315 = vmatpush.bf16.msra.mxu1 %v5179_v62  ;;  %2341 = vmatpush.bf16.msra.mxu0 %v5307_v63  ;;  %v6629_v62 = vld [vmem:[%s8791_s3 + $0x84] sm:$0xf]  ;;  %v5136_v63 = vld [vmem:[%s8791_s3 + $0x88] sm:$0xf0] }
 0x2d8   : > { %2354 = vmatpush.bf16.msra.mxu3 %v5371_v2  ;;  %2380 = vmatpush.bf16.msra.mxu2 %v5499_v4  ;;  %v5467_v2 = vor.u32 %v6711_v55, %v5464_v56  ;;  %v5264_v4 = vld [vmem:[%s8791_s3 + $0x188] sm:$0xf0]  ;;  %v5395_v55 = vor.u32 %v6693_v53, %v5392_v54  ;;  %v6739_v56 = vld [vmem:[#allocation16 + $0x30] sm:$0xff] }
 0x2d9   : > { %v5267_v14 = vor.u32 %v6661_v0, %v5264_v4  ;;  %v5696_v0 = vld [vmem:[#allocation12 + $0xa0] sm:$0xf] }
 0x2da   : > { %v5680_v4 = vld [vmem:[#allocation12 + $0x80] sm:$0xf] }
 0x2db   : > { %2316 = vmatpush.bf16.msra.mxu1 %v5171_v12  ;;  %2342 = vmatpush.bf16.msra.mxu0 %v5299_v13  ;;  %v5544_v12 = vld [vmem:[%s8791_s3 + $0x3b8] sm:$0xf0]  ;;  %v5139_v13 = vor.u32 %v6629_v62, %v5136_v63  ;;  %v6737_v63 = vld [vmem:[#allocation16 + $0x20] sm:$0xff]  ;;  %v5681_v5 = vor.u32 %v6847_v38, %v5680_v4 }
 0x2dc   : > { %2355 = vmatpush.bf16.msra.mxu3 %v5363_v16  ;;  %2381 = vmatpush.bf16.msra.mxu2 %v5491_v17  ;;  %v5451_v16 = vor.u32 %v6707_v7, %v5448_v8  ;;  %v5459_v17 = vor.u32 %v6709_v9, %v5456_v10  ;;  %v5547_v20 = vor.u32 %v6731_v11, %v5544_v12  ;;  %v6735_v7 = vld [vmem:[#allocation16 + $0x10] sm:$0xff]  ;;  %v5664_v8 = vld [vmem:[#allocation12 + $0x60] sm:$0xf]  ;;  %v6734_v11 = vld [vmem:[#allocation16 + $0x8] sm:$0xff] }
 0x2dd   : > { %2282 = vmatmul.bf16.vlgmr.msrb.gmra.mxu0 %v8396_v23  ;;  %5548 = vmatmul.msk.bf16.vlgmr.msrb.gmra.mxu1 %vm581_vm11, %v8398_v24  ;;  %v6843_v9 = vld [vmem:[#allocation12 + $0x6c] sm:$0xf0]  ;;  %v5648_v12 = vld [vmem:[#allocation12 + $0x40] sm:$0xf] }
 0x2de   : > { %2308 = vmatmul.bf16.vlgmr.msrb.gmra.mxu3 %v7868_v3  ;;  %2334 = vmatmul.bf16.vlgmr.msrb.gmra.mxu2 %v8294_v31  ;;  %v5475_v3 = vor.u32 %v6713_v44, %v5472_v45  ;;  %v6663_v31 = vld [vmem:[%s8791_s3 + $0x194] sm:$0xf]  ;;  %v6725_v44 = vld [vmem:[%s8791_s3 + $0x384] sm:$0xf]  ;;  %v5665_v10 = vor.u32 %v6843_v9, %v5664_v8  ;;  %v6887_v8 = vld [vmem:[#allocation12 + $0x1cc] sm:$0xf0] }
 0x2df   : > { %2317 = vmatpush.bf16.msra.mxu1 %v5163_v25  ;;  %2343 = vmatpush.bf16.msra.mxu0 %v5291_v26  ;;  %v5275_v39 = vor.u32 %v6663_v31, %v5272_v52  ;;  %v5536_v25 = vld [vmem:[%s8791_s3 + $0x3a8] sm:$0xf0]  ;;  %v5443_v26 = vor.u32 %v6705_v18, %v5440_v19  ;;  %v6699_v45 = vld [vmem:[%s8791_s3 + $0x2b4] sm:$0xf]  ;;  %v5400_v31 = vld [vmem:[%s8791_s3 + $0x298] sm:$0xf0] }
 0x2e0   : > { %2356 = vmatpush.bf16.msra.mxu3 %v5355_v35  ;;  %2382 = vmatpush.bf16.msra.mxu2 %v5483_v33  ;;  %v5539_v30 = vor.u32 %v6729_v22, %v5536_v25  ;;  %v6740_v35 = vld [vmem:[#allocation16 + $0x38] sm:$0xff]  ;;  %v6727_v33 = vld [vmem:[%s8791_s3 + $0x394] sm:$0xf]  ;;  %v5920_v19 = vld [vmem:[#allocation12 + $0x260] sm:$0xf] }
 0x2e1   : > { %v5531_v43 = vor.u32 %v6727_v33, %v5528_v36  ;;  %v6831_v22 = vld [vmem:[#allocation12 + $0xc] sm:$0xf0]  ;;  %v5904_v25 = vld [vmem:[#allocation12 + $0x240] sm:$0xf] }
 0x2e3   : > { %v2205_v57 = vpop.f32.mrf.mxu3  ;;  %v2218_v59 = vpop.f32.mrf.mxu2  ;;  %2318 = vmatpush.bf16.msra.mxu1 %v5155_v46  ;;  %2344 = vmatpush.bf16.msra.mxu0 %v5283_v49  ;;  %v5416_v46 = vld [vmem:[%s8791_s3 + $0x2b8] sm:$0xf0] }
 0x2e4   : > { %v2206_v60 = vadd.f32 %v2205_v57, %v1589_v48  ;;  %2357 = vmatpush.bf16.msra.mxu3 %v5347_v51  ;;  %2383 = vmatpush.bf16.msra.mxu2 %v5475_v3  ;;  %v5419_v49 = vor.u32 %v6699_v45, %v5416_v46  ;;  %v5411_v51 = vor.u32 %v6697_v50, %v5408_v27  ;;  %v6695_v3 = vld [vmem:[%s8791_s3 + $0x294] sm:$0xf]  ;;  %v5728_v57 = vld [vmem:[#allocation12 + $0xe0] sm:$0xf]  ;;  %v6895_v50 = vld [vmem:[#allocation12 + $0x20c] sm:$0xf0] }
 0x2e5   : > { %v5403_v52 = vor.u32 %v6695_v3, %v5400_v31  ;;  %v5826_v3 = vld [vmem:[#allocation12 + $0x1b0] sm:$0xf0] }
 0x2e6   : > { %v8477_v6 = vadd.f32 %v2218_v59, %v2206_v60  ;;  %v6859_v59 = vld [vmem:[#allocation12 + $0xec] sm:$0xf0] }
 0x2e7   : > { %2319 = vmatpush.bf16.msra.mxu1 %v5147_v61  ;;  %2345 = vmatpush.bf16.msra.mxu0 %v5275_v39  ;;  %v5729_v60 = vor.u32 %v6859_v59, %v5728_v57  ;;  %v5712_v61 = vld [vmem:[#allocation12 + $0xc0] sm:$0xf]  ;;  %v6855_v39 = vld [vmem:[#allocation12 + $0xcc] sm:$0xf0]  ;;  %v6746_v57 = vld [vmem:[#allocation16 + $0x68] sm:$0xff] }
 0x2e8   : > { %2358 = vmatpush.bf16.msra.mxu3 %v5339_v1  ;;  %2384 = vmatpush.bf16.msra.mxu2 %v5467_v2  ;;  %v5713_v62 = vor.u32 %v6855_v39, %v5712_v61  ;;  %v6851_v1 = vld [vmem:[#allocation12 + $0xac] sm:$0xf0]  ;;  %v6877_v59 = vld [vmem:[#allocation12 + $0x184] sm:$0xf]  ;;  %v5856_v39 = vld [vmem:[#allocation12 + $0x1e0] sm:$0xf] }
 0x2e9   : > { %v5697_v2 = vor.u32 %v6851_v1, %v5696_v0  ;;  %v6745_v0 = vld [vmem:[#allocation16 + $0x60] sm:$0xff] }
 0x2ea   : > { %v6873_v1 = vld [vmem:[#allocation12 + $0x164] sm:$0xf] }
 0x2eb   : > { %v2207_v21 = vpop.f32.mrf.mxu3  ;;  %v2220_v47 = vpop.f32.mrf.mxu2  ;;  %2320 = vmatpush.bf16.msra.mxu1 %v5139_v13  ;;  %2346 = vmatpush.bf16.msra.mxu0 %v5267_v14  ;;  %v6839_v13 = vld [vmem:[#allocation12 + $0x4c] sm:$0xf0] }
 0x2ec   : > { %2359 = vmatpush.bf16.msra.mxu3 %v5331_v15  ;;  %2385 = vmatpush.bf16.msra.mxu2 %v5459_v17  ;;  %v5649_v14 = vor.u32 %v6839_v13, %v5648_v12  ;;  %v6733_v15 = vld [vmem:[#allocation16] sm:$0xff]  ;;  %v6835_v17 = vld [vmem:[#allocation12 + $0x2c] sm:$0xf0]  ;;  %v6744_v13 = vld [vmem:[#allocation16 + $0x58] sm:$0xff] }
 0x2ed   : > { %v5616_v47 = vld [vmem:[#allocation12] sm:$0xf] }
 0x2ee   : > { %2321 = vmatmul.bf16.vlgmr.msra.gmra.mxu1 %v7870_v42  ;;  %2347 = vmatmul.bf16.vlgmr.msra.gmra.mxu0 %v8296_v32  ;;  %v6701_v42 = vld [vmem:[%s8791_s3 + $0x2c4] sm:$0xf]  ;;  %v5424_v32 = vld [vmem:[%s8791_s3 + $0x2c8] sm:$0xf0] }
 0x2ef   : > { %2365 = vmatpush.bf16.msrb.mxu1 %v5451_v16  ;;  %2395 = vmatpush.bf16.msrb.mxu0 %v5547_v20  ;;  %v5632_v16 = vld [vmem:[#allocation12 + $0x20] sm:$0xf]  ;;  %v6907_v20 = vld [vmem:[#allocation12 + $0x26c] sm:$0xf0] }
 0x2f0   : > { %2360 = vmatmul.bf16.vlgmr.msra.gmra.mxu3 %v8298_v37  ;;  %2386 = vmatmul.bf16.vlgmr.msra.gmra.mxu2 %v8396_v23  ;;  %v5520_v37 = vld [vmem:[%s8791_s3 + $0x388] sm:$0xf0]  ;;  %v5427_v23 = vor.u32 %v6701_v42, %v5424_v32  ;;  %v5633_v18 = vor.u32 %v6835_v17, %v5632_v16  ;;  %v5921_v21 = vor.u32 %v6907_v20, %v5920_v19  ;;  %v5888_v32 = vld [vmem:[#allocation12 + $0x220] sm:$0xf]  ;;  %v6883_v19 = vld [vmem:[#allocation12 + $0x1ac] sm:$0xf0] }
 0x2f1   : > { %2554 = vmatpush.bf16.msrb.mxu3 %v6740_v35  ;;  %v5523_v48 = vor.u32 %v6725_v44, %v5520_v37  ;;  %v5905_v35 = vor.u32 %v6903_v28, %v5904_v25  ;;  %v6748_v42 = vld [vmem:[#allocation16 + $0x78] sm:$0xff]  ;;  %v6885_v37 = vld [vmem:[#allocation12 + $0x1c4] sm:$0xf]  ;;  %v5762_v25 = vld [vmem:[#allocation12 + $0x130] sm:$0xf0] }
 0x2f3   : > { %2366 = vmatpush.bf16.msrb.mxu1 %v5443_v26  ;;  %2396 = vmatpush.bf16.msrb.mxu0 %v5539_v30  ;;  %v5617_v26 = vor.u32 %v6831_v22, %v5616_v47  ;;  %v5858_v30 = vld [vmem:[#allocation12 + $0x1f0] sm:$0xf0]  ;;  %v6865_v22 = vld [vmem:[#allocation12 + $0x124] sm:$0xf] }
 0x2f4   : > { %v5861_v33 = vor.u32 %v6889_v29, %v5858_v30  ;;  %v5765_v30 = vor.u32 %v6865_v22, %v5762_v25 }
 0x2f5   : > { %2555 = vmatpush.bf16.msrb.mxu3 %v6739_v56 }
 0x2f7   : > { %2367 = vmatpush.bf16.msrb.mxu1 %v5435_v41  ;;  %2397 = vmatpush.bf16.msrb.mxu0 %v5531_v43  ;;  %v6899_v43 = vld [vmem:[#allocation12 + $0x22c] sm:$0xf0] }
 0x2f8   : > { %v5889_v44 = vor.u32 %v6899_v43, %v5888_v32  ;;  %v6742_v32 = vld [vmem:[#allocation16 + $0x48] sm:$0xff] }
 0x2fb   : > { %2368 = vmatpush.bf16.msrb.mxu1 %v5427_v23  ;;  %2398 = vmatpush.bf16.msrb.mxu0 %v5523_v48  ;;  %v5842_v23 = vld [vmem:[#allocation12 + $0x1d0] sm:$0xf0] }
 0x2fc   : > { %v5845_v45 = vor.u32 %v6885_v37, %v5842_v23  ;;  %v6747_v48 = vld [vmem:[#allocation16 + $0x70] sm:$0xff]  ;;  %v6861_v37 = vld [vmem:[#allocation12 + $0x104] sm:$0xf] }
 0x2fd   : > { %v5746_v23 = vld [vmem:[#allocation12 + $0x110] sm:$0xf0] }
 0x2fe   : > { %5549 = vmatmul.msk.bf16.vlgmr.msrb.gmra.mxu0 %vm581_vm11, %v8398_v24  ;;  %v6738_v24 = vld [vmem:[#allocation16 + $0x28] sm:$0xff] }
 0x2ff   : > { %2369 = vmatpush.bf16.msrb.mxu1 %v5419_v49  ;;  %2556 = vmatpush.bf16.msrb.mxu3 %v6738_v24  ;;  %v5872_v49 = vld [vmem:[#allocation12 + $0x200] sm:$0xf] }
 0x300   : > { %2567 = vmatpush.bf16.msra.mxu0 %v6748_v42  ;;  %v5873_v27 = vor.u32 %v6895_v50, %v5872_v49  ;;  %v6879_v42 = vld [vmem:[#allocation12 + $0x18c] sm:$0xf0] }
 0x303   : > { %2370 = vmatpush.bf16.msrb.mxu1 %v5411_v51  ;;  %2557 = vmatpush.bf16.msrb.mxu3 %v6737_v63  ;;  %v6881_v51 = vld [vmem:[#allocation12 + $0x1a4] sm:$0xf] }
 0x304   : > { %2568 = vmatpush.bf16.msra.mxu0 %v6747_v48  ;;  %v5829_v53 = vor.u32 %v6881_v51, %v5826_v3  ;;  %v6875_v48 = vld [vmem:[#allocation12 + $0x16c] sm:$0xf0]  ;;  %v6857_v51 = vld [vmem:[#allocation12 + $0xe4] sm:$0xf]  ;;  %v5730_v3 = vld [vmem:[#allocation12 + $0xf0] sm:$0xf0] }
 0x307   : > { %2371 = vmatpush.bf16.msrb.mxu1 %v5403_v52 }
 0x308   : > { %2569 = vmatpush.bf16.msra.mxu0 %v6746_v57  ;;  %v6860_v57 = vld [vmem:[#allocation12 + $0xf4] sm:$0xf0] }
 0x30b   : > { %2372 = vmatpush.bf16.msrb.mxu1 %v5395_v55 }
 0x30c   : > { %2570 = vmatpush.bf16.msra.mxu0 %v6745_v0 }
 0x30e   : > { %2373 = vmatmul.bf16.vlgmr.msrb.gmra.mxu1 %v8300_v40  ;;  %v6736_v40 = vld [vmem:[#allocation16 + $0x18] sm:$0xff] }
 0x30f   : > { %3173 = vmatpush.bf16.msra.mxu1 %v5729_v60  ;;  %2558 = vmatpush.bf16.msrb.mxu3 %v6736_v40  ;;  %v5810_v60 = vld [vmem:[#allocation12 + $0x190] sm:$0xf0] }
 0x310   : > { %v5813_v61 = vor.u32 %v6877_v59, %v5810_v60  ;;  %2571 = vmatpush.bf16.msra.mxu0 %v6744_v13  ;;  %v5776_v60 = vld [vmem:[#allocation12 + $0x140] sm:$0xf] }
 0x313   : > { %3174 = vmatpush.bf16.msra.mxu1 %v5713_v62  ;;  %2559 = vmatpush.bf16.msrb.mxu3 %v6735_v7  ;;  %v6891_v62 = vld [vmem:[#allocation12 + $0x1ec] sm:$0xf0]  ;;  %v5840_v7 = vld [vmem:[#allocation12 + $0x1c0] sm:$0xf] }
 0x314   : > { %v5857_v63 = vor.u32 %v6891_v62, %v5856_v39  ;;  %v6858_v39 = vld [vmem:[#allocation12 + $0xec] sm:$0xf]  ;;  %v5738_v62 = vld [vmem:[#allocation12 + $0xf8] sm:$0xf0] }
 0x316   : > { %3186 = vmatpush.bf16.msrb.mxu2 %v5857_v63 }
 0x317   : > { %3175 = vmatpush.bf16.msra.mxu1 %v5697_v2  ;;  %2560 = vmatpush.bf16.msrb.mxu3 %v6734_v11  ;;  %v5794_v2 = vld [vmem:[#allocation12 + $0x170] sm:$0xf0]  ;;  %v5841_v11 = vor.u32 %v6887_v8, %v5840_v7 }
 0x31a   : > { %3187 = vmatpush.bf16.msrb.mxu2 %v5841_v11  ;;  %v5760_v11 = vld [vmem:[#allocation12 + $0x120] sm:$0xf] }
 0x31b   : > { %3176 = vmatpush.bf16.msra.mxu1 %v5681_v5  ;;  %2561 = vmatpush.bf16.msrb.mxu3 %v6733_v15  ;;  %v5797_v5 = vor.u32 %v6873_v1, %v5794_v2  ;;  %v5778_v15 = vld [vmem:[#allocation12 + $0x150] sm:$0xf0] }
 0x31f   : > { %3177 = vmatpush.bf16.msra.mxu1 %v5665_v10  ;;  %3203 = vmatpush.bf16.msra.mxu3 %v5921_v21  ;;  %v6743_v21 = vld [vmem:[#allocation16 + $0x50] sm:$0xff] }
 0x320   : > { %2572 = vmatpush.bf16.msra.mxu0 %v6743_v21  ;;  %v6849_v21 = vld [vmem:[#allocation12 + $0xa4] sm:$0xf] }
 0x323   : > { %3178 = vmatpush.bf16.msra.mxu1 %v5649_v14  ;;  %3204 = vmatpush.bf16.msra.mxu3 %v5905_v35  ;;  %v6869_v14 = vld [vmem:[#allocation12 + $0x144] sm:$0xf] }
 0x324   : > { %v5781_v17 = vor.u32 %v6869_v14, %v5778_v15  ;;  %2573 = vmatpush.bf16.msra.mxu0 %v6742_v32  ;;  %v5720_v14 = vld [vmem:[#allocation12 + $0xc8] sm:$0xf]  ;;  %v6856_v15 = vld [vmem:[#allocation12 + $0xd4] sm:$0xf0]  ;;  %v6850_v32 = vld [vmem:[#allocation12 + $0xac] sm:$0xf] }
 0x327   : > { %3179 = vmatpush.bf16.msra.mxu1 %v5633_v18  ;;  %3205 = vmatpush.bf16.msra.mxu3 %v5889_v44  ;;  %v5824_v18 = vld [vmem:[#allocation12 + $0x1a0] sm:$0xf] }
 0x328   : > { %v5825_v20 = vor.u32 %v6883_v19, %v5824_v18 }
 0x32a   : > { %3188 = vmatpush.bf16.msrb.mxu2 %v5825_v20  ;;  %v5722_v20 = vld [vmem:[#allocation12 + $0xd8] sm:$0xf0] }
 0x32b   : > { %3180 = vmatpush.bf16.msra.mxu1 %v5617_v26  ;;  %3206 = vmatpush.bf16.msra.mxu3 %v5873_v27  ;;  %v6741_v27 = vld [vmem:[#allocation16 + $0x40] sm:$0xff] }
 0x32c   : > { %2574 = vmatpush.bf16.msra.mxu0 %v6741_v27 }
 0x32f   : > { %3225 = vmatpush.bf16.msrb.mxu1 %v5861_v33 }
 0x333   : > { %3226 = vmatpush.bf16.msrb.mxu1 %v5845_v45  ;;  %v5749_v45 = vor.u32 %v6861_v37, %v5746_v23 }
 0x337   : > { %3227 = vmatpush.bf16.msrb.mxu1 %v5829_v53 }
 0x33b   : > { %3228 = vmatpush.bf16.msrb.mxu1 %v5813_v61 }
 0x33f   : > { %3229 = vmatpush.bf16.msrb.mxu1 %v5797_v5 }
 0x343   : > { %3230 = vmatpush.bf16.msrb.mxu1 %v5781_v17  ;;  %v6854_v17 = vld [vmem:[#allocation12 + $0xcc] sm:$0xf] }
 0x347   : > { %3231 = vmatpush.bf16.msrb.mxu1 %v5765_v30  ;;  %v5704_v30 = vld [vmem:[#allocation12 + $0xa8] sm:$0xf] }
 0x34a   : > { %v2231_v36 = vpop.f32.mrf.mxu0  ;;  %v2244_v41 = vpop.f32.mrf.mxu1 }
 0x34b   : > { %v2232_v46 = vadd.f32 %v2231_v36, %v8477_v6  ;;  %v8565_v6 = vld [vmem:[#allocation4] sm:$0xff]  ;;  %3232 = vmatpush.bf16.msrb.mxu1 %v5749_v45 }
 0x34c   : > { %590 = vst.msk [vmem:[#allocation3 + $0x10] sm:$0x1f] %vm589_vm3, %v8565_v6  ;;  %v6905_v45 = vld [vmem:[#allocation12 + $0x264] sm:$0xf] }
 0x34d   : > { %v2245_v56 = vadd.f32 %v2244_v41, %v2232_v46  ;;  %v5808_v41 = vld [vmem:[#allocation12 + $0x180] sm:$0xf]  ;;  %598 = vst.msk [vmem:[#allocation4 + $0x28] sm:$0x1] %vm597_vm7, %v8565_v6 }
 0x34e   : > { %v5809_v44 = vor.u32 %v6879_v42, %v5808_v41  ;;  %v5792_v46 = vld [vmem:[#allocation12 + $0x160] sm:$0xf]  ;;  %v6852_v41 = vld [vmem:[#allocation12 + $0xb4] sm:$0xf0]  ;;  %v5725_v42 = vor.u32 %v6854_v17, %v5722_v20  ;;  %v5650_v17 = vld [vmem:[#allocation12 + $0x50] sm:$0xf0] }
 0x34f   : > { %v5793_v50 = vor.u32 %v6875_v48, %v5792_v46  ;;  %v5922_v46 = vld [vmem:[#allocation12 + $0x270] sm:$0xf0]  ;;  %v6845_v48 = vld [vmem:[#allocation12 + $0x84] sm:$0xf]  ;;  %v6280_v6 = vld [vmem:[#allocation15 + $0x20] sm:$0xf] }
 0x350   : > { %3189 = vmatpush.bf16.msrb.mxu2 %v5809_v44  ;;  %v5925_v27 = vor.u32 %v6905_v45, %v5922_v46  ;;  %v5640_v45 = vld [vmem:[#allocation12 + $0x28] sm:$0xf]  ;;  %v6836_v46 = vld [vmem:[#allocation12 + $0x34] sm:$0xf0] }
 0x351   : > { %v2257_v31 = vpop.f32.mrf.mxu3  ;;  %v2270_v52 = vpop.f32.mrf.mxu2 }
 0x352   : > { %v2233_v54 = vpop.f32.mrf.mxu0  ;;  %v2246_v55 = vpop.f32.mrf.mxu1  ;;  %v2258_v24 = vadd.f32 %v2257_v31, %v2245_v56 }
 0x353   : > { %v5733_v54 = vor.u32 %v6857_v51, %v5730_v3  ;;  %v2583_v5 = vld [vmem:[#allocation3 + $0x10] sm:$0x1f]  ;;  %v5682_v51 = vld [vmem:[#allocation12 + $0x90] sm:$0xf0]  ;;  %v1590_v3 = vperm.slane %v8412_v34, 1 }
 0x354   : > { %v2271_v4 = vadd.f32 %v2270_v52, %v2258_v24  ;;  %v5736_v52 = vld [vmem:[#allocation12 + $0xe8] sm:$0xf]  ;;  %v6871_v24 = vld [vmem:[#allocation12 + $0x14c] sm:$0xf0]  ;;  %3190 = vmatpush.bf16.msrb.mxu2 %v5793_v50  ;;  %v8583_v22 = vpack.c.bf16 %v2583_v5, %v2583_v5  ;;  %v6844_v5 = vld [vmem:[#allocation12 + $0x74] sm:$0xf0] }
 0x355   : > { %3212 = vmatpush.bf16.msrb.mxu0 %v5733_v54  ;;  %v5777_v63 = vor.u32 %v6871_v24, %v5776_v60  ;;  %v5737_v8 = vor.u32 %v6860_v57, %v5736_v52  ;;  %v5688_v52 = vld [vmem:[#allocation12 + $0x88] sm:$0xf]  ;;  %v5685_v54 = vor.u32 %v6845_v48, %v5682_v51  ;;  %v6901_v57 = vld [vmem:[#allocation12 + $0x244] sm:$0xf]  ;;  %v5906_v60 = vld [vmem:[#allocation12 + $0x250] sm:$0xf0] }
 0x356   : > { %v2764_v50 = vshll.u32 %v8583_v22, 16  ;;  %v5690_v24 = vld [vmem:[#allocation12 + $0x98] sm:$0xf0]  ;;  %v5618_v51 = vld [vmem:[#allocation12 + $0x10] sm:$0xf0] }
 0x358   : > { %3191 = vmatpush.bf16.msrb.mxu2 %v5777_v63  ;;  %v2762_v63 = vshrl.u32 %v8583_v22, 16  ;;  %v2766_v34 = vrot.slane %v2764_v50, 1 }
 0x359   : > { %v2259_v38 = vpop.f32.mrf.mxu3  ;;  %v2272_v40 = vpop.f32.mrf.mxu2 }
 0x35a   : > { %v2283_v9 = vpop.f32.mrf.mxu0  ;;  %v2296_v10 = vpop.f32.mrf.mxu1  ;;  %v5714_v38 = vld [vmem:[#allocation12 + $0xd0] sm:$0xf0] }
 0x35b   : > { %v2284_v12 = vadd.f32 %v2283_v9, %v2271_v4  ;;  %v6853_v4 = vld [vmem:[#allocation12 + $0xc4] sm:$0xf] }
 0x35c   : > { %v5717_v7 = vor.u32 %v6853_v4, %v5714_v38 }
 0x35d   : > { %v2297_v16 = vadd.f32 %v2296_v10, %v2284_v12  ;;  %v6867_v12 = vld [vmem:[#allocation12 + $0x12c] sm:$0xf0] }
 0x35e   : > { %3213 = vmatpush.bf16.msrb.mxu0 %v5717_v7  ;;  %v5761_v18 = vor.u32 %v6867_v12, %v5760_v11  ;;  %v6837_v11 = vld [vmem:[#allocation12 + $0x44] sm:$0xf] }
 0x35f   : > { %v2404_v47 = vmax.f32 %v2297_v16, 0.0  ;;  %v5741_v16 = vor.u32 %v6858_v39, %v5738_v62  ;;  %v6841_v39 = vld [vmem:[#allocation12 + $0x64] sm:$0xf]  ;;  %v5666_v62 = vld [vmem:[#allocation12 + $0x70] sm:$0xf0]  ;;  %v5653_v20 = vor.u32 %v6837_v11, %v5650_v17 }
 0x360   : > { %3192 = vmatpush.bf16.msrb.mxu2 %v5761_v18  ;;  %v8595_v18 = vor.u32 %v2766_v34, %v2762_v63  ;;  %v6874_v17 = vld [vmem:[#allocation12 + $0x16c] sm:$0xf] }
 0x361   : > { %2406 = vst [vmem:[#allocation3] sm:$0xf] %v2404_v47  ;;  %v2409_v26 = vsel %vm2408_vm4, %v2404_v47, 0.0  ;;  %v8569_v28 = vpop.f32.mrf.mxu3  ;;  %v8571_v29 = vpop.f32.mrf.mxu2  ;;  %v5698_v47 = vld [vmem:[#allocation12 + $0xb0] sm:$0xf0] }
 0x362   : > { %v2410_v35 = vrot.slane %v2409_v26, 4  ;;  %v2285_v33 = vpop.f32.mrf.mxu0  ;;  %v2298_v36 = vpop.f32.mrf.mxu1  ;;  %v5701_v25 = vor.u32 %v6849_v21, %v5698_v47  ;;  %v2310_v4 = vadd.f32 %v8569_v28, %v1590_v3  ;;  %v5656_v47 = vld [vmem:[#allocation12 + $0x48] sm:$0xf] }
 0x363   : > { %v6863_v33 = vld [vmem:[#allocation12 + $0x10c] sm:$0xf0] }
 0x364   : > { %v2411_v43 = vadd.f32 %v2410_v35, %v2409_v26  ;;  %v5721_v26 = vor.u32 %v6856_v15, %v5720_v14  ;;  %v5744_v35 = vld [vmem:[#allocation12 + $0x100] sm:$0xf]  ;;  %3214 = vmatpush.bf16.msrb.mxu0 %v5701_v25  ;;  %v6842_v14 = vld [vmem:[#allocation12 + $0x6c] sm:$0xf]  ;;  %v5674_v15 = vld [vmem:[#allocation12 + $0x78] sm:$0xf0] }
 0x365   : > { %v5745_v44 = vor.u32 %v6863_v33, %v5744_v35  ;;  %v6840_v25 = vld [vmem:[#allocation12 + $0x54] sm:$0xf0]  ;;  %v6893_v35 = vld [vmem:[#allocation12 + $0x204] sm:$0xf] }
 0x366   : > { %v2412_v49 = vrot.slane %v2411_v43, 2 }
 0x367   : > { %3193 = vmatpush.bf16.msrb.mxu2 %v5745_v44 }
 0x368   : > { %v2413_v31 = vadd.f32 %v2412_v49, %v2411_v43  ;;  %v2581_v53 = vld [vmem:[#allocation3] sm:$0x1f]  ;;  %v5706_v43 = vld [vmem:[#allocation12 + $0xb8] sm:$0xf0]  ;;  %3215 = vmatpush.bf16.msrb.mxu0 %v5685_v54  ;;  %v6832_v54 = vld [vmem:[#allocation12 + $0x14] sm:$0xf0] }
 0x369   : > { %v2311_v55 = vpop.f32.mrf.mxu3  ;;  %v2337_v56 = vpop.f32.mrf.mxu2  ;;  %v8573_v59 = vpack.c.bf16 %v2581_v53, %v2581_v53  ;;  %v6848_v53 = vld [vmem:[#allocation12 + $0x94] sm:$0xf0] }
 0x36a   : > { %v2414_v61 = vrot.slane %v2413_v31, 1  ;;  %v5709_v55 = vor.u32 %v6850_v32, %v5706_v43  ;;  %v6846_v56 = vld [vmem:[#allocation12 + $0x8c] sm:$0xf]  ;;  %v5689_v38 = vor.u32 %v6848_v53, %v5688_v52  ;;  %v6833_v32 = vld [vmem:[#allocation12 + $0x24] sm:$0xf]  ;;  %v5641_v52 = vor.u32 %v6836_v46, %v5640_v45 }
 0x36b   : > { %v8575_v0 = vpop.f32.mrf.mxu1  ;;  %v8577_v1 = vpop.f32.mrf.mxu0  ;;  %v2750_v2 = vshll.u32 %v8573_v59, 16  ;;  %v2748_v9 = vshrl.u32 %v8573_v59, 16  ;;  %3242 = vmatpush.bf16.msra.mxu2 %v5925_v27  ;;  %v5634_v43 = vld [vmem:[#allocation12 + $0x30] sm:$0xf0]  ;;  %v6829_v27 = vld [vmem:[#allocation12 + $0x4] sm:$0xf] }
 0x36c   : > { %v2415_v40 = vadd.f32 %v2414_v61, %v2413_v31  ;;  %v5705_v31 = vor.u32 %v6852_v41, %v5704_v30  ;;  %v5909_v61 = vor.u32 %v6901_v57, %v5906_v60  ;;  %v2323_v12 = vadd.f32 %v8575_v0, %v2310_v4  ;;  %v6838_v30 = vld [vmem:[#allocation12 + $0x4c] sm:$0xf]  ;;  %v5874_v0 = vld [vmem:[#allocation12 + $0x210] sm:$0xf0]  ;;  %v5658_v41 = vld [vmem:[#allocation12 + $0x58] sm:$0xf0] }
 0x36d   : > { %v2752_v10 = vrot.slane %v2750_v2, 1  ;;  %v5669_v2 = vor.u32 %v6841_v39, %v5666_v62  ;;  %v5637_v44 = vor.u32 %v6833_v32, %v5634_v43  ;;  %v5661_v48 = vor.u32 %v6838_v30, %v5658_v41  ;;  %v5624_v53 = vld [vmem:[#allocation12 + $0x8] sm:$0xf]  ;;  %v5866_v60 = vld [vmem:[#allocation12 + $0x1f8] sm:$0xf0] }
 0x36e   : > { %v2423_v13 = vpack.c.bf16 %v2415_v40, %v2415_v40  ;;  %v5672_v40 = vld [vmem:[#allocation12 + $0x68] sm:$0xf]  ;;  %v2336_v33 = vadd.f32 %v8571_v29, %v2323_v12  ;;  %v5642_v29 = vld [vmem:[#allocation12 + $0x38] sm:$0xf0]  ;;  %v5625_v62 = vor.u32 %v6832_v54, %v5624_v53  ;;  %v6886_v4 = vld [vmem:[#allocation12 + $0x1cc] sm:$0xf] }
 0x36f   : > { %v8581_v19 = vor.u32 %v2752_v10, %v2748_v9  ;;  %v6897_v9 = vld [vmem:[#allocation12 + $0x224] sm:$0xf]  ;;  %v5890_v10 = vld [vmem:[#allocation12 + $0x230] sm:$0xf0]  ;;  %3243 = vmatpush.bf16.msra.mxu2 %v5909_v61  ;;  %3216 = vmatpush.bf16.msrb.mxu0 %v5669_v2  ;;  %v5673_v21 = vor.u32 %v6844_v5, %v5672_v40  ;;  %v5626_v61 = vld [vmem:[#allocation12 + $0x18] sm:$0xf0] }
 0x370   : > { %2562 = vmatmul.bf16.vlgmr.msrb.gmra.mxu3 %v2423_v13  ;;  %v2349_v50 = vadd.f32 %v8577_v1, %v2336_v33  ;;  %v5786_v41 = vld [vmem:[#allocation12 + $0x158] sm:$0xf0]  ;;  %v6827_v43 = vld [vmem:[#allocation10 + $0x26c] sm:$0xf0]  ;;  %v6228_v54 = vld [vmem:[#allocation10 + $0x240] sm:$0xf] }
 0x371   : > { %3251 = vmatpush.bf16.msrb.mxu3 %v5737_v8  ;;  %3181 = vmatmul.bf16.vlgmr.msra.gmra.mxu1 %v8581_v19  ;;  %v5693_v8 = vor.u32 %v6846_v56, %v5690_v24  ;;  %v6830_v24 = vld [vmem:[#allocation12 + $0xc] sm:$0xf]  ;;  %v5770_v53 = vld [vmem:[#allocation12 + $0x138] sm:$0xf0] }
 0x372   : > { %3290 = vmatpush.bf16.msra.mxu1 %v5741_v16  ;;  %v5893_v16 = vor.u32 %v6897_v9, %v5890_v10  ;;  %v5629_v34 = vor.u32 %v6830_v24, %v5626_v61  ;;  %v5832_v61 = vld [vmem:[#allocation12 + $0x1a8] sm:$0xf] }
 0x373   : > { %v8586_v36 = vpop.f32.mrf.mxu3  ;;  %v8588_v37 = vpop.f32.mrf.mxu2  ;;  %3217 = vmatpush.bf16.msrb.mxu0 %v5653_v20 }
 0x374   : > { %v2324_v23 = vpop.f32.mrf.mxu1  ;;  %v2350_v49 = vpop.f32.mrf.mxu0  ;;  %3244 = vmatpush.bf16.msra.mxu2 %v5893_v16  ;;  %v2362_v57 = vadd.f32 %v8586_v36, %v2349_v50 }
 0x375   : > { %3252 = vmatpush.bf16.msrb.mxu3 %v5721_v26  ;;  %v5677_v26 = vor.u32 %v6842_v14, %v5674_v15  ;;  %v5657_v23 = vor.u32 %v6840_v25, %v5656_v47  ;;  %v6834_v49 = vld [vmem:[#allocation12 + $0x2c] sm:$0xf]  ;;  %v5864_v25 = vld [vmem:[#allocation12 + $0x1e8] sm:$0xf] }
 0x376   : > { %3291 = vmatpush.bf16.msra.mxu1 %v5725_v42  ;;  %v5877_v42 = vor.u32 %v6893_v35, %v5874_v0  ;;  %v5645_v56 = vor.u32 %v6834_v49, %v5642_v29  ;;  %v6892_v35 = vld [vmem:[#allocation12 + $0x1f4] sm:$0xf0]  ;;  %v6870_v0 = vld [vmem:[#allocation12 + $0x14c] sm:$0xf]  ;;  %v5848_v29 = vld [vmem:[#allocation12 + $0x1c8] sm:$0xf] }
 0x377   : > { %3218 = vmatpush.bf16.msrb.mxu0 %v5637_v44  ;;  %v5928_v44 = vld [vmem:[#allocation12 + $0x268] sm:$0xf]  ;;  %v5865_v49 = vor.u32 %v6892_v35, %v5864_v25  ;;  %v5789_v50 = vor.u32 %v6870_v0, %v5786_v41  ;;  %v6896_v0 = vld [vmem:[#allocation12 + $0x214] sm:$0xf0]  ;;  %v6022_v41 = vld [vmem:[#allocation10 + $0xb0] sm:$0xf0] }
 0x378   : > { %3245 = vmatpush.bf16.msra.mxu2 %v5877_v42  ;;  %v6244_v42 = vld [vmem:[#allocation10 + $0x260] sm:$0xf]  ;;  %v5880_v35 = vld [vmem:[#allocation12 + $0x208] sm:$0xf] }
 0x379   : > { %3253 = vmatpush.bf16.msrb.mxu3 %v5705_v31  ;;  %v5621_v31 = vor.u32 %v6829_v27, %v5618_v51  ;;  %v6888_v27 = vld [vmem:[#allocation12 + $0x1d4] sm:$0xf0] }
 0x37a   : > { %3292 = vmatpush.bf16.msra.mxu1 %v5709_v55  ;;  %v6890_v55 = vld [vmem:[#allocation12 + $0x1ec] sm:$0xf] }
 0x37b   : > { %v2363_v7 = vpop.f32.mrf.mxu3  ;;  %v2389_v13 = vpop.f32.mrf.mxu2  ;;  %3219 = vmatpush.bf16.msrb.mxu0 %v5621_v31  ;;  %v5869_v63 = vor.u32 %v6890_v55, %v5866_v60  ;;  %v6823_v55 = vld [vmem:[#allocation10 + $0x24c] sm:$0xf0]  ;;  %v5849_v60 = vor.u32 %v6888_v27, %v5848_v29  ;;  %v6765_v27 = vld [vmem:[#allocation10 + $0x84] sm:$0xf] }
 0x37c   : > { %v2400_v28 = vpop.f32.mrf.mxu0  ;;  %v6882_v7 = vld [vmem:[#allocation12 + $0x1ac] sm:$0xf]  ;;  %v5818_v13 = vld [vmem:[#allocation12 + $0x198] sm:$0xf0] }
 0x37d   : > { %3254 = vmatpush.bf16.msrb.mxu3 %v5689_v38  ;;  %v5850_v38 = vld [vmem:[#allocation12 + $0x1d8] sm:$0xf0] }
 0x37e   : > { %3293 = vmatpush.bf16.msra.mxu1 %v5693_v8  ;;  %v5853_v5 = vor.u32 %v6886_v4, %v5850_v38  ;;  %v5834_v8 = vld [vmem:[#allocation12 + $0x1b8] sm:$0xf0]  ;;  %v6819_v4 = vld [vmem:[#allocation10 + $0x22c] sm:$0xf0]  ;;  %v6777_v38 = vld [vmem:[#allocation10 + $0xe4] sm:$0xf] }
 0x37f   : > { %v5837_v12 = vor.u32 %v6882_v7, %v5834_v8 }
 0x380   : > { %5934 = vmatmul.msk.bf16.vlgmr.msra.gmra.mxu3 %vm581_vm11, %v8595_v18 }
 0x381   : > { %3255 = vmatpush.bf16.msrb.mxu3 %v5673_v21 }
 0x382   : > { %3294 = vmatpush.bf16.msra.mxu1 %v5677_v26 }
 0x384   : > { %v2402_v3 = vpop.f32.mrf.mxu0 }
 0x385   : > { %3256 = vmatpush.bf16.msrb.mxu3 %v5657_v23  ;;  %v6908_v23 = vld [vmem:[#allocation12 + $0x274] sm:$0xf0]  ;;  %v6245_v3 = vor.u32 %v6827_v43, %v6244_v42  ;;  %v6906_v42 = vld [vmem:[#allocation12 + $0x26c] sm:$0xf] }
 0x386   : > { %3295 = vmatpush.bf16.msra.mxu1 %v5661_v48  ;;  %v5929_v31 = vor.u32 %v6908_v23, %v5928_v44  ;;  %v5784_v23 = vld [vmem:[#allocation12 + $0x148] sm:$0xf] }
 0x389   : > { %3257 = vmatpush.bf16.msrb.mxu3 %v5641_v52  ;;  %v6866_v52 = vld [vmem:[#allocation12 + $0x12c] sm:$0xf] }
 0x38a   : > { %3296 = vmatpush.bf16.msra.mxu1 %v5645_v56  ;;  %v5912_v56 = vld [vmem:[#allocation12 + $0x248] sm:$0xf]  ;;  %v5773_v24 = vor.u32 %v6866_v52, %v5770_v53  ;;  %v5914_v52 = vld [vmem:[#allocation12 + $0x258] sm:$0xf0] }
 0x38b   : > { %v2374_v1 = vpop.f32.mrf.mxu1 }
 0x38c   : > { %v2375_v39 = vadd.f32 %v2374_v1, %v2362_v57  ;;  %v6904_v57 = vld [vmem:[#allocation12 + $0x254] sm:$0xf0] }
 0x38d   : > { %3258 = vmatpush.bf16.msrb.mxu3 %v5625_v62  ;;  %v6884_v1 = vld [vmem:[#allocation12 + $0x1b4] sm:$0xf0]  ;;  %v5913_v62 = vor.u32 %v6904_v57, %v5912_v56 }
 0x38e   : > { %v2388_v2 = vadd.f32 %v8588_v37, %v2375_v39  ;;  %3297 = vmatpush.bf16.msra.mxu1 %v5629_v34  ;;  %v6878_v37 = vld [vmem:[#allocation12 + $0x18c] sm:$0xf]  ;;  %v6229_v39 = vor.u32 %v6823_v55, %v6228_v54  ;;  %v5754_v34 = vld [vmem:[#allocation12 + $0x118] sm:$0xf0]  ;;  %v5833_v7 = vor.u32 %v6884_v1, %v5832_v61  ;;  %v5768_v55 = vld [vmem:[#allocation12 + $0x128] sm:$0xf] }
 0x38f   : > { %v5821_v16 = vor.u32 %v6878_v37, %v5818_v13  ;;  %v6196_v37 = vld [vmem:[#allocation10 + $0x200] sm:$0xf]  ;;  %v6868_v57 = vld [vmem:[#allocation12 + $0x134] sm:$0xf0]  ;;  %v6761_v1 = vld [vmem:[#allocation10 + $0x64] sm:$0xf] }
 0x390   : > { %v2401_v40 = vadd.f32 %v2400_v28, %v2388_v2  ;;  %3259 = vmatmul.bf16.vlgmr.msrb.gmra.mxu3 %v8581_v19  ;;  %v5802_v28 = vld [vmem:[#allocation12 + $0x178] sm:$0xf0]  ;;  %v6212_v2 = vld [vmem:[#allocation10 + $0x220] sm:$0xf] }
 0x391   : > { %3303 = vmatpush.bf16.msra.mxu3 %v5869_v63  ;;  %v5805_v26 = vor.u32 %v6874_v17, %v5802_v28  ;;  %v6862_v63 = vld [vmem:[#allocation12 + $0x10c] sm:$0xf]  ;;  %v5800_v28 = vld [vmem:[#allocation12 + $0x168] sm:$0xf] }
 0x392   : > { %v2405_v36 = vmax.f32 %v2401_v40, 0.0  ;;  %v6054_v40 = vld [vmem:[#allocation10 + $0xf0] sm:$0xf0]  ;;  %v5757_v8 = vor.u32 %v6862_v63, %v5754_v34  ;;  %v5898_v63 = vld [vmem:[#allocation12 + $0x238] sm:$0xf0] }
 0x393   : > { %v2376_v9 = vpop.f32.mrf.mxu1 }
 0x394   : > { %2407 = vst [vmem:[#allocation3 + $0x8] sm:$0xf] %v2405_v36  ;;  %v2416_v10 = vsel %vm2408_vm4, %v2405_v36, 0.0  ;;  %v6900_v36 = vld [vmem:[#allocation12 + $0x234] sm:$0xf0]  ;;  %v6213_v9 = vor.u32 %v6819_v4, %v6212_v2 }
 0x395   : > { %v2417_v11 = vrot.slane %v2416_v10, 4  ;;  %3304 = vmatpush.bf16.msra.mxu3 %v5853_v5  ;;  %v5896_v5 = vld [vmem:[#allocation12 + $0x228] sm:$0xf]  ;;  %v6864_v4 = vld [vmem:[#allocation12 + $0x114] sm:$0xf0] }
 0x396   : > { %v5897_v13 = vor.u32 %v6900_v36, %v5896_v5  ;;  %v5752_v2 = vld [vmem:[#allocation12 + $0x108] sm:$0xf]  ;;  %v6134_v5 = vld [vmem:[#allocation10 + $0x190] sm:$0xf0]  ;;  %v6052_v36 = vld [vmem:[#allocation10 + $0xe0] sm:$0xf] }
 0x397   : > { %v2418_v14 = vadd.f32 %v2417_v11, %v2416_v10  ;;  %v6057_v10 = vor.u32 %v6777_v38, %v6054_v40  ;;  %v5816_v11 = vld [vmem:[#allocation12 + $0x188] sm:$0xf]  ;;  %v6797_v40 = vld [vmem:[#allocation10 + $0x184] sm:$0xf] }
 0x399   : > { %v2419_v15 = vrot.slane %v2418_v14, 2  ;;  %3305 = vmatpush.bf16.msra.mxu3 %v5837_v12  ;;  %v6880_v12 = vld [vmem:[#allocation12 + $0x194] sm:$0xf0] }
 0x39a   : > { %v5817_v17 = vor.u32 %v6880_v12, %v5816_v11  ;;  %v6894_v11 = vld [vmem:[#allocation12 + $0x20c] sm:$0xf]  ;;  %v5882_v12 = vld [vmem:[#allocation12 + $0x218] sm:$0xf0] }
 0x39b   : > { %v2420_v20 = vadd.f32 %v2419_v15, %v2418_v14  ;;  %v2582_v21 = vld [vmem:[#allocation3 + $0x8] sm:$0x1f]  ;;  %v6773_v15 = vld [vmem:[#allocation10 + $0xc4] sm:$0xf] }
 0x39c   : > { %v8605_v47 = vpack.c.bf16 %v2582_v21, %v2582_v21  ;;  %v6815_v14 = vld [vmem:[#allocation10 + $0x20c] sm:$0xf0] }
 0x39d   : > { %3306 = vmatpush.bf16.msra.mxu3 %v5821_v16  ;;  %v2421_v30 = vrot.slane %v2420_v20, 1  ;;  %v6038_v16 = vld [vmem:[#allocation10 + $0xd0] sm:$0xf0]  ;;  %v6197_v21 = vor.u32 %v6815_v14, %v6196_v37  ;;  %v5753_v37 = vor.u32 %v6864_v4, %v5752_v2  ;;  %v5988_v4 = vld [vmem:[#allocation10 + $0x60] sm:$0xf] }
 0x39e   : > { %v2757_v33 = vshll.u32 %v8605_v47, 16  ;;  %v2755_v45 = vshrl.u32 %v8605_v47, 16  ;;  %v6041_v25 = vor.u32 %v6773_v15, %v6038_v16  ;;  %v6180_v15 = vld [vmem:[#allocation10 + $0x1e0] sm:$0xf]  ;;  %v6811_v16 = vld [vmem:[#allocation10 + $0x1ec] sm:$0xf0] }
 0x39f   : > { %v2422_v32 = vadd.f32 %v2421_v30, %v2420_v20  ;;  %v6876_v20 = vld [vmem:[#allocation12 + $0x174] sm:$0xf0]  ;;  %v6182_v30 = vld [vmem:[#allocation10 + $0x1f0] sm:$0xf0] }
 0x3a0   : > { %v2759_v46 = vrot.slane %v2757_v33, 1  ;;  %v6769_v33 = vld [vmem:[#allocation10 + $0xa4] sm:$0xf]  ;;  %v5801_v43 = vor.u32 %v6876_v20, %v5800_v28  ;;  %v5885_v20 = vor.u32 %v6894_v11, %v5882_v12  ;;  %v6070_v2 = vld [vmem:[#allocation10 + $0x110] sm:$0xf0] }
 0x3a1   : > { %3307 = vmatpush.bf16.msra.mxu3 %v5805_v26  ;;  %v2424_v48 = vpack.c.bf16 %v2422_v32, %v2422_v32  ;;  %v6809_v26 = vld [vmem:[#allocation10 + $0x1e4] sm:$0xf]  ;;  %v5930_v32 = vld [vmem:[#allocation12 + $0x278] sm:$0xf0]  ;;  %v6116_v12 = vld [vmem:[#allocation10 + $0x160] sm:$0xf] }
 0x3a2   : > { %v8609_v51 = vor.u32 %v2759_v46, %v2755_v45  ;;  %v6185_v44 = vor.u32 %v6809_v26, %v6182_v30  ;;  %v5881_v45 = vor.u32 %v6896_v0, %v5880_v35  ;;  %v6025_v46 = vor.u32 %v6769_v33, %v6022_v41  ;;  %v6793_v28 = vld [vmem:[#allocation10 + $0x164] sm:$0xf]  ;;  %v6775_v26 = vld [vmem:[#allocation10 + $0xcc] sm:$0xf0]  ;;  %v5958_v35 = vld [vmem:[#allocation10 + $0x30] sm:$0xf0] }
 0x3a3   : > { %2575 = vmatmul.bf16.vlgmr.msra.gmra.mxu0 %v2424_v48  ;;  %v6872_v48 = vld [vmem:[#allocation12 + $0x154] sm:$0xf0]  ;;  %v5933_v29 = vor.u32 %v6906_v42, %v5930_v32  ;;  %v6753_v30 = vld [vmem:[#allocation10 + $0x24] sm:$0xf]  ;;  %v6181_v0 = vor.u32 %v6811_v16, %v6180_v15  ;;  %v6164_v42 = vld [vmem:[#allocation10 + $0x1c0] sm:$0xf] }
 0x3a4   : > { %3194 = vmatmul.bf16.vlgmr.msrb.gmra.mxu2 %v8609_v51  ;;  %3233 = vmatmul.bf16.vlgmr.msrb.gmra.mxu1 %v8609_v51  ;;  %v5785_v53 = vor.u32 %v6872_v48, %v5784_v23  ;;  %v6807_v32 = vld [vmem:[#allocation10 + $0x1cc] sm:$0xf0]  ;;  %v6102_v23 = vld [vmem:[#allocation10 + $0x150] sm:$0xf0]  ;;  %v6749_v48 = vld [vmem:[#allocation10 + $0x4] sm:$0xf] }
 0x3a5   : > { %3264 = vmatpush.bf16.msrb.mxu2 %v5865_v49  ;;  %3308 = vmatpush.bf16.msra.mxu3 %v5789_v50  ;;  %v6805_v49 = vld [vmem:[#allocation10 + $0x1c4] sm:$0xf]  ;;  %v6166_v50 = vld [vmem:[#allocation10 + $0x1d0] sm:$0xf0]  ;;  %v6759_v15 = vld [vmem:[#allocation10 + $0x4c] sm:$0xf0] }
 0x3a6   : > { %3761 = vmatpush.bf16.msrb.mxu1 %v6245_v3  ;;  %3281 = vmatpush.bf16.msra.mxu0 %v5929_v31  ;;  %v6006_v3 = vld [vmem:[#allocation10 + $0x90] sm:$0xf0]  ;;  %v6902_v31 = vld [vmem:[#allocation12 + $0x24c] sm:$0xf]  ;;  %v6169_v54 = vor.u32 %v6805_v49, %v6166_v50  ;;  %v6165_v50 = vor.u32 %v6807_v32, %v6164_v42  ;;  %v5956_v42 = vld [vmem:[#allocation10 + $0x20] sm:$0xf] }
 0x3a7   : > { %v6009_v56 = vor.u32 %v6765_v27, %v6006_v3  ;;  %v5917_v61 = vor.u32 %v6902_v31, %v5914_v52  ;;  %v5942_v49 = vld [vmem:[#allocation10 + $0x10] sm:$0xf0]  ;;  %v6828_v27 = vld [vmem:[#allocation10 + $0x274] sm:$0xf0]  ;;  %v6148_v52 = vld [vmem:[#allocation10 + $0x1a0] sm:$0xf] }
 0x3a8   : > { %v6755_v32 = vld [vmem:[#allocation10 + $0x2c] sm:$0xf0] }
 0x3a9   : > { %3265 = vmatpush.bf16.msrb.mxu2 %v5849_v60  ;;  %3309 = vmatpush.bf16.msra.mxu3 %v5773_v24  ;;  %v6801_v60 = vld [vmem:[#allocation10 + $0x1a4] sm:$0xf]  ;;  %v6150_v24 = vld [vmem:[#allocation10 + $0x1b0] sm:$0xf0] }
 0x3aa   : > { %3762 = vmatpush.bf16.msrb.mxu1 %v6229_v39  ;;  %3282 = vmatpush.bf16.msra.mxu0 %v5913_v62  ;;  %v5990_v39 = vld [vmem:[#allocation10 + $0x70] sm:$0xf0]  ;;  %v6898_v62 = vld [vmem:[#allocation12 + $0x22c] sm:$0xf]  ;;  %v6153_v34 = vor.u32 %v6801_v60, %v6150_v24 }
 0x3ab   : > { %v5993_v38 = vor.u32 %v6761_v1, %v5990_v39  ;;  %v6824_v1 = vld [vmem:[#allocation10 + $0x254] sm:$0xf0] }
 0x3ad   : > { %3266 = vmatpush.bf16.msrb.mxu2 %v5833_v7  ;;  %3310 = vmatpush.bf16.msra.mxu3 %v5757_v8  ;;  %v5901_v7 = vor.u32 %v6898_v62, %v5898_v63  ;;  %v6779_v8 = vld [vmem:[#allocation10 + $0xec] sm:$0xf0]  ;;  %v6132_v63 = vld [vmem:[#allocation10 + $0x180] sm:$0xf] }
 0x3ae   : > { %3763 = vmatpush.bf16.msrb.mxu1 %v6213_v9  ;;  %3283 = vmatpush.bf16.msra.mxu0 %v5897_v13  ;;  %v6757_v9 = vld [vmem:[#allocation10 + $0x44] sm:$0xf]  ;;  %v6137_v13 = vor.u32 %v6797_v40, %v6134_v5  ;;  %v6053_v14 = vor.u32 %v6779_v8, %v6052_v36  ;;  %v6778_v5 = vld [vmem:[#allocation10 + $0xec] sm:$0xf]  ;;  %v6062_v36 = vld [vmem:[#allocation10 + $0xf8] sm:$0xf0] }
 0x3af   : > { %v6220_v8 = vld [vmem:[#allocation10 + $0x228] sm:$0xf] }
 0x3b0   : > { %3311 = vmatmul.bf16.vlgmr.msra.gmra.mxu3 %v8609_v51 }
 0x3b1   : > { %3770 = vmatpush.bf16.msrb.mxu3 %v6057_v10  ;;  %3267 = vmatpush.bf16.msrb.mxu2 %v5817_v17  ;;  %v5974_v10 = vld [vmem:[#allocation10 + $0x50] sm:$0xf0] }
 0x3b2   : > { %3764 = vmatpush.bf16.msrb.mxu1 %v6197_v21  ;;  %3284 = vmatpush.bf16.msra.mxu0 %v5881_v45  ;;  %v5977_v17 = vor.u32 %v6757_v9, %v5974_v10  ;;  %v6118_v21 = vld [vmem:[#allocation10 + $0x170] sm:$0xf0]  ;;  %v6020_v45 = vld [vmem:[#allocation10 + $0xa0] sm:$0xf]  ;;  %v6820_v9 = vld [vmem:[#allocation10 + $0x234] sm:$0xf0] }
 0x3b3   : > { %3220 = vmatmul.bf16.vlgmr.msrb.gmra.mxu0 %v8581_v19  ;;  %v6121_v33 = vor.u32 %v6793_v28, %v6118_v21  ;;  %v6221_v16 = vor.u32 %v6820_v9, %v6220_v8  ;;  %v6046_v28 = vld [vmem:[#allocation10 + $0xd8] sm:$0xf0]  ;;  %v6100_v21 = vld [vmem:[#allocation10 + $0x140] sm:$0xf]  ;;  %v6776_v8 = vld [vmem:[#allocation10 + $0xd4] sm:$0xf0] }
 0x3b4   : > { %5935 = vmatmul.msk.bf16.vlgmr.msra.gmra.mxu2 %vm581_vm11, %v8595_v18  ;;  %3298 = vmatmul.bf16.vlgmr.msra.gmra.mxu1 %v8581_v19  ;;  %v5769_v19 = vor.u32 %v6868_v57, %v5768_v55  ;;  %v5945_v55 = vor.u32 %v6749_v48, %v5942_v49  ;;  %v6767_v57 = vld [vmem:[#allocation10 + $0x8c] sm:$0xf0]  ;;  %v6084_v48 = vld [vmem:[#allocation10 + $0x120] sm:$0xf]  ;;  %v5957_v49 = vor.u32 %v6755_v32, %v5956_v42  ;;  %v6188_v42 = vld [vmem:[#allocation10 + $0x1e8] sm:$0xf] }
 0x3b5   : > { %3771 = vmatpush.bf16.msrb.mxu3 %v6041_v25  ;;  %3268 = vmatpush.bf16.msrb.mxu2 %v5801_v43  ;;  %v6036_v25 = vld [vmem:[#allocation10 + $0xc0] sm:$0xf]  ;;  %v6789_v43 = vld [vmem:[#allocation10 + $0x144] sm:$0xf]  ;;  %v6812_v32 = vld [vmem:[#allocation10 + $0x1f4] sm:$0xf0] }
 0x3b6   : > { %3783 = vmatpush.bf16.msra.mxu1 %v6185_v44  ;;  %3320 = vmatpush.bf16.msrb.mxu0 %v5933_v29  ;;  %v6037_v41 = vor.u32 %v6775_v26, %v6036_v25  ;;  %v5961_v44 = vor.u32 %v6753_v30, %v5958_v35  ;;  %v6252_v29 = vld [vmem:[#allocation10 + $0x268] sm:$0xf]  ;;  %v6105_v3 = vor.u32 %v6789_v43, %v6102_v23  ;;  %v6816_v26 = vld [vmem:[#allocation10 + $0x214] sm:$0xf0]  ;;  %v6791_v35 = vld [vmem:[#allocation10 + $0x14c] sm:$0xf0] }
 0x3b7   : > { %v6253_v60 = vor.u32 %v6828_v27, %v6252_v29  ;;  %v6204_v25 = vld [vmem:[#allocation10 + $0x208] sm:$0xf]  ;;  %v6030_v23 = vld [vmem:[#allocation10 + $0xb8] sm:$0xf0]  ;;  %v6806_v29 = vld [vmem:[#allocation10 + $0x1cc] sm:$0xf] }
 0x3b8   : > { %v6205_v43 = vor.u32 %v6816_v26, %v6204_v25  ;;  %v6174_v27 = vld [vmem:[#allocation10 + $0x1d8] sm:$0xf0]  ;;  %v6754_v26 = vld [vmem:[#allocation10 + $0x2c] sm:$0xf] }
 0x3b9   : > { %3772 = vmatpush.bf16.msrb.mxu3 %v6025_v46  ;;  %3269 = vmatpush.bf16.msrb.mxu2 %v5785_v53  ;;  %v6771_v46 = vld [vmem:[#allocation10 + $0xac] sm:$0xf0] }
 0x3ba   : > { %3784 = vmatpush.bf16.msra.mxu1 %v6169_v54  ;;  %3321 = vmatpush.bf16.msrb.mxu0 %v5917_v61  ;;  %v6021_v31 = vor.u32 %v6771_v46, %v6020_v45  ;;  %v6803_v53 = vld [vmem:[#allocation10 + $0x1ac] sm:$0xf0]  ;;  %v6785_v54 = vld [vmem:[#allocation10 + $0x124] sm:$0xf]  ;;  %v6236_v61 = vld [vmem:[#allocation10 + $0x248] sm:$0xf]  ;;  %v6101_v45 = vor.u32 %v6791_v35, %v6100_v21 }
 0x3bb   : > { %v6149_v24 = vor.u32 %v6803_v53, %v6148_v52  ;;  %v6237_v40 = vor.u32 %v6824_v1, %v6236_v61  ;;  %v6751_v52 = vld [vmem:[#allocation10 + $0xc] sm:$0xf0]  ;;  %v6014_v53 = vld [vmem:[#allocation10 + $0x98] sm:$0xf0]  ;;  %v6060_v61 = vld [vmem:[#allocation10 + $0xe8] sm:$0xf] }
 0x3bc   : > { %v6780_v1 = vld [vmem:[#allocation10 + $0xf4] sm:$0xf0]  ;;  %v6126_v35 = vld [vmem:[#allocation10 + $0x178] sm:$0xf0] }
 0x3bd   : > { %3773 = vmatpush.bf16.msrb.mxu3 %v6009_v56  ;;  %3270 = vmatpush.bf16.msrb.mxu2 %v5769_v19  ;;  %v6086_v56 = vld [vmem:[#allocation10 + $0x130] sm:$0xf0]  ;;  %v6799_v19 = vld [vmem:[#allocation10 + $0x18c] sm:$0xf0] }
 0x3be   : > { %3785 = vmatpush.bf16.msra.mxu1 %v6153_v34  ;;  %3322 = vmatpush.bf16.msrb.mxu0 %v5901_v7  ;;  %v6089_v39 = vor.u32 %v6785_v54, %v6086_v56  ;;  %v6781_v34 = vld [vmem:[#allocation10 + $0x104] sm:$0xf]  ;;  %v6133_v7 = vor.u32 %v6799_v19, %v6132_v63  ;;  %v6762_v63 = vld [vmem:[#allocation10 + $0x6c] sm:$0xf] }
 0x3bf   : > { %v6073_v10 = vor.u32 %v6781_v34, %v6070_v2  ;;  %v6825_v54 = vld [vmem:[#allocation10 + $0x264] sm:$0xf]  ;;  %v6802_v19 = vld [vmem:[#allocation10 + $0x1ac] sm:$0xf]  ;;  %v6158_v34 = vld [vmem:[#allocation10 + $0x1b8] sm:$0xf0] }
 0x3c0   : > { %v5998_v2 = vld [vmem:[#allocation10 + $0x78] sm:$0xf0] }
 0x3c1   : > { %3774 = vmatpush.bf16.msrb.mxu3 %v5993_v38  ;;  %3271 = vmatpush.bf16.msrb.mxu2 %v5753_v37  ;;  %v6763_v38 = vld [vmem:[#allocation10 + $0x6c] sm:$0xf0]  ;;  %v6001_v9 = vor.u32 %v6762_v63, %v5998_v2  ;;  %v6760_v63 = vld [vmem:[#allocation10 + $0x54] sm:$0xf0]  ;;  %v6078_v2 = vld [vmem:[#allocation10 + $0x118] sm:$0xf0] }
 0x3c2   : > { %3786 = vmatpush.bf16.msra.mxu1 %v6137_v13  ;;  %3323 = vmatpush.bf16.msrb.mxu0 %v5885_v20  ;;  %v5989_v11 = vor.u32 %v6763_v38, %v5988_v4  ;;  %v6795_v37 = vld [vmem:[#allocation10 + $0x16c] sm:$0xf0]  ;;  %v6065_v13 = vor.u32 %v6778_v5, %v6062_v36  ;;  %v6821_v4 = vld [vmem:[#allocation10 + $0x244] sm:$0xf]  ;;  %v6230_v38 = vld [vmem:[#allocation10 + $0x250] sm:$0xf0]  ;;  %v6061_v5 = vor.u32 %v6780_v1, %v6060_v61 }
 0x3c3   : > { %5936 = vmatmul.msk.bf16.vlgmr.msra.gmra.mxu0 %vm581_vm11, %v8595_v18  ;;  %v6117_v20 = vor.u32 %v6795_v37, %v6116_v12  ;;  %v6161_v36 = vor.u32 %v6802_v19, %v6158_v34  ;;  %v6798_v12 = vld [vmem:[#allocation10 + $0x18c] sm:$0xf]  ;;  %v6142_v37 = vld [vmem:[#allocation10 + $0x198] sm:$0xf0]  ;;  %v6804_v61 = vld [vmem:[#allocation10 + $0x1b4] sm:$0xf0] }
 0x3c4   : > { %3272 = vmatmul.bf16.vlgmr.msrb.gmra.mxu2 %v8609_v51  ;;  %6258 = vmatmul.msk.bf16.vlgmr.msrb.gmra.mxu1 %vm581_vm11, %v8583_v22  ;;  %v6004_v51 = vld [vmem:[#allocation10 + $0x80] sm:$0xf]  ;;  %v6782_v34 = vld [vmem:[#allocation10 + $0x10c] sm:$0xf] }
 0x3c5   : > { %3731 = vmatpush.bf16.msra.mxu2 %v6053_v14  ;;  %3775 = vmatpush.bf16.msrb.mxu3 %v5977_v17  ;;  %v6005_v62 = vor.u32 %v6767_v57, %v6004_v51  ;;  %v5972_v14 = vld [vmem:[#allocation10 + $0x40] sm:$0xf]  ;;  %v6774_v17 = vld [vmem:[#allocation10 + $0xcc] sm:$0xf]  ;;  %v6177_v51 = vor.u32 %v6806_v29, %v6174_v27  ;;  %v6189_v29 = vor.u32 %v6812_v32, %v6188_v42 }
 0x3c6   : > { %3744 = vmatpush.bf16.msra.mxu0 %v6181_v0  ;;  %3787 = vmatpush.bf16.msra.mxu1 %v6121_v33  ;;  %v5973_v30 = vor.u32 %v6759_v15, %v5972_v14  ;;  %v6810_v0 = vld [vmem:[#allocation10 + $0x1ec] sm:$0xf]  ;;  %v6190_v33 = vld [vmem:[#allocation10 + $0x1f8] sm:$0xf0]  ;;  %v6068_v57 = vld [vmem:[#allocation10 + $0x100] sm:$0xf] }
 0x3c7   : > { %v6193_v46 = vor.u32 %v6810_v0, %v6190_v33  ;;  %v6817_v14 = vld [vmem:[#allocation10 + $0x224] sm:$0xf]  ;;  %v6214_v15 = vld [vmem:[#allocation10 + $0x230] sm:$0xf0]  ;;  %v5966_v0 = vld [vmem:[#allocation10 + $0x38] sm:$0xf0] }
 0x3c8   : > { %v6217_v25 = vor.u32 %v6817_v14, %v6214_v15  ;;  %v6813_v33 = vld [vmem:[#allocation10 + $0x204] sm:$0xf]  ;;  %v6750_v27 = vld [vmem:[#allocation10 + $0xc] sm:$0xf]  ;;  %v6752_v14 = vld [vmem:[#allocation10 + $0x14] sm:$0xf0] }
 0x3c9   : > { %3732 = vmatpush.bf16.msra.mxu2 %v6037_v41  ;;  %3776 = vmatpush.bf16.msrb.mxu3 %v5961_v44  ;;  %v6049_v41 = vor.u32 %v6774_v17, %v6046_v28  ;;  %v6770_v44 = vld [vmem:[#allocation10 + $0xac] sm:$0xf]  ;;  %v6145_v17 = vor.u32 %v6798_v12, %v6142_v37  ;;  %v6028_v28 = vld [vmem:[#allocation10 + $0xa8] sm:$0xf] }
 0x3ca   : > { %3745 = vmatpush.bf16.msra.mxu0 %v6165_v50  ;;  %3788 = vmatpush.bf16.msra.mxu1 %v6105_v3  ;;  %v6787_v50 = vld [vmem:[#allocation10 + $0x12c] sm:$0xf0]  ;;  %v6033_v3 = vor.u32 %v6770_v44, %v6030_v23  ;;  %v6012_v23 = vld [vmem:[#allocation10 + $0x88] sm:$0xf] }
 0x3cb   : > { %v6085_v56 = vor.u32 %v6787_v50, %v6084_v48  ;;  %v6768_v48 = vld [vmem:[#allocation10 + $0x94] sm:$0xf0]  ;;  %v6110_v50 = vld [vmem:[#allocation10 + $0x158] sm:$0xf0] }
 0x3cd   : > { %3733 = vmatpush.bf16.msra.mxu2 %v6021_v31  ;;  %3777 = vmatpush.bf16.msrb.mxu3 %v5945_v55  ;;  %v5940_v31 = vld [vmem:[#allocation10] sm:$0xf]  ;;  %v6246_v55 = vld [vmem:[#allocation10 + $0x270] sm:$0xf0] }
 0x3ce   : > { %3746 = vmatpush.bf16.msra.mxu0 %v6149_v24  ;;  %3789 = vmatpush.bf16.msra.mxu1 %v6089_v39  ;;  %v6783_v24 = vld [vmem:[#allocation10 + $0x10c] sm:$0xf0] }
 0x3d0   : > { %3778 = vmatmul.bf16.vlgmr.msrb.gmra.mxu3 %v8573_v59 }
 0x3d1   : > { %3839 = vmatpush.bf16.msra.mxu3 %v6253_v60  ;;  %3734 = vmatpush.bf16.msra.mxu2 %v6005_v62  ;;  %v5941_v60 = vor.u32 %v6751_v52, %v5940_v31  ;;  %v6249_v62 = vor.u32 %v6825_v54, %v6246_v55  ;;  %v6172_v31 = vld [vmem:[#allocation10 + $0x1c8] sm:$0xf]  ;;  %v6808_v52 = vld [vmem:[#allocation10 + $0x1d4] sm:$0xf0] }
 0x3d2   : > { %3747 = vmatpush.bf16.msra.mxu0 %v6133_v7  ;;  %3790 = vmatpush.bf16.msra.mxu1 %v6073_v10  ;;  %v6044_v7 = vld [vmem:[#allocation10 + $0xc8] sm:$0xf]  ;;  %v6233_v10 = vor.u32 %v6821_v4, %v6230_v38 }
 0x3d3   : > { %5937 = vmatmul.msk.bf16.vlgmr.msrb.gmra.mxu0 %vm581_vm11, %v8595_v18  ;;  %v6766_v18 = vld [vmem:[#allocation10 + $0x8c] sm:$0xf]  ;;  %v5996_v55 = vld [vmem:[#allocation10 + $0x68] sm:$0xf] }
 0x3d4   : > { %v6017_v39 = vor.u32 %v6766_v18, %v6014_v53  ;;  %v6013_v18 = vor.u32 %v6768_v48, %v6012_v23  ;;  %v6140_v38 = vld [vmem:[#allocation10 + $0x188] sm:$0xf]  ;;  %v6222_v23 = vld [vmem:[#allocation10 + $0x238] sm:$0xf0] }
 0x3d5   : > { %3840 = vmatpush.bf16.msra.mxu3 %v6237_v40  ;;  %3735 = vmatpush.bf16.msra.mxu2 %v5989_v11  ;;  %v6069_v40 = vor.u32 %v6783_v24, %v6068_v57  ;;  %v6758_v11 = vld [vmem:[#allocation10 + $0x4c] sm:$0xf]  ;;  %v6156_v24 = vld [vmem:[#allocation10 + $0x1a8] sm:$0xf] }
 0x3d6   : > { %3848 = vmatpush.bf16.msrb.mxu1 %v6065_v13  ;;  %3748 = vmatpush.bf16.msra.mxu0 %v6117_v20  ;;  %v5982_v13 = vld [vmem:[#allocation10 + $0x58] sm:$0xf0]  ;;  %v6772_v20 = vld [vmem:[#allocation10 + $0xb4] sm:$0xf0]  ;;  %v6786_v57 = vld [vmem:[#allocation10 + $0x12c] sm:$0xf]  ;;  %v6157_v19 = vor.u32 %v6804_v61, %v6156_v24 }
 0x3d7   : > { %3791 = vmatmul.bf16.vlgmr.msra.gmra.mxu1 %v8605_v47  ;;  %v5985_v21 = vor.u32 %v6758_v11, %v5982_v13  ;;  %v6796_v11 = vld [vmem:[#allocation10 + $0x174] sm:$0xf0]  ;;  %v5948_v13 = vld [vmem:[#allocation10 + $0x8] sm:$0xf] }
 0x3d9   : > { %3841 = vmatpush.bf16.msra.mxu3 %v6221_v16  ;;  %3736 = vmatpush.bf16.msra.mxu2 %v5973_v30  ;;  %v6045_v16 = vor.u32 %v6776_v8, %v6044_v7  ;;  %v6794_v30 = vld [vmem:[#allocation10 + $0x16c] sm:$0xf]  ;;  %v5964_v7 = vld [vmem:[#allocation10 + $0x28] sm:$0xf]  ;;  %v6756_v8 = vld [vmem:[#allocation10 + $0x34] sm:$0xf0] }
 0x3da   : > { %3849 = vmatpush.bf16.msrb.mxu1 %v6049_v41  ;;  %3749 = vmatpush.bf16.msra.mxu0 %v6101_v45  ;;  %v6198_v41 = vld [vmem:[#allocation10 + $0x210] sm:$0xf0]  ;;  %v6129_v44 = vor.u32 %v6794_v30, %v6126_v35  ;;  %v5969_v45 = vor.u32 %v6754_v26, %v5966_v0  ;;  %v5965_v37 = vor.u32 %v6756_v8, %v5964_v7  ;;  %v6822_v35 = vld [vmem:[#allocation10 + $0x24c] sm:$0xf]  ;;  %v6238_v0 = vld [vmem:[#allocation10 + $0x258] sm:$0xf0] }
 0x3db   : > { %v6241_v32 = vor.u32 %v6822_v35, %v6238_v0 }
 0x3dd   : > { %3842 = vmatpush.bf16.msra.mxu3 %v6205_v43  ;;  %3737 = vmatpush.bf16.msra.mxu2 %v5957_v49  ;;  %v6029_v43 = vor.u32 %v6772_v20, %v6028_v28  ;;  %v6790_v49 = vld [vmem:[#allocation10 + $0x14c] sm:$0xf]  ;;  %v6108_v20 = vld [vmem:[#allocation10 + $0x148] sm:$0xf] }
 0x3de   : > { %3850 = vmatpush.bf16.msrb.mxu1 %v6033_v3  ;;  %3750 = vmatpush.bf16.msra.mxu0 %v6085_v56  ;;  %v5950_v3 = vld [vmem:[#allocation10 + $0x18] sm:$0xf0]  ;;  %v6113_v53 = vor.u32 %v6790_v49, %v6110_v50  ;;  %v6764_v56 = vld [vmem:[#allocation10 + $0x74] sm:$0xf0]  ;;  %v6814_v50 = vld [vmem:[#allocation10 + $0x20c] sm:$0xf] }
 0x3df   : > { %v5953_v54 = vor.u32 %v6750_v27, %v5950_v3  ;;  %v5997_v1 = vor.u32 %v6764_v56, %v5996_v55 }
 0x3e0   : > { %6260 = vmatmul.msk.bf16.vlgmr.msra.gmra.mxu3 %vm581_vm11, %v8583_v22 }
 0x3e1   : > { %3861 = vmatpush.bf16.msrb.mxu3 %v6193_v46  ;;  %3738 = vmatpush.bf16.msra.mxu2 %v5941_v60  ;;  %v6201_v46 = vor.u32 %v6813_v33, %v6198_v41  ;;  %v6094_v60 = vld [vmem:[#allocation10 + $0x138] sm:$0xf0]  ;;  %v6092_v33 = vld [vmem:[#allocation10 + $0x128] sm:$0xf]  ;;  %v6788_v41 = vld [vmem:[#allocation10 + $0x134] sm:$0xf0] }
 0x3e2   : > { %3851 = vmatpush.bf16.msrb.mxu1 %v6017_v39  ;;  %3751 = vmatpush.bf16.msra.mxu0 %v6069_v40  ;;  %v6097_v39 = vor.u32 %v6786_v57, %v6094_v60  ;;  %v6800_v40 = vld [vmem:[#allocation10 + $0x194] sm:$0xf0] }
 0x3e4   : > { %3739 = vmatmul.bf16.vlgmr.msra.gmra.mxu2 %v8573_v59 }
 0x3e5   : > { %3862 = vmatpush.bf16.msrb.mxu3 %v6177_v51  ;;  %3800 = vmatpush.bf16.msrb.mxu2 %v6249_v62  ;;  %v6173_v51 = vor.u32 %v6808_v52, %v6172_v31  ;;  %v5980_v62 = vld [vmem:[#allocation10 + $0x48] sm:$0xf]  ;;  %v2457_v52 = vld [vmem:[%s8800_s12] sm:$0x1] }
 0x3e6   : > { %3809 = vmatpush.bf16.msrb.mxu0 %v6061_v5  ;;  %3852 = vmatpush.bf16.msrb.mxu1 %v6001_v9  ;;  %v5981_v5 = vor.u32 %v6760_v63, %v5980_v62  ;;  %v6141_v9 = vor.u32 %v6800_v40, %v6140_v38 }
 0x3e7   : > { %3752 = vmatmul.bf16.vlgmr.msra.gmra.mxu0 %v8605_v47 }
 0x3e9   : > { %3863 = vmatpush.bf16.msrb.mxu3 %v6161_v36  ;;  %3801 = vmatpush.bf16.msrb.mxu2 %v6233_v10  ;;  %v6081_v36 = vor.u32 %v6782_v34, %v6078_v2  ;;  %v6124_v10 = vld [vmem:[#allocation10 + $0x168] sm:$0xf] }
 0x3ea   : > { %3810 = vmatpush.bf16.msrb.mxu0 %v6045_v16  ;;  %3853 = vmatpush.bf16.msrb.mxu1 %v5985_v21  ;;  %v6125_v15 = vor.u32 %v6796_v11, %v6124_v10  ;;  %v6826_v16 = vld [vmem:[#allocation10 + $0x26c] sm:$0xf]  ;;  %v6792_v21 = vld [vmem:[#allocation10 + $0x154] sm:$0xf0] }
 0x3eb   : > { %v6109_v30 = vor.u32 %v6792_v21, %v6108_v20  ;;  %v8662_v20 = vld [vmem:[%s8795_s7] sm:$0xf] }
 0x3ed   : > { %3864 = vmatpush.bf16.msrb.mxu3 %v6145_v17  ;;  %3802 = vmatpush.bf16.msrb.mxu2 %v6217_v25  ;;  %v6254_v17 = vld [vmem:[#allocation10 + $0x278] sm:$0xf0]  ;;  %v5949_v25 = vor.u32 %v6752_v14, %v5948_v13 }
 0x3ee   : > { %3811 = vmatpush.bf16.msrb.mxu0 %v6029_v43  ;;  %3854 = vmatpush.bf16.msrb.mxu1 %v5969_v45  ;;  %v8633_v4 = vpop.f32.mrf.mxu1  ;;  %v6257_v26 = vor.u32 %v6826_v16, %v6254_v17  ;;  %v6093_v43 = vor.u32 %v6788_v41, %v6092_v33  ;;  %v6076_v45 = vld [vmem:[#allocation10 + $0x108] sm:$0xf] }
 0x3f1   : > { %3865 = vmatpush.bf16.msrb.mxu3 %v6129_v44  ;;  %3803 = vmatpush.bf16.msrb.mxu2 %v6201_v46  ;;  %v6818_v44 = vld [vmem:[#allocation10 + $0x22c] sm:$0xf]  ;;  %v6784_v46 = vld [vmem:[#allocation10 + $0x114] sm:$0xf0] }
 0x3f2   : > { %3812 = vmatpush.bf16.msrb.mxu0 %v6013_v18  ;;  %3855 = vmatpush.bf16.msrb.mxu1 %v5953_v54  ;;  %v6225_v48 = vor.u32 %v6818_v44, %v6222_v23  ;;  %v6077_v49 = vor.u32 %v6784_v46, %v6076_v45  ;;  %v3890_v46 = vperm.slane %v8662_v20, 1 }
 0x3f3   : > { %v2563_v12 = vpop.f32.mrf.mxu3 }
 0x3f4   : > { %6259 = vmatmul.msk.bf16.vlgmr.msrb.gmra.mxu2 %vm581_vm11, %v8583_v22 }
 0x3f5   : > { %3822 = vmatpush.bf16.msra.mxu2 %v6189_v29  ;;  %3866 = vmatpush.bf16.msrb.mxu3 %v6113_v53  ;;  %v6206_v29 = vld [vmem:[#allocation10 + $0x218] sm:$0xf0]  ;;  %v2564_v53 = vadd.f32 %v2563_v12, %v2457_v52 }
 0x3f6   : > { %3813 = vmatpush.bf16.msrb.mxu0 %v5997_v1  ;;  %3856 = vmatmul.bf16.vlgmr.msrb.gmra.mxu1 %v8573_v59  ;;  %v3184_v28 = vpop.f32.mrf.mxu1  ;;  %v6209_v3 = vor.u32 %v6814_v50, %v6206_v29 }
 0x3f9   : > { %3823 = vmatpush.bf16.msra.mxu2 %v6173_v51  ;;  %3867 = vmatpush.bf16.msrb.mxu3 %v6097_v39 }
 0x3fa   : > { %3814 = vmatpush.bf16.msrb.mxu0 %v5981_v5 }
 0x3fb   : > { %v2565_v42 = vpop.f32.mrf.mxu3 }
 0x3fd   : > { %3824 = vmatpush.bf16.msra.mxu2 %v6157_v19  ;;  %3868 = vmatpush.bf16.msrb.mxu3 %v6081_v36 }
 0x3fe   : > { %3815 = vmatpush.bf16.msrb.mxu0 %v5965_v37 }
 0x400   : > { %3869 = vmatmul.bf16.vlgmr.msrb.gmra.mxu3 %v8605_v47 }
 0x401   : > { %3825 = vmatpush.bf16.msra.mxu2 %v6141_v9 }
 0x402   : > { %3816 = vmatpush.bf16.msrb.mxu0 %v5949_v25 }
 0x403   : > { %v3208_v27 = vpop.f32.mrf.mxu3 }
 0x405   : > { %3826 = vmatpush.bf16.msra.mxu2 %v6125_v15  ;;  %3817 = vmatmul.bf16.vlgmr.msrb.gmra.mxu0 %v8573_v59 }
 0x406   : > { %3878 = vmatpush.bf16.msra.mxu0 %v6257_v26  ;;  %v3889_v26 = vperm.slane %v8662_v20, 0 }
 0x409   : > { %3827 = vmatpush.bf16.msra.mxu2 %v6109_v30 }
 0x40a   : > { %3879 = vmatpush.bf16.msra.mxu0 %v6241_v32 }
 0x40b   : > { %v3210_v31 = vpop.f32.mrf.mxu3 }
 0x40c   : > { %v6392_v31 = vld [vmem:[#allocation15 + $0x100] sm:$0xf] }
 0x40d   : > { %3828 = vmatpush.bf16.msra.mxu2 %v6093_v43 }
 0x40e   : > { %3880 = vmatpush.bf16.msra.mxu0 %v6225_v48 }
 0x411   : > { %3829 = vmatpush.bf16.msra.mxu2 %v6077_v49 }
 0x412   : > { %3881 = vmatpush.bf16.msra.mxu0 %v6209_v3  ;;  %v6980_v3 = vld [vmem:[#allocation15 + $0x114] sm:$0xf0] }
 0x413   : > { %v3260_v59 = vpop.f32.mrf.mxu3 }
 0x414   : > { %3830 = vmatmul.bf16.vlgmr.msra.gmra.mxu2 %v8605_v47 }
 0x415   : > { %6261 = vmatmul.msk.bf16.vlgmr.msra.gmra.mxu0 %vm581_vm11, %v8583_v22 }
 0x41b   : > { %v3262_v18 = vpop.f32.mrf.mxu3 }
 0x420   : > { %v2576_v54 = vpop.f32.mrf.mxu0 }
 0x421   : > { %v2577_v55 = vadd.f32 %v2576_v54, %v2564_v53  ;;  %v3234_v56 = vpop.f32.mrf.mxu1  ;;  %v6978_v53 = vld [vmem:[#allocation15 + $0x104] sm:$0xf0]  ;;  %v6384_v54 = vld [vmem:[#allocation15 + $0xf0] sm:$0xf] }
 0x423   : > { %2580 = vst [vmem:[%s8647_s18] sm:$0x1] %v2577_v55  ;;  %v6976_v55 = vld [vmem:[#allocation15 + $0xf4] sm:$0xf0] }
 0x427   : > { %v3195_v47 = vpop.f32.mrf.mxu2 }
 0x428   : > { %v3196_v51 = vadd.f32 %v3195_v47, %v8633_v4  ;;  %v2578_v22 = vpop.f32.mrf.mxu0  ;;  %v6386_v47 = vld [vmem:[#allocation15 + $0xf8] sm:$0xf0] }
 0x429   : > { %v3236_v57 = vpop.f32.mrf.mxu1  ;;  %v6393_v22 = vor.u32 %v6978_v53, %v6392_v31 }
 0x42a   : > { %v3209_v60 = vadd.f32 %v3208_v27, %v3196_v51  ;;  %v6400_v27 = vld [vmem:[#allocation15 + $0x110] sm:$0xf]  ;;  %v6385_v57 = vor.u32 %v6976_v55, %v6384_v54  ;;  %v6954_v54 = vld [vmem:[#allocation15 + $0x44] sm:$0xf0]  ;;  %v6953_v55 = vld [vmem:[#allocation15 + $0x44] sm:$0xf] }
 0x42b   : > { %v6401_v18 = vor.u32 %v6980_v3, %v6400_v27  ;;  %v6306_v3 = vld [vmem:[#allocation15 + $0x58] sm:$0xf0] }
 0x42c   : > { %4273 = vmatpush.bf16.msrb.mxu0 %v6385_v57  ;;  %v6354_v57 = vld [vmem:[#allocation15 + $0xb8] sm:$0xf0] }
 0x42d   : > { %4292 = vmatpush.bf16.msra.mxu1 %v6401_v18  ;;  %v6296_v18 = vld [vmem:[#allocation15 + $0x40] sm:$0xf] }
 0x42f   : > { %v3197_v24 = vpop.f32.mrf.mxu2 }
 0x430   : > { %v3221_v61 = vpop.f32.mrf.mxu0  ;;  %v6974_v24 = vld [vmem:[#allocation15 + $0xe4] sm:$0xf0] }
 0x431   : > { %v3299_v1 = vpop.f32.mrf.mxu1  ;;  %v3235_v0 = vadd.f32 %v3234_v56, %v3221_v61  ;;  %v6975_v56 = vld [vmem:[#allocation15 + $0xf4] sm:$0xf]  ;;  %4293 = vmatpush.bf16.msra.mxu1 %v6393_v22 }
 0x432   : > { %v6389_v58 = vor.u32 %v6975_v56, %v6386_v47  ;;  %v6298_v56 = vld [vmem:[#allocation15 + $0x48] sm:$0xf0]  ;;  %v6967_v22 = vld [vmem:[#allocation15 + $0xb4] sm:$0xf] }
 0x433   : > { %v3312_v39 = vpop.f32.mrf.mxu3 }
 0x434   : > { %v8651_v62 = vadd.f32 %v3312_v39, %v3299_v1  ;;  %v6973_v1 = vld [vmem:[#allocation15 + $0xe4] sm:$0xf] }
 0x435   : > { %4312 = vmatpush.bf16.msrb.mxu1 %v6389_v58  ;;  %v6301_v58 = vor.u32 %v6953_v55, %v6298_v56  ;;  %v6923_v56 = vld [vmem:[#allocation13 + $0x74] sm:$0xf] }
 0x437   : > { %v3247_v63 = vpop.f32.mrf.mxu2 }
 0x438   : > { %v3223_v19 = vpop.f32.mrf.mxu0  ;;  %v3248_v32 = vadd.f32 %v3247_v63, %v3235_v0 }
 0x439   : > { %v3301_v34 = vpop.f32.mrf.mxu1 }
 0x43a   : > { %v6378_v34 = vld [vmem:[#allocation15 + $0xe8] sm:$0xf0] }
 0x43b   : > { %v3314_v2 = vpop.f32.mrf.mxu3 }
 0x43c   : > { %v6368_v2 = vld [vmem:[#allocation15 + $0xd0] sm:$0xf] }
 0x43f   : > { %v3249_v38 = vpop.f32.mrf.mxu2 }
 0x440   : > { %v3286_v40 = vpop.f32.mrf.mxu0  ;;  %v6972_v38 = vld [vmem:[#allocation15 + $0xd4] sm:$0xf0] }
 0x441   : > { %v3766_v5 = vpop.f32.mrf.mxu1 }
 0x447   : > { %v3273_v36 = vpop.f32.mrf.mxu2 }
 0x448   : > { %v3274_v7 = vadd.f32 %v3273_v36, %v3260_v59  ;;  %v3288_v8 = vpop.f32.mrf.mxu0  ;;  %v6960_v36 = vld [vmem:[#allocation15 + $0x74] sm:$0xf0] }
 0x449   : > { %v3768_v4 = vpop.f32.mrf.mxu1  ;;  %v6322_v8 = vld [vmem:[#allocation15 + $0x78] sm:$0xf0] }
 0x44a   : > { %v8653_v9 = vadd.f32 %v3286_v40, %v3274_v7  ;;  %v6959_v7 = vld [vmem:[#allocation15 + $0x74] sm:$0xf]  ;;  %v6381_v4 = vor.u32 %v6973_v1, %v6378_v34  ;;  %v6288_v1 = vld [vmem:[#allocation15 + $0x30] sm:$0xf] }
 0x44b   : > { %v6951_v34 = vld [vmem:[#allocation15 + $0x34] sm:$0xf] }
 0x44c   : > { %4313 = vmatpush.bf16.msrb.mxu1 %v6381_v4 }
 0x44f   : > { %v3275_v10 = vpop.f32.mrf.mxu2 }
 0x450   : > { %v8655_v11 = vpop.f32.mrf.mxu0  ;;  %v6971_v10 = vld [vmem:[#allocation15 + $0xd4] sm:$0xf] }
 0x451   : > { %v3326_v47 = vadd.f32 %v8655_v11, %v8651_v62  ;;  %v6357_v62 = vor.u32 %v6967_v22, %v6354_v57  ;;  %v6922_v22 = vld [vmem:[#allocation13 + $0x64] sm:$0xf0] }
 0x453   : > { %v3779_v12 = vpop.f32.mrf.mxu3 }
 0x454   : > { %v3792_v37 = vpop.f32.mrf.mxu1  ;;  %v3780_v44 = vadd.f32 %v3779_v12, %v3248_v32  ;;  %v6370_v12 = vld [vmem:[#allocation15 + $0xd8] sm:$0xf0] }
 0x456   : > { %v3793_v45 = vadd.f32 %v3792_v37, %v3780_v44 }
 0x458   : > { %v3327_v13 = vpop.f32.mrf.mxu0 }
 0x459   : > { %v6325_v13 = vor.u32 %v6959_v7, %v6322_v8  ;;  %v6965_v8 = vld [vmem:[#allocation15 + $0xa4] sm:$0xf] }
 0x45b   : > { %v3781_v14 = vpop.f32.mrf.mxu3  ;;  %4299 = vmatpush.bf16.msra.mxu3 %v6325_v13 }
 0x45c   : > { %v3794_v15 = vpop.f32.mrf.mxu1  ;;  %v6360_v14 = vld [vmem:[#allocation15 + $0xc0] sm:$0xf] }
 0x45d   : > { %v6369_v15 = vor.u32 %v6972_v38, %v6368_v2  ;;  %v6290_v2 = vld [vmem:[#allocation15 + $0x38] sm:$0xf0]  ;;  %v3892_v38 = vperm.slane %v8662_v20, 3 }
 0x463   : > { %v8657_v17 = vpop.f32.mrf.mxu3 }
 0x464   : > { %v3753_v16 = vpop.f32.mrf.mxu0 }
 0x467   : > { %v3740_v28 = vpop.f32.mrf.mxu2 }
 0x468   : > { %v3741_v21 = vadd.f32 %v3740_v28, %v3209_v60  ;;  %v6376_v60 = vld [vmem:[#allocation15 + $0xe0] sm:$0xf] }
 0x469   : > { %v6377_v19 = vor.u32 %v6974_v24, %v6376_v60  ;;  %v6312_v28 = vld [vmem:[#allocation15 + $0x60] sm:$0xf]  ;;  %v6966_v24 = vld [vmem:[#allocation15 + $0xa4] sm:$0xf0] }
 0x46a   : > { %v3754_v25 = vadd.f32 %v3753_v16, %v3741_v21  ;;  %v6970_v16 = vld [vmem:[#allocation15 + $0xc4] sm:$0xf0]  ;;  %v6344_v60 = vld [vmem:[#allocation15 + $0xa0] sm:$0xf] }
 0x46b   : > { %v3846_v41 = vpop.f32.mrf.mxu3  ;;  %4274 = vmatpush.bf16.msrb.mxu0 %v6377_v19  ;;  %v6958_v21 = vld [vmem:[#allocation15 + $0x64] sm:$0xf0]  ;;  %v6361_v44 = vor.u32 %v6970_v16, %v6360_v14  ;;  %v6952_v19 = vld [vmem:[#allocation15 + $0x34] sm:$0xf0]  ;;  %v6345_v7 = vor.u32 %v6966_v24, %v6344_v60  ;;  %v6293_v14 = vor.u32 %v6951_v34, %v6290_v2 }
 0x46c   : > { %v3767_v30 = vadd.f32 %v3766_v5, %v3754_v25  ;;  %v3755_v35 = vpop.f32.mrf.mxu0  ;;  %v6320_v5 = vld [vmem:[#allocation15 + $0x70] sm:$0xf]  ;;  %v6969_v41 = vld [vmem:[#allocation15 + $0xc4] sm:$0xf]  ;;  %v6289_v13 = vor.u32 %v6952_v19, %v6288_v1  ;;  %v6950_v16 = vld [vmem:[#allocation15 + $0x24] sm:$0xf0] }
 0x46d   : > { %v6321_v37 = vor.u32 %v6960_v36, %v6320_v5  ;;  %v6314_v35 = vld [vmem:[#allocation15 + $0x68] sm:$0xf0]  ;;  %v3891_v36 = vperm.slane %v8662_v20, 2  ;;  %v6946_v19 = vld [vmem:[#allocation15 + $0x4] sm:$0xf0] }
 0x46e   : > { %v3897_v33 = vadd.f32 %v3889_v26, %v3767_v30  ;;  %v6313_v26 = vor.u32 %v6958_v21, %v6312_v28  ;;  %v6957_v30 = vld [vmem:[#allocation15 + $0x64] sm:$0xf]  ;;  %v8699_v21 = vld [vmem:[#allocation4 + $0x10] sm:$0xff] }
 0x46f   : > { %v3742_v42 = vpop.f32.mrf.mxu2  ;;  %4260 = vmatpush.bf16.msrb.mxu2 %v6321_v37  ;;  %v6317_v0 = vor.u32 %v6957_v30, %v6314_v35  ;;  %4275 = vmatpush.bf16.msrb.mxu0 %v6369_v15  ;;  %v6964_v37 = vld [vmem:[#allocation15 + $0x94] sm:$0xf0]  ;;  %v6949_v28 = vld [vmem:[#allocation15 + $0x24] sm:$0xf]  ;;  %v6338_v35 = vld [vmem:[#allocation15 + $0x98] sm:$0xf0] }
 0x470   : > { %v8665_v43 = vmax.f32 %v3897_v33, 0.0  ;;  %v6373_v33 = vor.u32 %v6971_v10, %v6370_v12  ;;  %v6362_v42 = vld [vmem:[#allocation15 + $0xc8] sm:$0xf0]  ;;  %v6336_v12 = vld [vmem:[#allocation15 + $0x90] sm:$0xf] }
 0x471   : > { %4300 = vmatpush.bf16.msra.mxu3 %v6317_v0  ;;  %v6365_v53 = vor.u32 %v6969_v41, %v6362_v42  ;;  %v6337_v30 = vor.u32 %v6964_v37, %v6336_v12  ;;  %v6328_v0 = vld [vmem:[#allocation15 + $0x80] sm:$0xf]  ;;  %v6466_v41 = vld [vmem:[#allocation13 + $0x70] sm:$0xf]  ;;  %v6924_v42 = vld [vmem:[#allocation13 + $0x74] sm:$0xf0] }
 0x472   : > { %3922 = vst [vmem:[#allocation1] sm:$0xff] %v8665_v43  ;;  %4314 = vmatpush.bf16.msrb.mxu1 %v6373_v33  ;;  %v6962_v33 = vld [vmem:[#allocation15 + $0x84] sm:$0xf0]  ;;  %v6921_v37 = vld [vmem:[#allocation13 + $0x64] sm:$0xf] }
 0x473   : > { %v8668_v23 = vpop.f32.mrf.mxu1  ;;  %4261 = vmatpush.bf16.msrb.mxu2 %v6313_v26  ;;  %4276 = vmatpush.bf16.msrb.mxu0 %v6361_v44  ;;  %v6329_v55 = vor.u32 %v6962_v33, %v6328_v0 }
 0x476   : > { %4315 = vmatpush.bf16.msrb.mxu1 %v6365_v53 }
 0x477   : > { %v3805_v48 = vpop.f32.mrf.mxu2 }
 0x478   : > { %v3806_v49 = vadd.f32 %v3805_v48, %v3793_v45  ;;  %v6304_v45 = vld [vmem:[#allocation15 + $0x50] sm:$0xf]  ;;  %v6955_v48 = vld [vmem:[#allocation15 + $0x54] sm:$0xf] }
 0x479   : > { %v6309_v31 = vor.u32 %v6955_v48, %v6306_v3  ;;  %v6330_v3 = vld [vmem:[#allocation15 + $0x88] sm:$0xf0] }
 0x47a   : > { %v3898_v50 = vadd.f32 %v3890_v46, %v3806_v49  ;;  %v6956_v46 = vld [vmem:[#allocation15 + $0x54] sm:$0xf0]  ;;  %4316 = vmatpush.bf16.msrb.mxu1 %v6357_v62  ;;  %v6266_v62 = vld [vmem:[#allocation15 + $0x8] sm:$0xf0] }
 0x47b   : > { %v3859_v29 = vpop.f32.mrf.mxu1  ;;  %v6305_v27 = vor.u32 %v6956_v46, %v6304_v45  ;;  %4301 = vmatpush.bf16.msra.mxu3 %v6309_v31  ;;  %v6272_v45 = vld [vmem:[#allocation15 + $0x10] sm:$0xf]  ;;  %v6947_v31 = vld [vmem:[#allocation15 + $0x14] sm:$0xf] }
 0x47c   : > { %v8671_v59 = vmax.f32 %v3898_v50, 0.0  ;;  %v6352_v50 = vld [vmem:[#allocation15 + $0xb0] sm:$0xf]  ;;  %v6968_v29 = vld [vmem:[#allocation15 + $0xb4] sm:$0xf0] }
 0x47d   : > { %4262 = vmatpush.bf16.msrb.mxu2 %v6305_v27  ;;  %v6961_v27 = vld [vmem:[#allocation15 + $0x84] sm:$0xf] }
 0x47e   : > { %v3907_v51 = vrot.slane %v8671_v59, 7  ;;  %3923 = vst [vmem:[#allocation1 + $0x9] sm:$0xff] %v8671_v59 }
 0x47f   : > { %v3807_v61 = vpop.f32.mrf.mxu2  ;;  %4302 = vmatpush.bf16.msra.mxu3 %v6301_v58  ;;  %v6467_v58 = vor.u32 %v6924_v42, %v6466_v41  ;;  %v6917_v41 = vld [vmem:[#allocation13 + $0x44] sm:$0xf]  ;;  %v6444_v42 = vld [vmem:[#allocation13 + $0x48] sm:$0xf0] }
 0x480   : > { %v3908_v39 = vsel %vm1268_vm10, %v8665_v43, %v3907_v51  ;;  %v6353_v51 = vor.u32 %v6968_v29, %v6352_v50  ;;  %v6297_v61 = vor.u32 %v6954_v54, %v6296_v18  ;;  %v6948_v50 = vld [vmem:[#allocation15 + $0x14] sm:$0xf0]  ;;  %v6274_v18 = vld [vmem:[#allocation15 + $0x18] sm:$0xf0] }
 0x481   : > { %3912 = vst.msk [vmem:[#allocation4] ss:$8 sm:$0x3] %vm8674_vm6, %v3908_v39  ;;  %v3858_v39 = vadd.f32 %v8668_v23, %v3326_v47  ;;  %v6346_v23 = vld [vmem:[#allocation15 + $0xa8] sm:$0xf0]  ;;  %v6273_v1 = vor.u32 %v6948_v50, %v6272_v45  ;;  %v6277_v2 = vor.u32 %v6947_v31, %v6274_v18 }
 0x482   : > { %v8686_v40 = vpop.f32.mrf.mxu0  ;;  %4277 = vmatpush.bf16.msrb.mxu0 %v6353_v51  ;;  %4263 = vmatpush.bf16.msrb.mxu2 %v6297_v61  ;;  %v6349_v20 = vor.u32 %v6965_v8, %v6346_v23  ;;  %v6468_v47 = vld [vmem:[#allocation13 + $0x78] sm:$0xf0]  ;;  %v6458_v51 = vld [vmem:[#allocation13 + $0x60] sm:$0xf]  ;;  %v6546_v8 = vld [vmem:[#allocation13 + $0x110] sm:$0xf] }
 0x483   : > { %v8682_v63 = vpop.f32.mrf.mxu3  ;;  %v3819_v5 = vadd.f32 %v8686_v40, %v8653_v9  ;;  %v6282_v9 = vld [vmem:[#allocation15 + $0x28] sm:$0xf0]  ;;  %v6963_v40 = vld [vmem:[#allocation15 + $0x94] sm:$0xf]  ;;  %4303 = vmatpush.bf16.msra.mxu3 %v6293_v14  ;;  %v6944_v23 = vld [vmem:[#allocation13 + $0x114] sm:$0xf0]  ;;  %v6459_v12 = vor.u32 %v6922_v22, %v6458_v51 }
 0x484   : > { %v3871_v11 = vadd.f32 %v8682_v63, %v3858_v39  ;;  %v6285_v44 = vor.u32 %v6949_v28, %v6282_v9  ;;  %4317 = vmatpush.bf16.msrb.mxu1 %v6349_v20  ;;  %v6341_v29 = vor.u32 %v6963_v40, %v6338_v35  ;;  %v6264_v39 = vld [vmem:[#allocation15] sm:$0xf]  ;;  %v6450_v14 = vld [vmem:[#allocation13 + $0x50] sm:$0xf]  ;;  %v6547_v28 = vor.u32 %v6944_v23, %v6546_v8  ;;  %v6919_v9 = vld [vmem:[#allocation13 + $0x54] sm:$0xf] }
 0x485   : > { %v3925_v25 = vld [vmem:[#allocation1 + $0x1] ss:$9 sm:$0xff]  ;;  %v6918_v35 = vld [vmem:[#allocation13 + $0x44] sm:$0xf0] }
 0x486   : > { %3928 = vst.msk [vmem:[#allocation4 + $0x2] ss:$8 sm:$0x3] %vm8674_vm6, %v3925_v25  ;;  %4278 = vmatpush.bf16.msrb.mxu0 %v6345_v7  ;;  %4264 = vmatpush.bf16.msrb.mxu2 %v6289_v13  ;;  %v6402_v7 = vld [vmem:[#allocation15 + $0x118] sm:$0xf0] }
 0x487   : > { %4304 = vmatpush.bf16.msra.mxu3 %v6285_v44  ;;  %v6460_v13 = vld [vmem:[#allocation13 + $0x68] sm:$0xf0]  ;;  %v6916_v31 = vld [vmem:[#allocation13 + $0x34] sm:$0xf0]  ;;  %v6914_v51 = vld [vmem:[#allocation13 + $0x24] sm:$0xf0] }
 0x488   : > { %4318 = vmatpush.bf16.msrb.mxu1 %v6341_v29  ;;  %v6463_v20 = vor.u32 %v6921_v37, %v6460_v13  ;;  %v6538_v29 = vld [vmem:[#allocation13 + $0x100] sm:$0xf]  ;;  %v6913_v22 = vld [vmem:[#allocation13 + $0x24] sm:$0xf]  ;;  %v6530_v13 = vld [vmem:[#allocation13 + $0xf0] sm:$0xf] }
 0x48a   : > { %v3820_v49 = vpop.f32.mrf.mxu0  ;;  %4279 = vmatpush.bf16.msrb.mxu0 %v6337_v30 }
 0x48b   : > { %v3872_v32 = vpop.f32.mrf.mxu3  ;;  %v3975_v49 = vld [vmem:[#allocation4 + $0x28] sm:$0x1]  ;;  %4305 = vmatpush.bf16.msra.mxu3 %v6277_v2 }
 0x48c   : > { %v6281_v32 = vor.u32 %v6950_v16, %v6280_v6  ;;  %v6920_v6 = vld [vmem:[#allocation13 + $0x54] sm:$0xf0]  ;;  %v6910_v2 = vld [vmem:[#allocation13 + $0x4] sm:$0xf0] }
 0x48d   : > { %v6451_v40 = vor.u32 %v6920_v6, %v6450_v14  ;;  %v6940_v14 = vld [vmem:[#allocation13 + $0xf4] sm:$0xf0]  ;;  %v6939_v6 = vld [vmem:[#allocation13 + $0xf4] sm:$0xf] }
 0x48e   : > { %4265 = vmatpush.bf16.msrb.mxu2 %v6281_v32  ;;  %4280 = vmatpush.bf16.msrb.mxu0 %v6329_v55  ;;  %v6447_v32 = vor.u32 %v6917_v41, %v6444_v42  ;;  %v6436_v55 = vld [vmem:[#allocation13 + $0x38] sm:$0xf0]  ;;  %v6524_v41 = vld [vmem:[#allocation13 + $0xe8] sm:$0xf0] }
 0x492   : > { %v3883_v4 = vpop.f32.mrf.mxu0  ;;  %4521 = vmatpush.bf16.msra.mxu0 %v6467_v58  ;;  %4266 = vmatpush.bf16.msrb.mxu2 %v6273_v1  ;;  %v6911_v1 = vld [vmem:[#allocation13 + $0x14] sm:$0xf] }
 0x493   : > { %v3884_v15 = vadd.f32 %v3883_v4, %v3871_v11 }
 0x495   : > { %v3900_v25 = vadd.f32 %v3892_v38, %v3884_v15  ;;  %v6945_v38 = vld [vmem:[#allocation15 + $0x4] sm:$0xf]  ;;  %v6265_v15 = vor.u32 %v6946_v19, %v6264_v39  ;;  %v6420_v39 = vld [vmem:[#allocation13 + $0x18] sm:$0xf0] }
 0x496   : > { %4522 = vmatpush.bf16.msra.mxu0 %v6459_v12  ;;  %v6423_v19 = vor.u32 %v6911_v1, %v6420_v39  ;;  %v6490_v1 = vld [vmem:[#allocation13 + $0xa0] sm:$0xf]  ;;  %v6930_v39 = vld [vmem:[#allocation13 + $0xa4] sm:$0xf0] }
 0x497   : > { %v3831_v10 = vpop.f32.mrf.mxu2  ;;  %v8702_v46 = vmax.f32 %v3900_v25, 0.0  ;;  %v6452_v25 = vld [vmem:[#allocation13 + $0x58] sm:$0xf0]  ;;  %4267 = vmatpush.bf16.msrb.mxu2 %v6265_v15 }
 0x498   : > { %v3832_v63 = vadd.f32 %v3831_v10, %v3819_v5  ;;  %v6979_v5 = vld [vmem:[#allocation15 + $0x114] sm:$0xf]  ;;  %v6471_v10 = vor.u32 %v6923_v56, %v6468_v47  ;;  %v6455_v0 = vor.u32 %v6919_v9, %v6452_v25  ;;  %v6426_v47 = vld [vmem:[#allocation13 + $0x20] sm:$0xf]  ;;  %v6532_v15 = vld [vmem:[#allocation13 + $0xf8] sm:$0xf0] }
 0x499   : > { %v3916_v53 = vrot.slane %v8702_v46, 7  ;;  %3931 = vst [vmem:[#allocation1 + $0x9] sm:$0xff] %v8702_v46  ;;  %v6405_v16 = vor.u32 %v6979_v5, %v6402_v7 }
 0x49a   : > { %v3845_v26 = vadd.f32 %v8657_v17, %v3832_v63  ;;  %v4017_v17 = vpack.c.bf16 %v3975_v49, %v8699_v21  ;;  %v3885_v57 = vpop.f32.mrf.mxu0  ;;  %v6269_v63 = vor.u32 %v6945_v38, %v6266_v62  ;;  %4523 = vmatpush.bf16.msra.mxu0 %v6451_v40  ;;  %v6394_v49 = vld [vmem:[#allocation15 + $0x108] sm:$0xf0]  ;;  %v6909_v62 = vld [vmem:[#allocation13 + $0x4] sm:$0xf] }
 0x49b   : > { %4331 = vmatpush.bf16.msra.mxu2 %v6405_v16 }
 0x49c   : > { %v3899_v48 = vadd.f32 %v3891_v36, %v3845_v26  ;;  %v4069_v24 = vshrl.u32 %v4017_v17, 16  ;;  %v4071_v61 = vshll.u32 %v4017_v17, 16  ;;  %v6333_v36 = vor.u32 %v6961_v27, %v6330_v3  ;;  %v6442_v26 = vld [vmem:[#allocation13 + $0x40] sm:$0xf]  ;;  %4306 = vmatpush.bf16.msra.mxu3 %v6269_v63  ;;  %v6942_v17 = vld [vmem:[#allocation13 + $0x104] sm:$0xf0] }
 0x49d   : > { %v6443_v33 = vor.u32 %v6918_v35, %v6442_v26  ;;  %v6434_v27 = vld [vmem:[#allocation13 + $0x30] sm:$0xf]  ;;  %v6539_v3 = vor.u32 %v6942_v17, %v6538_v29  ;;  %v6943_v63 = vld [vmem:[#allocation13 + $0x114] sm:$0xf]  ;;  %v6531_v26 = vor.u32 %v6940_v14, %v6530_v13  ;;  %v6522_v35 = vld [vmem:[#allocation13 + $0xe0] sm:$0xf] }
 0x49e   : > { %v8706_v54 = vmax.f32 %v3899_v48, 0.0  ;;  %v4073_v11 = vrot.slane %v4071_v61, 1  ;;  %4319 = vmatpush.bf16.msrb.mxu1 %v6333_v36  ;;  %v6977_v48 = vld [vmem:[#allocation15 + $0x104] sm:$0xf]  ;;  %v6435_v18 = vor.u32 %v6916_v31, %v6434_v27  ;;  %v6912_v61 = vld [vmem:[#allocation13 + $0x14] sm:$0xf0] }
 0x49f   : > { %v3833_v60 = vpop.f32.mrf.mxu2  ;;  %4524 = vmatpush.bf16.msra.mxu0 %v6443_v33  ;;  %v6397_v50 = vor.u32 %v6977_v48, %v6394_v49  ;;  %v6937_v33 = vld [vmem:[#allocation13 + $0xe4] sm:$0xf]  ;;  %v6514_v49 = vld [vmem:[#allocation13 + $0xd0] sm:$0xf]  ;;  %v6935_v29 = vld [vmem:[#allocation13 + $0xd4] sm:$0xf] }
 0x4a0   : > { %v3917_v34 = vsel %vm1268_vm10, %v8706_v54, %v3916_v53  ;;  %3930 = vst [vmem:[#allocation1] sm:$0xff] %v8706_v54  ;;  %v8714_v4 = vor.u32 %v4073_v11, %v4069_v24  ;;  %4553 = vmatpush.bf16.msrb.mxu3 %v6547_v28  ;;  %v6915_v53 = vld [vmem:[#allocation13 + $0x34] sm:$0xf]  ;;  %v6418_v24 = vld [vmem:[#allocation13 + $0x10] sm:$0xf]  ;;  %v6527_v48 = vor.u32 %v6937_v33, %v6524_v41 }
 0x4a1   : > { %3920 = vst.msk [vmem:[#allocation4 + $0x1] ss:$8 sm:$0x3] %vm8674_vm6, %v3917_v34  ;;  %4332 = vmatpush.bf16.msra.mxu2 %v6397_v50  ;;  %v6439_v56 = vor.u32 %v6915_v53, %v6436_v55  ;;  %v6419_v58 = vor.u32 %v6912_v61, %v6418_v24  ;;  %v6410_v34 = vld [vmem:[#allocation13] sm:$0xf] }
 0x4a2   : > { %6406 = vmatmul.msk.bf16.vlgmr.msra.gmra.mxu1 %vm593_vm5, %v8714_v4  ;;  %v6411_v38 = vor.u32 %v6910_v2, %v6410_v34  ;;  %v6412_v11 = vld [vmem:[#allocation13 + $0x8] sm:$0xf0]  ;;  %v6936_v50 = vld [vmem:[#allocation13 + $0xd4] sm:$0xf0]  ;;  %v6516_v17 = vld [vmem:[#allocation13 + $0xd8] sm:$0xf0]  ;;  %v6491_v2 = vor.u32 %v6930_v39, %v6490_v1 }
 0x4a3   : > { %4560 = vmatpush.bf16.msra.mxu1 %v6471_v10  ;;  %4525 = vmatpush.bf16.msra.mxu0 %v6435_v18  ;;  %v6415_v5 = vor.u32 %v6909_v62, %v6412_v11  ;;  %v6519_v31 = vor.u32 %v6935_v29, %v6516_v17  ;;  %v6506_v18 = vld [vmem:[#allocation13 + $0xc0] sm:$0xf]  ;;  %v6934_v53 = vld [vmem:[#allocation13 + $0xc4] sm:$0xf0]  ;;  %v6933_v55 = vld [vmem:[#allocation13 + $0xc4] sm:$0xf] }
 0x4a4   : > { %4554 = vmatpush.bf16.msrb.mxu3 %v6539_v3  ;;  %v6515_v3 = vor.u32 %v6936_v50, %v6514_v49  ;;  %v6492_v34 = vld [vmem:[#allocation13 + $0xa8] sm:$0xf0]  ;;  %v6928_v62 = vld [vmem:[#allocation13 + $0x94] sm:$0xf0]  ;;  %v6927_v11 = vld [vmem:[#allocation13 + $0x94] sm:$0xf] }
 0x4a7   : > { %v3933_v30 = vld [vmem:[#allocation1 + $0x1] ss:$9 sm:$0xff]  ;;  %4561 = vmatpush.bf16.msra.mxu1 %v6463_v20 }
 0x4a8   : > { %3936 = vst.msk [vmem:[#allocation4 + $0x3] ss:$8 sm:$0x3] %vm8674_vm6, %v3933_v30  ;;  %v6548_v20 = vld [vmem:[#allocation13 + $0x118] sm:$0xf0]  ;;  %v6535_v30 = vor.u32 %v6939_v6, %v6532_v15 }
 0x4a9   : > { %3938 = vst [vmem:[#allocation1] sm:$0xff] %v8665_v43  ;;  %v6551_v42 = vor.u32 %v6943_v63, %v6548_v20 }
 0x4aa   : > { %3939 = vst [vmem:[#allocation1 + $0x9] sm:$0xff] %v8671_v59 }
 0x4ab   : > { %4562 = vmatpush.bf16.msra.mxu1 %v6455_v0  ;;  %v6938_v0 = vld [vmem:[#allocation13 + $0xe4] sm:$0xf0] }
 0x4af   : > { %4563 = vmatpush.bf16.msra.mxu1 %v6447_v32  ;;  %v6941_v32 = vld [vmem:[#allocation13 + $0x104] sm:$0xf] }
 0x4b1   : > { %v3941_v44 = vld [vmem:[#allocation1 + $0x2] ss:$9 sm:$0xff] }
 0x4b2   : > { %3944 = vst.msk [vmem:[#allocation4 + $0x4] ss:$8 sm:$0x3] %vm8674_vm6, %v3941_v44  ;;  %v6540_v44 = vld [vmem:[#allocation13 + $0x108] sm:$0xf0] }
 0x4b3   : > { %3946 = vst [vmem:[#allocation1] sm:$0xff] %v8706_v54  ;;  %4564 = vmatpush.bf16.msra.mxu1 %v6439_v56  ;;  %v6543_v27 = vor.u32 %v6941_v32, %v6540_v44  ;;  %v6508_v56 = vld [vmem:[#allocation13 + $0xc8] sm:$0xf0] }
 0x4b4   : > { %3947 = vst [vmem:[#allocation1 + $0x9] sm:$0xff] %v8702_v46 }
 0x4bb   : > { %v3949_v45 = vld [vmem:[#allocation1 + $0x2] ss:$9 sm:$0xff] }
 0x4bc   : > { %3952 = vst.msk [vmem:[#allocation4 + $0x5] ss:$8 sm:$0x3] %vm8674_vm6, %v3949_v45  ;;  %v6523_v45 = vor.u32 %v6938_v0, %v6522_v35 }
 0x4bd   : > { %3954 = vst [vmem:[#allocation1] sm:$0xff] %v8665_v43  ;;  %v6427_v43 = vor.u32 %v6914_v51, %v6426_v47  ;;  %v6507_v47 = vor.u32 %v6934_v53, %v6506_v18  ;;  %v6511_v51 = vor.u32 %v6933_v55, %v6508_v56 }
 0x4be   : > { %3955 = vst [vmem:[#allocation1 + $0x9] sm:$0xff] %v8671_v59  ;;  %v6428_v59 = vld [vmem:[#allocation13 + $0x28] sm:$0xf0] }
 0x4bf   : > { %v6431_v60 = vor.u32 %v6913_v22, %v6428_v59  ;;  %4526 = vmatpush.bf16.msra.mxu0 %v6427_v43  ;;  %v6498_v43 = vld [vmem:[#allocation13 + $0xb0] sm:$0xf]  ;;  %v6932_v22 = vld [vmem:[#allocation13 + $0xb4] sm:$0xf0]  ;;  %v6931_v59 = vld [vmem:[#allocation13 + $0xb4] sm:$0xf] }
 0x4c0   : > { %v6499_v61 = vor.u32 %v6932_v22, %v6498_v43 }
 0x4c1   : > { %4565 = vmatpush.bf16.msra.mxu1 %v6431_v60  ;;  %v3978_v60 = vpack.c.bf16 %v8699_v21, %v8699_v21 }
 0x4c3   : > { %4527 = vmatpush.bf16.msra.mxu0 %v6419_v58 }
 0x4c5   : > { %v3957_v57 = vld [vmem:[#allocation1 + $0x3] ss:$9 sm:$0xff]  ;;  %4566 = vmatpush.bf16.msra.mxu1 %v6423_v19 }
 0x4c6   : > { %3960 = vst.msk [vmem:[#allocation4 + $0x6] ss:$8 sm:$0x3] %vm8674_vm6, %v3957_v57  ;;  %v6500_v57 = vld [vmem:[#allocation13 + $0xb8] sm:$0xf0] }
 0x4c7   : > { %3962 = vst [vmem:[#allocation1] sm:$0xff] %v8706_v54  ;;  %4528 = vmatpush.bf16.msra.mxu0 %v6411_v38  ;;  %v3974_v54 = vld [vmem:[#allocation4 + $0x20] sm:$0x1]  ;;  %v6503_v58 = vor.u32 %v6931_v59, %v6500_v57  ;;  %v6929_v19 = vld [vmem:[#allocation13 + $0xa4] sm:$0xf] }
 0x4c8   : > { %3963 = vst [vmem:[#allocation1 + $0x9] sm:$0xff] %v8702_v46  ;;  %v3973_v46 = vld [vmem:[#allocation4 + $0x18] sm:$0x1]  ;;  %v6495_v21 = vor.u32 %v6929_v19, %v6492_v34  ;;  %v6482_v38 = vld [vmem:[#allocation13 + $0x90] sm:$0xf] }
 0x4c9   : > { %4567 = vmatpush.bf16.msra.mxu1 %v6415_v5  ;;  %v6484_v5 = vld [vmem:[#allocation13 + $0x98] sm:$0xf0] }
 0x4cf   : > { %v3965_v36 = vld [vmem:[#allocation1 + $0x3] ss:$9 sm:$0xff] }
 0x4d0   : > { %3968 = vst.msk [vmem:[#allocation4 + $0x7] ss:$8 sm:$0x3] %vm8674_vm6, %v3965_v36  ;;  %v6483_v36 = vor.u32 %v6928_v62, %v6482_v38 }
 0x4d7   : > { %v3970_v7 = vld [vmem:[#allocation4] sm:$0xff]  ;;  %v8736_v8 = vld [vmem:[#allocation4 + $0x8] sm:$0xff] }
 0x4d8   : > { %v4015_v23 = vpack.c.bf16 %v3973_v46, %v3970_v7  ;;  %v4016_v10 = vpack.c.bf16 %v3974_v54, %v8736_v8  ;;  %v3976_v24 = vpack.c.bf16 %v3970_v7, %v3970_v7  ;;  %v6487_v46 = vor.u32 %v6927_v11, %v6484_v5  ;;  %v6474_v54 = vld [vmem:[#allocation13 + $0x80] sm:$0xf]  ;;  %v6925_v7 = vld [vmem:[#allocation13 + $0x84] sm:$0xf] }
 0x4da   : > { %v4057_v12 = vshll.u32 %v4015_v23, 16  ;;  %v4064_v37 = vshll.u32 %v4016_v10, 16  ;;  %v4055_v16 = vshrl.u32 %v4015_v23, 16  ;;  %v4062_v52 = vshrl.u32 %v4016_v10, 16  ;;  %v6476_v23 = vld [vmem:[#allocation13 + $0x88] sm:$0xf0] }
 0x4dc   : > { %v4059_v28 = vrot.slane %v4057_v12, 1  ;;  %v4066_v9 = vrot.slane %v4064_v37, 1  ;;  %v6479_v12 = vor.u32 %v6925_v7, %v6476_v23  ;;  %v3977_v37 = vpack.c.bf16 %v8736_v8, %v8736_v8 }
 0x4de   : > { %v4060_v40 = vor.u32 %v4059_v28, %v4055_v16  ;;  %v4067_v25 = vor.u32 %v4066_v9, %v4062_v52 }
 0x4e0   : > { %4268 = vmatmul.bf16.vlgmr.msrb.gmra.mxu2 %v4060_v40  ;;  %4281 = vmatmul.bf16.vlgmr.msrb.gmra.mxu0 %v4067_v25 }
 0x4e1   : > { %4307 = vmatmul.bf16.vlgmr.msra.gmra.mxu3 %v4060_v40  ;;  %4320 = vmatmul.bf16.vlgmr.msrb.gmra.mxu1 %v4067_v25 }
 0x4e2   : > { %4534 = vmatpush.bf16.msrb.mxu2 %v6531_v26  ;;  %4573 = vmatpush.bf16.msra.mxu3 %v6535_v30 }
 0x4e3   : > { %4592 = vmatpush.bf16.msrb.mxu0 %v6551_v42 }
 0x4e6   : > { %4535 = vmatpush.bf16.msrb.mxu2 %v6523_v45  ;;  %4574 = vmatpush.bf16.msra.mxu3 %v6527_v48 }
 0x4e7   : > { %4593 = vmatpush.bf16.msrb.mxu0 %v6543_v27 }
 0x4ea   : > { %4536 = vmatpush.bf16.msrb.mxu2 %v6515_v3  ;;  %4575 = vmatpush.bf16.msra.mxu3 %v6519_v31 }
 0x4ee   : > { %4537 = vmatpush.bf16.msrb.mxu2 %v6507_v47  ;;  %4576 = vmatpush.bf16.msra.mxu3 %v6511_v51 }
 0x4f0   : > { %6407 = vmatmul.msk.bf16.vlgmr.msra.gmra.mxu2 %vm593_vm5, %v8714_v4  ;;  %4529 = vmatmul.bf16.vlgmr.msra.gmra.mxu0 %v3976_v24  ;;  %v6926_v4 = vld [vmem:[#allocation13 + $0x84] sm:$0xf0] }
 0x4f1   : > { %6552 = vmatmul.msk.bf16.vlgmr.msrb.gmra.mxu3 %vm593_vm5, %v3978_v60  ;;  %4568 = vmatmul.bf16.vlgmr.msra.gmra.mxu1 %v3976_v24  ;;  %v6475_v10 = vor.u32 %v6926_v4, %v6474_v54 }
 0x4f2   : > { %4538 = vmatpush.bf16.msrb.mxu2 %v6499_v61  ;;  %4577 = vmatpush.bf16.msra.mxu3 %v6503_v58 }
 0x4f6   : > { %4539 = vmatpush.bf16.msrb.mxu2 %v6491_v2  ;;  %4578 = vmatpush.bf16.msra.mxu3 %v6495_v21 }
 0x4fa   : > { %4540 = vmatpush.bf16.msrb.mxu2 %v6483_v36  ;;  %4579 = vmatpush.bf16.msra.mxu3 %v6487_v46 }
 0x4fe   : > { %4541 = vmatpush.bf16.msrb.mxu2 %v6475_v10  ;;  %4580 = vmatpush.bf16.msra.mxu3 %v6479_v12 }
 0x500   : > { %6553 = vmatmul.msk.bf16.vlgmr.msrb.gmra.mxu0 %vm593_vm5, %v3978_v60 }
 0x501   : > { %4542 = vmatmul.bf16.vlgmr.msrb.gmra.mxu2 %v3977_v37  ;;  %4581 = vmatmul.bf16.vlgmr.msra.gmra.mxu3 %v3977_v37 }
 0x51f   : > { %v4295_v13 = vpop.f32.mrf.mxu1 }
 0x520   : > { %7308 = shalt.err (!%p7305_p8)
}
 0x521   : > { %7006 = dma.vmem_to_hbm [thread:$0]  (%p7490_p5), %s4664_s10, 16, %s4666_s14, %s4648_s25  }
 0x522   : > { %s8854_s19 = sld [smem:[#allocation33_spill]]  ;;  %s6558_s18 = sshll.u32 %s7563_s1, 4 }
 0x523   : > { %s8855_s16 = sld [smem:[#allocation35_spill]] }
 0x527   : > { %v4297_v8 = vpop.f32.mrf.mxu1 }
 0x528   : > { %v4599_v48 = vld [vmem:[%s8854_s19] sm:$0x3] }
 0x529   : > { %v4601_v3 = vperm.slane %v4599_v48, 0  ;;  %v4602_v18 = vperm.slane %v4599_v48, 1  ;;  %s577_s28 = scalar_lea.vmem %s8855_s16, %s6558_s18 }
 0x55d   : > { %v4282_v14 = vpop.f32.mrf.mxu0 }
 0x55e   : > { %v4321_v6 = vpop.f32.mrf.mxu1 }
 0x563   : > { %v4269_v15 = vpop.f32.mrf.mxu2 }
 0x564   : > { %v4308_v63 = vpop.f32.mrf.mxu3  ;;  %v4283_v41 = vadd.f32 %v4282_v14, %v4269_v15 }
 0x565   : > { %v4284_v16 = vpop.f32.mrf.mxu0  ;;  %v4322_v42 = vadd.f32 %v4321_v6, %v4308_v63 }
 0x566   : > { %v4323_v28 = vpop.f32.mrf.mxu1  ;;  %v4296_v45 = vadd.f32 %v4295_v13, %v4283_v41 }
 0x56b   : > { %v4271_v52 = vpop.f32.mrf.mxu2 }
 0x56c   : > { %v4310_v9 = vpop.f32.mrf.mxu3 }
 0x56d   : > { %v4530_v20 = vpop.f32.mrf.mxu0 }
 0x56e   : > { %v4569_v40 = vpop.f32.mrf.mxu1  ;;  %v4531_v49 = vadd.f32 %v4530_v20, %v4296_v45 }
 0x573   : > { %v4334_v25 = vpop.f32.mrf.mxu2 }
 0x574   : > { %v4556_v26 = vpop.f32.mrf.mxu3  ;;  %v4335_v44 = vadd.f32 %v4334_v25, %v4322_v42 }
 0x575   : > { %v4532_v30 = vpop.f32.mrf.mxu0 }
 0x576   : > { %v4571_v35 = vpop.f32.mrf.mxu1  ;;  %v4570_v50 = vadd.f32 %v4569_v40, %v4335_v44 }
 0x57b   : > { %v4336_v0 = vpop.f32.mrf.mxu2 }
 0x57c   : > { %v4558_v33 = vpop.f32.mrf.mxu3 }
 0x57d   : > { %v4595_v32 = vpop.f32.mrf.mxu0 }
 0x584   : > { %v4543_v29 = vpop.f32.mrf.mxu2  ;;  %v4582_v17 = vpop.f32.mrf.mxu3 }
 0x585   : > { %v4544_v27 = vadd.f32 %v4543_v29, %v4531_v49  ;;  %v4583_v31 = vadd.f32 %v4582_v17, %v4570_v50  ;;  %v4597_v53 = vpop.f32.mrf.mxu0 }
 0x587   : > { %v4557_v55 = vadd.f32 %v4556_v26, %v4544_v27  ;;  %v4596_v56 = vadd.f32 %v4595_v32, %v4583_v31 }
 0x589   : > { %v4605_v47 = vadd.f32 %v4601_v3, %v4557_v55  ;;  %v4606_v51 = vadd.f32 %v4602_v18, %v4596_v56 }
 0x58b   : > { %v6554_v43 = vmul.f32 -1.442695, %v4605_v47  ;;  %v6555_v22 = vmul.f32 -1.442695, %v4606_v51 }
 0x58c   : > { %v4545_v59 = vpop.f32.mrf.mxu2  ;;  %v4584_v57 = vpop.f32.mrf.mxu3 }
 0x58d   : > { %7092 = vpow2.f32 %v6554_v43 }
 0x58e   : > { %7094 = vpow2.f32 %v6555_v22 }
 0x593   : > { %v7093_v60 = vpop.eup %7092 }
 0x594   : > { %v7095_v24 = vpop.eup %7094  ;;  %v4613_v61 = vadd.f32 1.0, %v7093_v60 }
 0x595   : > { %v4614_v58 = vadd.f32 1.0, %v7095_v24 }
 0x596   : > { %7096 = vrcp.f32 %v4613_v61  ;;  %v4626_v21 = vand.u32 2147483648, %v4613_v61  ;;  %v4624_v11 = vand.u32 2147483647, %v4613_v61  ;;  %vm4620_vm9 = vweird.f32 %v4613_v61 }
 0x597   : > { %7098 = vrcp.f32 %v4614_v58  ;;  %v4641_v5 = vand.u32 2147483648, %v4614_v58  ;;  %v4639_v46 = vand.u32 2147483647, %v4614_v58  ;;  %vm4635_vm11 = vweird.f32 %v4614_v58 }
 0x598   : > { %v4627_v4 = vor.u32 1.1754944e-38, %v4626_v21  ;;  %vm4625_vm12 = vcmp.eq.f32.partialorder %v4624_v11, 8.507059e+37 }
 0x599   : > { %v4642_v10 = vor.u32 1.1754944e-38, %v4641_v5  ;;  %vm4640_vm14 = vcmp.eq.f32.partialorder %v4639_v46, 8.507059e+37 }
 0x59c   : > { %v7097_v1 = vpop.eup %7096 }
 0x59d   : > { %v7099_v39 = vpop.eup %7098  ;;  %v4616_v19 = vmul.f32 %v7097_v1, %v4613_v61  ;;  %vm4621_vm5 = vweird.f32 %v7097_v1 }
 0x59e   : > { %v4631_v34 = vmul.f32 %v7099_v39, %v4614_v58  ;;  %vm4636_vm8 = vweird.f32 %v7099_v39  ;;  %vm4622_vm10 = vmor %vm4620_vm9, %vm4621_vm5 }
 0x59f   : > { %v4617_v2 = vsub.f32 1.0, %v4616_v19  ;;  %vm4637_vm13 = vmor %vm4635_vm11, %vm4636_vm8 }
 0x5a0   : > { %v4632_v38 = vsub.f32 1.0, %v4631_v34 }
 0x5a1   : > { %v4618_v62 = vmul.f32 %v7097_v1, %v4617_v2 }
 0x5a2   : > { %v4633_v36 = vmul.f32 %v7099_v39, %v4632_v38 }
 0x5a3   : > { %v4619_v54 = vadd.f32 %v7097_v1, %v4618_v62 }
 0x5a4   : > { %v4634_v7 = vadd.f32 %v7099_v39, %v4633_v36 }
 0x5a5   : > { %v4623_v23 = vsel %vm4622_vm10, %v7097_v1, %v4619_v54 }
 0x5a6   : > { %v4628_v12 = vsel %vm4625_vm12, %v4627_v4, %v4623_v23  ;;  %v4638_v37 = vsel %vm4637_vm13, %v7099_v39, %v4634_v7 }
 0x5a7   : > { %4645 = vst [vmem:[%s577_s28] sm:$0xff] %v4628_v12  ;;  %v4643_v13 = vsel %vm4640_vm14, %v4642_v10, %v4638_v37 }
 0x5a8   : > { %4646 = vst [vmem:[%s577_s28 + $0x8] sm:$0xff] %v4643_v13 }
 0x5a9 PF: > { %s8856_s1 = sld [smem:[#allocation26_spill]] }
 0x5aa   : > { %s8857_s24 = sld [smem:[#allocation24_spill]] }
 0x5af   : > { %p7043_p5 = scmp.ge.s32.totalorder %s8856_s1, 2 }
 0x5b0   : > { %s4680_s14 = sand.u32 1, %s8857_s24  }
 0x5b1   : > { %p7028_p9 = pnand %p7043_p5, %p7494_p6  ;;  %s4681_s25 = scalar_lea.sflag [#allocation9], %s4680_s14 }
 0x5b3   : > { %p7029_p10 = pneg %p7028_p9 }
 0x5b5   : > { %7342 = dma.done.wait (%p7029_p10), %s4681_s25, 16  }
 0x5b6   : > { %7344 = vsyncadd (%p7029_p10), %s4681_s25, 4294967280  ;;  %s8859_s16 = sld [smem:[#allocation27_spill]]  ;;  %s8862_s29 = smov %s7351_s30 }
 0x5b7   : > { %s8860_s21 = sld [smem:[#allocation25_spill]] }
 0x5b8   : > { %s8861_s15 = sld [smem:[#allocation28_spill]] }
 0x5bc   : > { %p29_p11 = scmp.ge.s32.totalorder %s8859_s16, 4  }
 0x5bd   : > { %s8863_s30 = smov %s8860_s21 }
 0x5be   :  { %31 = sbr.rel (!%p29_p11) target bundleno = 14 (0xe), region = 225 }
 0x5c3   :  { %4694 = vsyncpa [#allocation8], 1 }
 0x5c4   :  { %4696 = vsyncpa [#allocation8 + $0x1], 1 }
 0x5c5   :  { %4697 = vsyncpa [#allocation11], 1 }
 0x5c6   :  { %4698 = vsyncpa [#allocation14], 1 }
 0x5c7   :  { %4699 = vsyncpa [#allocation17], 1 }
 0x5c8   :  { %4700 = vsyncpa [#allocation9], 1 }
 0x5c9   :  { %4702 = vsyncpa [#allocation9 + $0x1], 1 }

</bundles_post_ra>
